<compile_context>
chip_gen: v7x
topology: tpu7x:2x2x1
jax: 0.10.0
libtpu: 0.0.40
codegen_flags: <defaults>
</compile_context>

<pallas_src>
import functools
import math

import jax
import jax.numpy as jnp
from jax import lax
from jax.experimental import pallas as pl
from jax.experimental.pallas import tpu as pltpu


@functools.lru_cache(maxsize=None)
def _vmem_limit_bytes():
    """Generation-aware scoped-VMEM budget (~48 MiB on v7x, ~96 MiB on v5e/v6e)."""
    cap = None
    try:
        cap = getattr(pltpu.get_tpu_info(), "vmem_capacity_bytes", None)
    except Exception:
        cap = None
    if not cap:
        cap = 64 * 1024 * 1024  # conservative default (v7x per-TC capacity)
    return int(max(min(cap - 16 * 1024 * 1024, 96 * 1024 * 1024), 32 * 1024 * 1024))


def _pick_tile(dim, candidates=(512, 256, 128, 64, 32, 16, 8)):
    """Largest candidate that divides `dim`, else the full dim (always legal).

    TODO(synk): non-divisible large dims fall back to a single full-size tile;
    a padded / masked edge-tile scheme would be needed for such shapes.
    """
    for c in candidates:
        if dim % c == 0:
            return c
    return dim


# --------------------------- tiled linear kernel ---------------------------- #

def _linear_kernel(x_ref, w_ref, o_ref, acc_ref):
    @pl.when(pl.program_id(2) == 0)
    def _():
        acc_ref[...] = jnp.zeros_like(acc_ref)

    acc_ref[...] += jnp.dot(x_ref[...], w_ref[...],
                            preferred_element_type=jnp.float32)

    @pl.when(pl.program_id(2) == pl.num_programs(2) - 1)
    def _():
        o_ref[...] = acc_ref[...].astype(o_ref.dtype)


def pallas_linear(x2d, w, out_dtype=None):
    """x2d: (M, K) @ w: (K, Cout) -> (M, Cout), f32 accumulation (no bias)."""
    M, K = x2d.shape
    K2, Cout = w.shape
    assert K == K2
    out_dtype = x2d.dtype if out_dtype is None else out_dtype

    tm = _pick_tile(M)
    tn = _pick_tile(Cout)
    tk = _pick_tile(K)
    grid = (M // tm, Cout // tn, K // tk)

    itemsize = jnp.dtype(x2d.dtype).itemsize
    cost = pl.CostEstimate(
        flops=2 * M * K * Cout,
        transcendentals=0,
        bytes_accessed=itemsize * (M * K + K * Cout)
        + jnp.dtype(out_dtype).itemsize * M * Cout,
    )

    return pl.pallas_call(
        _linear_kernel,
        grid=grid,
        in_specs=[pl.BlockSpec((tm, tk), lambda i, j, k: (i, k)),
                  pl.BlockSpec((tk, tn), lambda i, j, k: (k, j))],
        out_specs=pl.BlockSpec((tm, tn), lambda i, j, k: (i, j)),
        out_shape=jax.ShapeDtypeStruct((M, Cout), out_dtype),
        scratch_shapes=[pltpu.VMEM((tm, tn), jnp.float32)],
        compiler_params=pltpu.CompilerParams(
            dimension_semantics=("parallel", "parallel", "arbitrary"),
            vmem_limit_bytes=_vmem_limit_bytes()),
        cost_estimate=cost,
    )(x2d, w)


# ------------- fused joint-attention + output-projection kernel ------------- #

def _dual_attn_kernel(q_ref, kvx_ref, kvq_ref, pw_ref, pb_ref, o_ref,
                      m_sc, l_sc, acc_sc, *, num_heads, head_dim, nkx,
                      approx_recip):
    """One (batch, query-row-tile, kv-tile) step, all heads, online softmax.

    q_ref  : (1, tq,  C)   query rows, 1/sqrt(Dh) already folded into weights
    kvx_ref: (1, tkx, 2C)  x-derived   K|V tile (k cols [0,C), v cols [C,2C))
    kvq_ref: (1, tkq, 2C)  query-derived K|V tile
    pw_ref : (C, C), pb_ref: (1, C)  fused output projection
    o_ref  : (1, tq, C)    lane-dense output, already (B, seq, C) layout
    """
    H, Dh = num_heads, head_dim
    C = H * Dh
    k_step = pl.program_id(2)
    n_kv = pl.num_programs(2)

    @pl.when(k_step == 0)
    def _():
        m_sc[...] = jnp.full(m_sc.shape, -jnp.inf, m_sc.dtype)
        l_sc[...] = jnp.zeros(l_sc.shape, l_sc.dtype)
        acc_sc[...] = jnp.zeros(acc_sc.shape, acc_sc.dtype)

    dn = (((1,), (1,)), ((), ()))  # contract last dims: q @ k^T w/o transposing k

    def online_update(kv_ref):
        for h in range(H):
            q_h = q_ref[0, :, h * Dh:(h + 1) * Dh]            # (tq, Dh)
            k_h = kv_ref[0, :, h * Dh:(h + 1) * Dh]           # (tk, Dh)
            v_h = kv_ref[0, :, C + h * Dh:C + (h + 1) * Dh]   # (tk, Dh)
            s = lax.dot_general(q_h, k_h, dn,
                                preferred_element_type=jnp.float32)  # (tq, tk)
            m_prev = m_sc[:, h:h + 1]
            m_new = jnp.maximum(m_prev, jnp.max(s, axis=-1, keepdims=True))
            alpha = jnp.exp(m_prev - m_new)
            p = jnp.exp(s - m_new)
            l_sc[:, h:h + 1] = alpha * l_sc[:, h:h + 1] + jnp.sum(
                p, axis=-1, keepdims=True)
            pv = jnp.dot(p.astype(v_h.dtype), v_h,
                         preferred_element_type=jnp.float32)
            acc_sc[:, h * Dh:(h + 1) * Dh] = (
                alpha * acc_sc[:, h * Dh:(h + 1) * Dh] + pv)
            m_sc[:, h:h + 1] = m_new

    @pl.when(k_step < nkx)
    def _():
        online_update(kvx_ref)

    @pl.when(k_step >= nkx)
    def _():
        online_update(kvq_ref)

    @pl.when(k_step == n_kv - 1)
    def _():
        # normalize in place, then fused output projection + bias, single store
        for h in range(H):
            inv = pl.reciprocal(l_sc[:, h:h + 1], approx=approx_recip)
            acc_sc[:, h * Dh:(h + 1) * Dh] = acc_sc[:, h * Dh:(h + 1) * Dh] * inv
        attn = acc_sc[...].astype(pw_ref.dtype)                       # (tq, C)
        out = jnp.dot(attn, pw_ref[...], preferred_element_type=jnp.float32)
        out = out + pb_ref[...].astype(jnp.float32)
        o_ref[0] = out.astype(o_ref.dtype)


def _pick_kv_tile(s_kv, c, itemsize, budget_bytes):
    """Keep the whole KV resident (one fetch per batch) when it comfortably fits,
    otherwise flash-tile the KV sequence so VMEM stays O(tkv * 2C)."""
    if s_kv <= 2048 and s_kv * 2 * c * itemsize * 2 <= budget_bytes:
        return s_kv
    return _pick_tile(s_kv, (512, 256, 128))


def pallas_dual_attention(q, kv_x, kv_q, proj_w, proj_b, num_heads,
                          out_dtype=None):
    """softmax(q [xK ; qK]^T) [xV ; qV] @ proj_w + proj_b (per head), fused.

    q: (B, Sq, C) pre-scaled query rows; kv_x: (B, N, 2C), kv_q: (B, Nq, 2C)
    fused K|V projections; proj_w: (C, C); proj_b: (1, C).
    Returns (B, Sq, C) already in sequence-major layout.
    """
    B, Sq, C = q.shape
    _, Nx, C2 = kv_x.shape
    _, Nqk, _ = kv_q.shape
    assert C2 == 2 * C
    Dh = C // num_heads
    out_dtype = q.dtype if out_dtype is None else out_dtype

    vmem_budget = _vmem_limit_bytes()
    itemsize = jnp.dtype(q.dtype).itemsize
    tq = _pick_tile(Sq, (256, 128, 64, 32, 16, 8))
    tkx = _pick_kv_tile(Nx, C, itemsize, vmem_budget // 8)
    tkq = _pick_kv_tile(Nqk, C, itemsize, vmem_budget // 8)
    nkx, nkq = Nx // tkx, Nqk // tkq

    kernel = functools.partial(
        _dual_attn_kernel, num_heads=num_heads, head_dim=Dh, nkx=nkx,
        approx_recip=(jnp.dtype(q.dtype) != jnp.dtype(jnp.float32)))

    S = Nx + Nqk
    cost = pl.CostEstimate(
        flops=int(4 * B * Sq * S * C + 2 * B * Sq * C * C),
        transcendentals=int(B * num_heads * Sq * S),
        bytes_accessed=int(
            itemsize * (B * Sq * C + B * (Sq // tq) * S * 2 * C + C * C)
            + 4 * C + jnp.dtype(out_dtype).itemsize * B * Sq * C),
    )

    return pl.pallas_call(
        kernel,
        grid=(B, Sq // tq, nkx + nkq),
        in_specs=[
            pl.BlockSpec((1, tq, C), lambda b, i, k: (b, i, 0)),
            # Clamped index maps: x-KV tiles while k < nkx, query-KV tiles after.
            # The idle operand keeps the same block index -> no extra DMA.
            pl.BlockSpec((1, tkx, 2 * C),
                         lambda b, i, k: (b, jnp.minimum(k, nkx - 1), 0)),
            pl.BlockSpec((1, tkq, 2 * C),
                         lambda b, i, k: (b, jnp.maximum(k - nkx, 0), 0)),
            pl.BlockSpec((C, C), lambda b, i, k: (0, 0)),   # proj weight, resident
            pl.BlockSpec((1, C), lambda b, i, k: (0, 0)),   # proj bias, resident
        ],
        out_specs=pl.BlockSpec((1, tq, C), lambda b, i, k: (b, i, 0)),
        out_shape=jax.ShapeDtypeStruct((B, Sq, C), out_dtype),
        scratch_shapes=[
            pltpu.VMEM((tq, num_heads), jnp.float32),   # running max per head
            pltpu.VMEM((tq, num_heads), jnp.float32),   # running denom per head
            pltpu.VMEM((tq, C), jnp.float32),           # output accumulator
        ],
        compiler_params=pltpu.CompilerParams(
            dimension_semantics=("parallel", "parallel", "arbitrary"),
            vmem_limit_bytes=vmem_budget),
        cost_estimate=cost,
    )(q, kv_x, kv_q, proj_w, proj_b)


# --------------------------- DualAttention module --------------------------- #

def init_dual_attention_params(key, dim, query_dim):
    """Synthetic parameters matching the nn.Module shapes (qkv_bias=False)."""
    ks = jax.random.split(key, 6)
    std = 0.02
    f32 = jnp.float32
    return {
        # nn.Linear(dim, dim*3, bias=False) — stored transposed (Cin, Cout)
        "qkv_w": jax.random.normal(ks[0], (dim, 3 * dim), f32) * std,
        # nn.Linear(query_dim, query_dim*3, bias=False)
        "query_linear_w": jax.random.normal(ks[1], (query_dim, 3 * query_dim), f32) * std,
        # nn.Linear(dim, dim) — with bias
        "proj_w": jax.random.normal(ks[2], (dim, dim), f32) * std,
        "proj_b": jax.random.normal(ks[3], (1, dim), f32) * std,
        # nn.Linear(query_dim, query_dim) — with bias
        "query_proj_w": jax.random.normal(ks[4], (query_dim, query_dim), f32) * std,
        "query_proj_b": jax.random.normal(ks[5], (1, query_dim), f32) * std,
        # to_query_kv is nn.Identity() in the bidirectional (non zero_init) config.
    }


def dual_attention_forward(params, x, query, num_heads, compute_dtype=jnp.float32):
    """Bidirectional DualAttention forward (mask=None, eval mode).

    compute_dtype: matmul operand dtype (bf16 recommended on v6e/v7x);
    softmax statistics and all accumulations stay in f32.
    """
    B, N, C = x.shape
    _, Nq, Cq = query.shape
    assert C == Cq, "bidirectional DualAttention requires dim == query_dim"
    cd = compute_dtype
    out_dtype = x.dtype
    Dh = C // num_heads
    scale = 1.0 / math.sqrt(Dh)

    # Split fused weights; fold 1/sqrt(Dh) into the q-projection weights so the
    # kernel never rescales q, and K|V is produced as a 2C-wide operand so the
    # attention kernel never DMAs the unused q columns.
    qx_w = (params["qkv_w"][:, :C] * scale).astype(cd)
    kvx_w = params["qkv_w"][:, C:].astype(cd)
    qq_w = (params["query_linear_w"][:, :C] * scale).astype(cd)
    kvq_w = params["query_linear_w"][:, C:].astype(cd)

    x2 = x.astype(cd).reshape(B * N, C)
    q2 = query.astype(cd).reshape(B * Nq, C)

    q_x = pallas_linear(x2, qx_w, out_dtype=cd).reshape(B, N, C)
    kv_x = pallas_linear(x2, kvx_w, out_dtype=cd).reshape(B, N, 2 * C)
    q_q = pallas_linear(q2, qq_w, out_dtype=cd).reshape(B, Nq, C)
    kv_q = pallas_linear(q2, kvq_w, out_dtype=cd).reshape(B, Nq, 2 * C)

    # Flash-style joint attention over [x-KV ; query-KV] with the output
    # projection (proj / query_proj, proj_drop is a no-op in eval) fused in.
    xo = pallas_dual_attention(q_x, kv_x, kv_q, params["proj_w"].astype(cd),
                               params["proj_b"], num_heads, out_dtype)
    qo = pallas_dual_attention(q_q, kv_x, kv_q, params["query_proj_w"].astype(cd),
                               params["query_proj_b"], num_heads, out_dtype)
    # TODO(synk): the two attention calls could share a single KV fetch by merging
    # their row ranges into one grid (per-row-tile q-source selection).
    return xo, qo


# ------------------------------ pure-JAX reference -------------------------- #

def _reference_forward(params, x, query, num_heads):
    B, N, C = x.shape
    _, Nq, Cq = query.shape
    H = num_heads
    Dh = C // H
    qkv = (x.reshape(B * N, C) @ params["qkv_w"])
    qkv = qkv.reshape(B, N, 3, H, Dh).transpose(2, 0, 3, 1, 4)
    q, k, v = qkv[0], qkv[1], qkv[2]
    qqkv = (query.reshape(B * Nq, Cq) @ params["query_linear_w"])
    qqkv = qqkv.reshape(B, Nq, 3, H, Dh).transpose(2, 0, 3, 1, 4)
    q = jnp.concatenate([q, qqkv[0]], axis=2)
    k = jnp.concatenate([k, qqkv[1]], axis=2)
    v = jnp.concatenate([v, qqkv[2]], axis=2)
    s = jnp.einsum("bhqd,bhkd->bhqk", q, k) / math.sqrt(Dh)
    p = jax.nn.softmax(s, axis=-1)
    o = jnp.einsum("bhqk,bhkd->bhqd", p, v)
    xo = o[:, :, :N, :].transpose(0, 2, 1, 3).reshape(B, N, C)
    qo = o[:, :, N:, :].transpose(0, 2, 1, 3).reshape(B, Nq, Cq)
    xo = xo.reshape(B * N, C) @ params["proj_w"] + params["proj_b"]
    qo = qo.reshape(B * Nq, Cq) @ params["query_proj_w"] + params["query_proj_b"]
    return xo.reshape(B, N, C), qo.reshape(B, Nq, Cq)


# ------------------------------------ main ---------------------------------- #

if __name__ == "__main__":
    B, N, Nq = 2, 16, 8
    dim = query_dim = 32
    num_heads = 4                     # head_dim = 8

    key = jax.random.PRNGKey(0)
    kx, kq, kp = jax.random.split(key, 3)
    x = jax.random.normal(kx, (B, N, dim), jnp.float32)
    query = jax.random.normal(kq, (B, Nq, query_dim), jnp.float32)
    params = init_dual_attention_params(kp, dim, query_dim)

    x_exp, q_exp = _reference_forward(params, x, query, num_heads)

    # f32 operands (tight check, exact reciprocal path)
    fwd_f32 = jax.jit(functools.partial(dual_attention_forward, num_heads=num_heads))
    x_out, q_out = fwd_f32(params, x, query)
    x_out = jax.block_until_ready(x_out)
    q_out = jax.block_until_ready(q_out)
    assert x_out.shape == (B, N, dim) and q_out.shape == (B, Nq, query_dim)
    assert jnp.allclose(x_out, x_exp, atol=2e-3, rtol=2e-3)
    assert jnp.allclose(q_out, q_exp, atol=2e-3, rtol=2e-3)

    # bf16 MXU-operand path (v6e/v7x recommendation); softmax/accum stay f32.
    fwd_bf16 = jax.jit(functools.partial(dual_attention_forward, num_heads=num_heads,
                                         compute_dtype=jnp.bfloat16))
    xb, qb = fwd_bf16(params, x, query)
    xb = jax.block_until_ready(xb)
    qb = jax.block_until_ready(qb)
    assert bool(jnp.all(jnp.isfinite(xb))) and bool(jnp.all(jnp.isfinite(qb)))
    assert jnp.allclose(xb, x_exp, atol=3e-2, rtol=3e-2)
    assert jnp.allclose(qb, q_exp, atol=3e-2, rtol=3e-2)

    print("KERNEL_OK")
</pallas_src>

<mosaic_0001>
module attributes {stable_mosaic.version = 11 : i64} {
  func.func @_linear_kernel(%arg0: i32, %arg1: i32, %arg2: i32, %arg3: memref<32x32xf32, #tpu.memory_space<vmem>>, %arg4: memref<32x64xf32, #tpu.memory_space<vmem>>, %arg5: memref<32x64xf32, #tpu.memory_space<vmem>>, %arg6: memref<32x64xf32, #tpu.memory_space<vmem>>) attributes {dimension_semantics = [#tpu.dimension_semantics<parallel>, #tpu.dimension_semantics<parallel>, #tpu.dimension_semantics<arbitrary>], iteration_bounds = array<i64: 1, 1, 1>, scalar_prefetch = 0 : i64, scratch_operands = 1 : i64, tpu.core_type = #tpu.core_type<tc>, window_params = [{transform_indices = @transform_0, window_bounds = array<i64: 32, 32>}, {transform_indices = @transform_1, window_bounds = array<i64: 32, 64>}, {transform_indices = @transform_2, window_bounds = array<i64: 32, 64>}]} {
    %c0_i32 = arith.constant 0 : i32
    %0 = arith.cmpi eq, %arg2, %c0_i32 : i32
    %1 = arith.extui %0 : i1 to i32
    %c0_i32_0 = arith.constant 0 : i32
    %2 = arith.cmpi ne, %1, %c0_i32_0 : i32
    scf.if %2 {
      %cst_10 = arith.constant 0.000000e+00 : f32
      %12 = vector.broadcast %cst_10 : f32 to vector<32x64xf32>
      %c0_11 = arith.constant 0 : index
      %c0_12 = arith.constant 0 : index
      %13 = vector.load %arg6[%c0_11, %c0_12] : memref<32x64xf32, #tpu.memory_space<vmem>>, vector<32x64xf32>
      tpu.vector_store %arg6[%c0_11, %c0_12], %12 {strides = array<i32>} : memref<32x64xf32, #tpu.memory_space<vmem>>, vector<32x64xf32>,
    } else {
    }
    %c0 = arith.constant 0 : index
    %c0_1 = arith.constant 0 : index
    %3 = vector.load %arg6[%c0, %c0_1] : memref<32x64xf32, #tpu.memory_space<vmem>>, vector<32x64xf32>
    %c0_2 = arith.constant 0 : index
    %c0_3 = arith.constant 0 : index
    %4 = vector.load %arg3[%c0_2, %c0_3] : memref<32x32xf32, #tpu.memory_space<vmem>>, vector<32x32xf32>
    %c0_4 = arith.constant 0 : index
    %c0_5 = arith.constant 0 : index
    %5 = vector.load %arg4[%c0_4, %c0_5] : memref<32x64xf32, #tpu.memory_space<vmem>>, vector<32x64xf32>
    %cst = arith.constant dense<0.000000e+00> : vector<32x64xf32>
    %6 = tpu.matmul %4, %5, %cst {dimension_numbers = #tpu.dot_dimension_numbers<[1], [0], [0], [1], [0, 0, 1, 1], [], []>} : vector<32x32xf32>, vector<32x64xf32>, vector<32x64xf32> -> vector<32x64xf32>
    %7 = arith.addf %3, %6 : vector<32x64xf32>
    %c0_6 = arith.constant 0 : index
    %c0_7 = arith.constant 0 : index
    %8 = vector.load %arg6[%c0_6, %c0_7] : memref<32x64xf32, #tpu.memory_space<vmem>>, vector<32x64xf32>
    tpu.vector_store %arg6[%c0_6, %c0_7], %7 {strides = array<i32>} : memref<32x64xf32, #tpu.memory_space<vmem>>, vector<32x64xf32>,
    %c0_i32_8 = arith.constant 0 : i32
    %9 = arith.cmpi eq, %arg2, %c0_i32_8 : i32
    %10 = arith.extui %9 : i1 to i32
    %c0_i32_9 = arith.constant 0 : i32
    %11 = arith.cmpi ne, %10, %c0_i32_9 : i32
    scf.if %11 {
      %c0_10 = arith.constant 0 : index
      %c0_11 = arith.constant 0 : index
      %12 = vector.load %arg6[%c0_10, %c0_11] : memref<32x64xf32, #tpu.memory_space<vmem>>, vector<32x64xf32>
      %c0_12 = arith.constant 0 : index
      %c0_13 = arith.constant 0 : index
      %13 = vector.load %arg5[%c0_12, %c0_13] : memref<32x64xf32, #tpu.memory_space<vmem>>, vector<32x64xf32>
      tpu.vector_store %arg5[%c0_12, %c0_13], %12 {strides = array<i32>} : memref<32x64xf32, #tpu.memory_space<vmem>>, vector<32x64xf32>,
    } else {
    }
    return
  }
  func.func @transform_0(%arg0: i32, %arg1: i32, %arg2: i32) -> (i32, i32) {
    %c0_i32 = arith.constant 0 : i32
    return %arg0, %arg2 : i32, i32
  }
  func.func @transform_1(%arg0: i32, %arg1: i32, %arg2: i32) -> (i32, i32) {
    %c0_i32 = arith.constant 0 : i32
    return %arg2, %arg1 : i32, i32
  }
  func.func @transform_2(%arg0: i32, %arg1: i32, %arg2: i32) -> (i32, i32) {
    %c0_i32 = arith.constant 0 : i32
    return %arg0, %arg1 : i32, i32
  }
}

module attributes {stable_mosaic.version = 11 : i64} {
  func.func @_linear_kernel(%arg0: i32, %arg1: i32, %arg2: i32, %arg3: memref<32x32xf32, #tpu.memory_space<vmem>>, %arg4: memref<32x32xf32, #tpu.memory_space<vmem>>, %arg5: memref<32x32xf32, #tpu.memory_space<vmem>>, %arg6: memref<32x32xf32, #tpu.memory_space<vmem>>) attributes {dimension_semantics = [#tpu.dimension_semantics<parallel>, #tpu.dimension_semantics<parallel>, #tpu.dimension_semantics<arbitrary>], iteration_bounds = array<i64: 1, 1, 1>, scalar_prefetch = 0 : i64, scratch_operands = 1 : i64, tpu.core_type = #tpu.core_type<tc>, window_params = [{transform_indices = @transform_0, window_bounds = array<i64: 32, 32>}, {transform_indices = @transform_1, window_bounds = array<i64: 32, 32>}, {transform_indices = @transform_2, window_bounds = array<i64: 32, 32>}]} {
    %c0_i32 = arith.constant 0 : i32
    %0 = arith.cmpi eq, %arg2, %c0_i32 : i32
    %1 = arith.extui %0 : i1 to i32
    %c0_i32_0 = arith.constant 0 : i32
    %2 = arith.cmpi ne, %1, %c0_i32_0 : i32
    scf.if %2 {
      %cst_10 = arith.constant 0.000000e+00 : f32
      %12 = vector.broadcast %cst_10 : f32 to vector<32x32xf32>
      %c0_11 = arith.constant 0 : index
      %c0_12 = arith.constant 0 : index
      %13 = vector.load %arg6[%c0_11, %c0_12] : memref<32x32xf32, #tpu.memory_space<vmem>>, vector<32x32xf32>
      tpu.vector_store %arg6[%c0_11, %c0_12], %12 {strides = array<i32>} : memref<32x32xf32, #tpu.memory_space<vmem>>, vector<32x32xf32>,
    } else {
    }
    %c0 = arith.constant 0 : index
    %c0_1 = arith.constant 0 : index
    %3 = vector.load %arg6[%c0, %c0_1] : memref<32x32xf32, #tpu.memory_space<vmem>>, vector<32x32xf32>
    %c0_2 = arith.constant 0 : index
    %c0_3 = arith.constant 0 : index
    %4 = vector.load %arg3[%c0_2, %c0_3] : memref<32x32xf32, #tpu.memory_space<vmem>>, vector<32x32xf32>
    %c0_4 = arith.constant 0 : index
    %c0_5 = arith.constant 0 : index
    %5 = vector.load %arg4[%c0_4, %c0_5] : memref<32x32xf32, #tpu.memory_space<vmem>>, vector<32x32xf32>
    %cst = arith.constant dense<0.000000e+00> : vector<32x32xf32>
    %6 = tpu.matmul %4, %5, %cst {dimension_numbers = #tpu.dot_dimension_numbers<[1], [0], [0], [1], [0, 0, 1, 1], [], []>} : vector<32x32xf32>, vector<32x32xf32>, vector<32x32xf32> -> vector<32x32xf32>
    %7 = arith.addf %3, %6 : vector<32x32xf32>
    %c0_6 = arith.constant 0 : index
    %c0_7 = arith.constant 0 : index
    %8 = vector.load %arg6[%c0_6, %c0_7] : memref<32x32xf32, #tpu.memory_space<vmem>>, vector<32x32xf32>
    tpu.vector_store %arg6[%c0_6, %c0_7], %7 {strides = array<i32>} : memref<32x32xf32, #tpu.memory_space<vmem>>, vector<32x32xf32>,
    %c0_i32_8 = arith.constant 0 : i32
    %9 = arith.cmpi eq, %arg2, %c0_i32_8 : i32
    %10 = arith.extui %9 : i1 to i32
    %c0_i32_9 = arith.constant 0 : i32
    %11 = arith.cmpi ne, %10, %c0_i32_9 : i32
    scf.if %11 {
      %c0_10 = arith.constant 0 : index
      %c0_11 = arith.constant 0 : index
      %12 = vector.load %arg6[%c0_10, %c0_11] : memref<32x32xf32, #tpu.memory_space<vmem>>, vector<32x32xf32>
      %c0_12 = arith.constant 0 : index
      %c0_13 = arith.constant 0 : index
      %13 = vector.load %arg5[%c0_12, %c0_13] : memref<32x32xf32, #tpu.memory_space<vmem>>, vector<32x32xf32>
      tpu.vector_store %arg5[%c0_12, %c0_13], %12 {strides = array<i32>} : memref<32x32xf32, #tpu.memory_space<vmem>>, vector<32x32xf32>,
    } else {
    }
    return
  }
  func.func @transform_0(%arg0: i32, %arg1: i32, %arg2: i32) -> (i32, i32) {
    %c0_i32 = arith.constant 0 : i32
    return %arg0, %arg2 : i32, i32
  }
  func.func @transform_1(%arg0: i32, %arg1: i32, %arg2: i32) -> (i32, i32) {
    %c0_i32 = arith.constant 0 : i32
    return %arg2, %arg1 : i32, i32
  }
  func.func @transform_2(%arg0: i32, %arg1: i32, %arg2: i32) -> (i32, i32) {
    %c0_i32 = arith.constant 0 : i32
    return %arg0, %arg1 : i32, i32
  }
}

module attributes {stable_mosaic.version = 11 : i64} {
  func.func @_linear_kernel(%arg0: i32, %arg1: i32, %arg2: i32, %arg3: memref<16x32xf32, #tpu.memory_space<vmem>>, %arg4: memref<32x32xf32, #tpu.memory_space<vmem>>, %arg5: memref<16x32xf32, #tpu.memory_space<vmem>>, %arg6: memref<16x32xf32, #tpu.memory_space<vmem>>) attributes {dimension_semantics = [#tpu.dimension_semantics<parallel>, #tpu.dimension_semantics<parallel>, #tpu.dimension_semantics<arbitrary>], iteration_bounds = array<i64: 1, 1, 1>, scalar_prefetch = 0 : i64, scratch_operands = 1 : i64, tpu.core_type = #tpu.core_type<tc>, window_params = [{transform_indices = @transform_0, window_bounds = array<i64: 16, 32>}, {transform_indices = @transform_1, window_bounds = array<i64: 32, 32>}, {transform_indices = @transform_2, window_bounds = array<i64: 16, 32>}]} {
    %c0_i32 = arith.constant 0 : i32
    %0 = arith.cmpi eq, %arg2, %c0_i32 : i32
    %1 = arith.extui %0 : i1 to i32
    %c0_i32_0 = arith.constant 0 : i32
    %2 = arith.cmpi ne, %1, %c0_i32_0 : i32
    scf.if %2 {
      %cst_10 = arith.constant 0.000000e+00 : f32
      %12 = vector.broadcast %cst_10 : f32 to vector<16x32xf32>
      %c0_11 = arith.constant 0 : index
      %c0_12 = arith.constant 0 : index
      %13 = vector.load %arg6[%c0_11, %c0_12] : memref<16x32xf32, #tpu.memory_space<vmem>>, vector<16x32xf32>
      tpu.vector_store %arg6[%c0_11, %c0_12], %12 {strides = array<i32>} : memref<16x32xf32, #tpu.memory_space<vmem>>, vector<16x32xf32>,
    } else {
    }
    %c0 = arith.constant 0 : index
    %c0_1 = arith.constant 0 : index
    %3 = vector.load %arg6[%c0, %c0_1] : memref<16x32xf32, #tpu.memory_space<vmem>>, vector<16x32xf32>
    %c0_2 = arith.constant 0 : index
    %c0_3 = arith.constant 0 : index
    %4 = vector.load %arg3[%c0_2, %c0_3] : memref<16x32xf32, #tpu.memory_space<vmem>>, vector<16x32xf32>
    %c0_4 = arith.constant 0 : index
    %c0_5 = arith.constant 0 : index
    %5 = vector.load %arg4[%c0_4, %c0_5] : memref<32x32xf32, #tpu.memory_space<vmem>>, vector<32x32xf32>
    %cst = arith.constant dense<0.000000e+00> : vector<16x32xf32>
    %6 = tpu.matmul %4, %5, %cst {dimension_numbers = #tpu.dot_dimension_numbers<[1], [0], [0], [1], [0, 0, 1, 1], [], []>} : vector<16x32xf32>, vector<32x32xf32>, vector<16x32xf32> -> vector<16x32xf32>
    %7 = arith.addf %3, %6 : vector<16x32xf32>
    %c0_6 = arith.constant 0 : index
    %c0_7 = arith.constant 0 : index
    %8 = vector.load %arg6[%c0_6, %c0_7] : memref<16x32xf32, #tpu.memory_space<vmem>>, vector<16x32xf32>
    tpu.vector_store %arg6[%c0_6, %c0_7], %7 {strides = array<i32>} : memref<16x32xf32, #tpu.memory_space<vmem>>, vector<16x32xf32>,
    %c0_i32_8 = arith.constant 0 : i32
    %9 = arith.cmpi eq, %arg2, %c0_i32_8 : i32
    %10 = arith.extui %9 : i1 to i32
    %c0_i32_9 = arith.constant 0 : i32
    %11 = arith.cmpi ne, %10, %c0_i32_9 : i32
    scf.if %11 {
      %c0_10 = arith.constant 0 : index
      %c0_11 = arith.constant 0 : index
      %12 = vector.load %arg6[%c0_10, %c0_11] : memref<16x32xf32, #tpu.memory_space<vmem>>, vector<16x32xf32>
      %c0_12 = arith.constant 0 : index
      %c0_13 = arith.constant 0 : index
      %13 = vector.load %arg5[%c0_12, %c0_13] : memref<16x32xf32, #tpu.memory_space<vmem>>, vector<16x32xf32>
      tpu.vector_store %arg5[%c0_12, %c0_13], %12 {strides = array<i32>} : memref<16x32xf32, #tpu.memory_space<vmem>>, vector<16x32xf32>,
    } else {
    }
    return
  }
  func.func @transform_0(%arg0: i32, %arg1: i32, %arg2: i32) -> (i32, i32) {
    %c0_i32 = arith.constant 0 : i32
    return %arg0, %arg2 : i32, i32
  }
  func.func @transform_1(%arg0: i32, %arg1: i32, %arg2: i32) -> (i32, i32) {
    %c0_i32 = arith.constant 0 : i32
    return %arg2, %arg1 : i32, i32
  }
  func.func @transform_2(%arg0: i32, %arg1: i32, %arg2: i32) -> (i32, i32) {
    %c0_i32 = arith.constant 0 : i32
    return %arg0, %arg1 : i32, i32
  }
}

module attributes {stable_mosaic.version = 11 : i64} {
  func.func @_linear_kernel(%arg0: i32, %arg1: i32, %arg2: i32, %arg3: memref<16x32xf32, #tpu.memory_space<vmem>>, %arg4: memref<32x64xf32, #tpu.memory_space<vmem>>, %arg5: memref<16x64xf32, #tpu.memory_space<vmem>>, %arg6: memref<16x64xf32, #tpu.memory_space<vmem>>) attributes {dimension_semantics = [#tpu.dimension_semantics<parallel>, #tpu.dimension_semantics<parallel>, #tpu.dimension_semantics<arbitrary>], iteration_bounds = array<i64: 1, 1, 1>, scalar_prefetch = 0 : i64, scratch_operands = 1 : i64, tpu.core_type = #tpu.core_type<tc>, window_params = [{transform_indices = @transform_0, window_bounds = array<i64: 16, 32>}, {transform_indices = @transform_1, window_bounds = array<i64: 32, 64>}, {transform_indices = @transform_2, window_bounds = array<i64: 16, 64>}]} {
    %c0_i32 = arith.constant 0 : i32
    %0 = arith.cmpi eq, %arg2, %c0_i32 : i32
    %1 = arith.extui %0 : i1 to i32
    %c0_i32_0 = arith.constant 0 : i32
    %2 = arith.cmpi ne, %1, %c0_i32_0 : i32
    scf.if %2 {
      %cst_10 = arith.constant 0.000000e+00 : f32
      %12 = vector.broadcast %cst_10 : f32 to vector<16x64xf32>
      %c0_11 = arith.constant 0 : index
      %c0_12 = arith.constant 0 : index
      %13 = vector.load %arg6[%c0_11, %c0_12] : memref<16x64xf32, #tpu.memory_space<vmem>>, vector<16x64xf32>
      tpu.vector_store %arg6[%c0_11, %c0_12], %12 {strides = array<i32>} : memref<16x64xf32, #tpu.memory_space<vmem>>, vector<16x64xf32>,
    } else {
    }
    %c0 = arith.constant 0 : index
    %c0_1 = arith.constant 0 : index
    %3 = vector.load %arg6[%c0, %c0_1] : memref<16x64xf32, #tpu.memory_space<vmem>>, vector<16x64xf32>
    %c0_2 = arith.constant 0 : index
    %c0_3 = arith.constant 0 : index
    %4 = vector.load %arg3[%c0_2, %c0_3] : memref<16x32xf32, #tpu.memory_space<vmem>>, vector<16x32xf32>
    %c0_4 = arith.constant 0 : index
    %c0_5 = arith.constant 0 : index
    %5 = vector.load %arg4[%c0_4, %c0_5] : memref<32x64xf32, #tpu.memory_space<vmem>>, vector<32x64xf32>
    %cst = arith.constant dense<0.000000e+00> : vector<16x64xf32>
    %6 = tpu.matmul %4, %5, %cst {dimension_numbers = #tpu.dot_dimension_numbers<[1], [0], [0], [1], [0, 0, 1, 1], [], []>} : vector<16x32xf32>, vector<32x64xf32>, vector<16x64xf32> -> vector<16x64xf32>
    %7 = arith.addf %3, %6 : vector<16x64xf32>
    %c0_6 = arith.constant 0 : index
    %c0_7 = arith.constant 0 : index
    %8 = vector.load %arg6[%c0_6, %c0_7] : memref<16x64xf32, #tpu.memory_space<vmem>>, vector<16x64xf32>
    tpu.vector_store %arg6[%c0_6, %c0_7], %7 {strides = array<i32>} : memref<16x64xf32, #tpu.memory_space<vmem>>, vector<16x64xf32>,
    %c0_i32_8 = arith.constant 0 : i32
    %9 = arith.cmpi eq, %arg2, %c0_i32_8 : i32
    %10 = arith.extui %9 : i1 to i32
    %c0_i32_9 = arith.constant 0 : i32
    %11 = arith.cmpi ne, %10, %c0_i32_9 : i32
    scf.if %11 {
      %c0_10 = arith.constant 0 : index
      %c0_11 = arith.constant 0 : index
      %12 = vector.load %arg6[%c0_10, %c0_11] : memref<16x64xf32, #tpu.memory_space<vmem>>, vector<16x64xf32>
      %c0_12 = arith.constant 0 : index
      %c0_13 = arith.constant 0 : index
      %13 = vector.load %arg5[%c0_12, %c0_13] : memref<16x64xf32, #tpu.memory_space<vmem>>, vector<16x64xf32>
      tpu.vector_store %arg5[%c0_12, %c0_13], %12 {strides = array<i32>} : memref<16x64xf32, #tpu.memory_space<vmem>>, vector<16x64xf32>,
    } else {
    }
    return
  }
  func.func @transform_0(%arg0: i32, %arg1: i32, %arg2: i32) -> (i32, i32) {
    %c0_i32 = arith.constant 0 : i32
    return %arg0, %arg2 : i32, i32
  }
  func.func @transform_1(%arg0: i32, %arg1: i32, %arg2: i32) -> (i32, i32) {
    %c0_i32 = arith.constant 0 : i32
    return %arg2, %arg1 : i32, i32
  }
  func.func @transform_2(%arg0: i32, %arg1: i32, %arg2: i32) -> (i32, i32) {
    %c0_i32 = arith.constant 0 : i32
    return %arg0, %arg1 : i32, i32
  }
}

module attributes {stable_mosaic.version = 11 : i64} {
  func.func @_dual_attn_kernel(%arg0: i32, %arg1: i32, %arg2: i32, %arg3: memref<1x8x32xf32, #tpu.memory_space<vmem>>, %arg4: memref<1x16x64xf32, #tpu.memory_space<vmem>>, %arg5: memref<1x8x64xf32, #tpu.memory_space<vmem>>, %arg6: memref<32x32xf32, #tpu.memory_space<vmem>>, %arg7: memref<1x32xf32, #tpu.memory_space<vmem>>, %arg8: memref<1x8x32xf32, #tpu.memory_space<vmem>>, %arg9: memref<8x4xf32, #tpu.memory_space<vmem>>, %arg10: memref<8x4xf32, #tpu.memory_space<vmem>>, %arg11: memref<8x32xf32, #tpu.memory_space<vmem>>) attributes {dimension_semantics = [#tpu.dimension_semantics<parallel>, #tpu.dimension_semantics<parallel>, #tpu.dimension_semantics<arbitrary>], iteration_bounds = array<i64: 2, 1, 2>, scalar_prefetch = 0 : i64, scratch_operands = 3 : i64, tpu.core_type = #tpu.core_type<tc>, window_params = [{transform_indices = @transform_0, window_bounds = array<i64: 1, 8, 32>}, {transform_indices = @transform_1, window_bounds = array<i64: 1, 16, 64>}, {transform_indices = @transform_2, window_bounds = array<i64: 1, 8, 64>}, {pipeline_mode = #tpu.pipeline_mode<synchronous>, transform_indices = @transform_3, window_bounds = array<i64: 32, 32>}, {pipeline_mode = #tpu.pipeline_mode<synchronous>, transform_indices = @transform_4, window_bounds = array<i64: 1, 32>}, {transform_indices = @transform_5, window_bounds = array<i64: 1, 8, 32>}]} {
    %c0_i32 = arith.constant 0 : i32
    %0 = arith.cmpi eq, %arg2, %c0_i32 : i32
    %1 = arith.extui %0 : i1 to i32
    %c0_i32_0 = arith.constant 0 : i32
    %2 = arith.cmpi ne, %1, %c0_i32_0 : i32
    scf.if %2 {
      %cst = arith.constant 0xFF800000 : f32
      %12 = vector.broadcast %cst : f32 to vector<8x4xf32>
      %c0 = arith.constant 0 : index
      %c0_6 = arith.constant 0 : index
      %13 = vector.load %arg9[%c0, %c0_6] : memref<8x4xf32, #tpu.memory_space<vmem>>, vector<8x4xf32>
      tpu.vector_store %arg9[%c0, %c0_6], %12 {strides = array<i32>} : memref<8x4xf32, #tpu.memory_space<vmem>>, vector<8x4xf32>,
      %cst_7 = arith.constant 0.000000e+00 : f32
      %14 = vector.broadcast %cst_7 : f32 to vector<8x4xf32>
      %c0_8 = arith.constant 0 : index
      %c0_9 = arith.constant 0 : index
      %15 = vector.load %arg10[%c0_8, %c0_9] : memref<8x4xf32, #tpu.memory_space<vmem>>, vector<8x4xf32>
      tpu.vector_store %arg10[%c0_8, %c0_9], %14 {strides = array<i32>} : memref<8x4xf32, #tpu.memory_space<vmem>>, vector<8x4xf32>,
      %cst_10 = arith.constant 0.000000e+00 : f32
      %16 = vector.broadcast %cst_10 : f32 to vector<8x32xf32>
      %c0_11 = arith.constant 0 : index
      %c0_12 = arith.constant 0 : index
      %17 = vector.load %arg11[%c0_11, %c0_12] : memref<8x32xf32, #tpu.memory_space<vmem>>, vector<8x32xf32>
      tpu.vector_store %arg11[%c0_11, %c0_12], %16 {strides = array<i32>} : memref<8x32xf32, #tpu.memory_space<vmem>>, vector<8x32xf32>,
    } else {
    }
    %c1_i32 = arith.constant 1 : i32
    %3 = arith.cmpi slt, %arg2, %c1_i32 : i32
    %4 = arith.extui %3 : i1 to i32
    %c0_i32_1 = arith.constant 0 : i32
    %5 = arith.cmpi ne, %4, %c0_i32_1 : i32
    scf.if %5 {
      %c0 = arith.constant 0 : index
      %c0_6 = arith.constant 0 : index
      %c0_7 = arith.constant 0 : index
      %12 = vector.load %arg3[%c0, %c0_6, %c0_7] : memref<1x8x32xf32, #tpu.memory_space<vmem>>, vector<1x8x8xf32>
      %13 = vector.shape_cast %12 : vector<1x8x8xf32> to vector<8x8xf32>
      %c0_8 = arith.constant 0 : index
      %c0_9 = arith.constant 0 : index
      %c0_10 = arith.constant 0 : index
      %14 = vector.load %arg4[%c0_8, %c0_9, %c0_10] : memref<1x16x64xf32, #tpu.memory_space<vmem>>, vector<1x16x8xf32>
      %15 = vector.shape_cast %14 : vector<1x16x8xf32> to vector<16x8xf32>
      %c0_11 = arith.constant 0 : index
      %c0_12 = arith.constant 0 : index
      %c32 = arith.constant 32 : index
      %16 = vector.load %arg4[%c0_11, %c0_12, %c32] : memref<1x16x64xf32, #tpu.memory_space<vmem>>, vector<1x16x8xf32>
      %17 = vector.shape_cast %16 : vector<1x16x8xf32> to vector<16x8xf32>
      %cst = arith.constant dense<0.000000e+00> : vector<8x16xf32>
      %18 = tpu.matmul %13, %15, %cst {dimension_numbers = #tpu.dot_dimension_numbers<[1], [1], [0], [0], [0, 0, 1, 0], [], []>} : vector<8x8xf32>, vector<16x8xf32>, vector<8x16xf32> -> vector<8x16xf32>
      %c0_13 = arith.constant 0 : index
      %c0_14 = arith.constant 0 : index
      %19 = vector.load %arg9[%c0_13, %c0_14] : memref<8x4xf32, #tpu.memory_space<vmem>>, vector<8x1xf32>
      %cst_15 = arith.constant dense<0xFF800000> : vector<8xf32>
      %20 = vector.multi_reduction <maximumf>, %18, %cst_15 [1] : vector<8x16xf32> to vector<8xf32>
      %21 = vector.shape_cast %20 : vector<8xf32> to vector<8x1xf32>
      %22 = arith.maximumf %19, %21 : vector<8x1xf32>
      %23 = arith.subf %19, %22 : vector<8x1xf32>
      %24 = math.exp %23 : vector<8x1xf32>
      %25 = vector.broadcast %22 : vector<8x1xf32> to vector<8x16xf32>
      %26 = arith.subf %18, %25 : vector<8x16xf32>
      %27 = math.exp %26 : vector<8x16xf32>
      %c0_16 = arith.constant 0 : index
      %c0_17 = arith.constant 0 : index
      %28 = vector.load %arg10[%c0_16, %c0_17] : memref<8x4xf32, #tpu.memory_space<vmem>>, vector<8x1xf32>
      %29 = arith.mulf %24, %28 : vector<8x1xf32>
      %cst_18 = arith.constant dense<0.000000e+00> : vector<8xf32>
      %30 = vector.multi_reduction <add>, %27, %cst_18 [1] : vector<8x16xf32> to vector<8xf32>
      %31 = vector.shape_cast %30 : vector<8xf32> to vector<8x1xf32>
      %32 = arith.addf %29, %31 : vector<8x1xf32>
      %c0_19 = arith.constant 0 : index
      %c0_20 = arith.constant 0 : index
      %33 = vector.load %arg10[%c0_19, %c0_20] : memref<8x4xf32, #tpu.memory_space<vmem>>, vector<8x1xf32>
      tpu.vector_store %arg10[%c0_19, %c0_20], %32 {strides = array<i32>} : memref<8x4xf32, #tpu.memory_space<vmem>>, vector<8x1xf32>,
      %cst_21 = arith.constant dense<0.000000e+00> : vector<8x8xf32>
      %34 = tpu.matmul %27, %17, %cst_21 {dimension_numbers = #tpu.dot_dimension_numbers<[1], [0], [0], [1], [0, 0, 1, 1], [], []>} : vector<8x16xf32>, vector<16x8xf32>, vector<8x8xf32> -> vector<8x8xf32>
      %c0_22 = arith.constant 0 : index
      %c0_23 = arith.constant 0 : index
      %35 = vector.load %arg11[%c0_22, %c0_23] : memref<8x32xf32, #tpu.memory_space<vmem>>, vector<8x8xf32>
      %36 = vector.broadcast %24 : vector<8x1xf32> to vector<8x8xf32>
      %37 = arith.mulf %36, %35 : vector<8x8xf32>
      %38 = arith.addf %37, %34 : vector<8x8xf32>
      %c0_24 = arith.constant 0 : index
      %c0_25 = arith.constant 0 : index
      %39 = vector.load %arg11[%c0_24, %c0_25] : memref<8x32xf32, #tpu.memory_space<vmem>>, vector<8x8xf32>
      tpu.vector_store %arg11[%c0_24, %c0_25], %38 {strides = array<i32>} : memref<8x32xf32, #tpu.memory_space<vmem>>, vector<8x8xf32>,
      %c0_26 = arith.constant 0 : index
      %c0_27 = arith.constant 0 : index
      %40 = vector.load %arg9[%c0_26, %c0_27] : memref<8x4xf32, #tpu.memory_space<vmem>>, vector<8x1xf32>
      tpu.vector_store %arg9[%c0_26, %c0_27], %22 {strides = array<i32>} : memref<8x4xf32, #tpu.memory_space<vmem>>, vector<8x1xf32>,
      %c0_28 = arith.constant 0 : index
      %c0_29 = arith.constant 0 : index
      %c8 = arith.constant 8 : index
      %41 = vector.load %arg3[%c0_28, %c0_29, %c8] : memref<1x8x32xf32, #tpu.memory_space<vmem>>, vector<1x8x8xf32>
      %42 = vector.shape_cast %41 : vector<1x8x8xf32> to vector<8x8xf32>
      %c0_30 = arith.constant 0 : index
      %c0_31 = arith.constant 0 : index
      %c8_32 = arith.constant 8 : index
      %43 = vector.load %arg4[%c0_30, %c0_31, %c8_32] : memref<1x16x64xf32, #tpu.memory_space<vmem>>, vector<1x16x8xf32>
      %44 = vector.shape_cast %43 : vector<1x16x8xf32> to vector<16x8xf32>
      %c0_33 = arith.constant 0 : index
      %c0_34 = arith.constant 0 : index
      %c40 = arith.constant 40 : index
      %45 = vector.load %arg4[%c0_33, %c0_34, %c40] : memref<1x16x64xf32, #tpu.memory_space<vmem>>, vector<1x16x8xf32>
      %46 = vector.shape_cast %45 : vector<1x16x8xf32> to vector<16x8xf32>
      %cst_35 = arith.constant dense<0.000000e+00> : vector<8x16xf32>
      %47 = tpu.matmul %42, %44, %cst_35 {dimension_numbers = #tpu.dot_dimension_numbers<[1], [1], [0], [0], [0, 0, 1, 0], [], []>} : vector<8x8xf32>, vector<16x8xf32>, vector<8x16xf32> -> vector<8x16xf32>
      %c0_36 = arith.constant 0 : index
      %c1 = arith.constant 1 : index
      %48 = vector.load %arg9[%c0_36, %c1] : memref<8x4xf32, #tpu.memory_space<vmem>>, vector<8x1xf32>
      %cst_37 = arith.constant dense<0xFF800000> : vector<8xf32>
      %49 = vector.multi_reduction <maximumf>, %47, %cst_37 [1] : vector<8x16xf32> to vector<8xf32>
      %50 = vector.shape_cast %49 : vector<8xf32> to vector<8x1xf32>
      %51 = arith.maximumf %48, %50 : vector<8x1xf32>
      %52 = arith.subf %48, %51 : vector<8x1xf32>
      %53 = math.exp %52 : vector<8x1xf32>
      %54 = vector.broadcast %51 : vector<8x1xf32> to vector<8x16xf32>
      %55 = arith.subf %47, %54 : vector<8x16xf32>
      %56 = math.exp %55 : vector<8x16xf32>
      %c0_38 = arith.constant 0 : index
      %c1_39 = arith.constant 1 : index
      %57 = vector.load %arg10[%c0_38, %c1_39] : memref<8x4xf32, #tpu.memory_space<vmem>>, vector<8x1xf32>
      %58 = arith.mulf %53, %57 : vector<8x1xf32>
      %cst_40 = arith.constant dense<0.000000e+00> : vector<8xf32>
      %59 = vector.multi_reduction <add>, %56, %cst_40 [1] : vector<8x16xf32> to vector<8xf32>
      %60 = vector.shape_cast %59 : vector<8xf32> to vector<8x1xf32>
      %61 = arith.addf %58, %60 : vector<8x1xf32>
      %c0_41 = arith.constant 0 : index
      %c1_42 = arith.constant 1 : index
      %62 = vector.load %arg10[%c0_41, %c1_42] : memref<8x4xf32, #tpu.memory_space<vmem>>, vector<8x1xf32>
      tpu.vector_store %arg10[%c0_41, %c1_42], %61 {strides = array<i32>} : memref<8x4xf32, #tpu.memory_space<vmem>>, vector<8x1xf32>,
      %cst_43 = arith.constant dense<0.000000e+00> : vector<8x8xf32>
      %63 = tpu.matmul %56, %46, %cst_43 {dimension_numbers = #tpu.dot_dimension_numbers<[1], [0], [0], [1], [0, 0, 1, 1], [], []>} : vector<8x16xf32>, vector<16x8xf32>, vector<8x8xf32> -> vector<8x8xf32>
      %c0_44 = arith.constant 0 : index
      %c8_45 = arith.constant 8 : index
      %64 = vector.load %arg11[%c0_44, %c8_45] : memref<8x32xf32, #tpu.memory_space<vmem>>, vector<8x8xf32>
      %65 = vector.broadcast %53 : vector<8x1xf32> to vector<8x8xf32>
      %66 = arith.mulf %65, %64 : vector<8x8xf32>
      %67 = arith.addf %66, %63 : vector<8x8xf32>
      %c0_46 = arith.constant 0 : index
      %c8_47 = arith.constant 8 : index
      %68 = vector.load %arg11[%c0_46, %c8_47] : memref<8x32xf32, #tpu.memory_space<vmem>>, vector<8x8xf32>
      tpu.vector_store %arg11[%c0_46, %c8_47], %67 {strides = array<i32>} : memref<8x32xf32, #tpu.memory_space<vmem>>, vector<8x8xf32>,
      %c0_48 = arith.constant 0 : index
      %c1_49 = arith.constant 1 : index
      %69 = vector.load %arg9[%c0_48, %c1_49] : memref<8x4xf32, #tpu.memory_space<vmem>>, vector<8x1xf32>
      tpu.vector_store %arg9[%c0_48, %c1_49], %51 {strides = array<i32>} : memref<8x4xf32, #tpu.memory_space<vmem>>, vector<8x1xf32>,
      %c0_50 = arith.constant 0 : index
      %c0_51 = arith.constant 0 : index
      %c16 = arith.constant 16 : index
      %70 = vector.load %arg3[%c0_50, %c0_51, %c16] : memref<1x8x32xf32, #tpu.memory_space<vmem>>, vector<1x8x8xf32>
      %71 = vector.shape_cast %70 : vector<1x8x8xf32> to vector<8x8xf32>
      %c0_52 = arith.constant 0 : index
      %c0_53 = arith.constant 0 : index
      %c16_54 = arith.constant 16 : index
      %72 = vector.load %arg4[%c0_52, %c0_53, %c16_54] : memref<1x16x64xf32, #tpu.memory_space<vmem>>, vector<1x16x8xf32>
      %73 = vector.shape_cast %72 : vector<1x16x8xf32> to vector<16x8xf32>
      %c0_55 = arith.constant 0 : index
      %c0_56 = arith.constant 0 : index
      %c48 = arith.constant 48 : index
      %74 = vector.load %arg4[%c0_55, %c0_56, %c48] : memref<1x16x64xf32, #tpu.memory_space<vmem>>, vector<1x16x8xf32>
      %75 = vector.shape_cast %74 : vector<1x16x8xf32> to vector<16x8xf32>
      %cst_57 = arith.constant dense<0.000000e+00> : vector<8x16xf32>
      %76 = tpu.matmul %71, %73, %cst_57 {dimension_numbers = #tpu.dot_dimension_numbers<[1], [1], [0], [0], [0, 0, 1, 0], [], []>} : vector<8x8xf32>, vector<16x8xf32>, vector<8x16xf32> -> vector<8x16xf32>
      %c0_58 = arith.constant 0 : index
      %c2 = arith.constant 2 : index
      %77 = vector.load %arg9[%c0_58, %c2] : memref<8x4xf32, #tpu.memory_space<vmem>>, vector<8x1xf32>
      %cst_59 = arith.constant dense<0xFF800000> : vector<8xf32>
      %78 = vector.multi_reduction <maximumf>, %76, %cst_59 [1] : vector<8x16xf32> to vector<8xf32>
      %79 = vector.shape_cast %78 : vector<8xf32> to vector<8x1xf32>
      %80 = arith.maximumf %77, %79 : vector<8x1xf32>
      %81 = arith.subf %77, %80 : vector<8x1xf32>
      %82 = math.exp %81 : vector<8x1xf32>
      %83 = vector.broadcast %80 : vector<8x1xf32> to vector<8x16xf32>
      %84 = arith.subf %76, %83 : vector<8x16xf32>
      %85 = math.exp %84 : vector<8x16xf32>
      %c0_60 = arith.constant 0 : index
      %c2_61 = arith.constant 2 : index
      %86 = vector.load %arg10[%c0_60, %c2_61] : memref<8x4xf32, #tpu.memory_space<vmem>>, vector<8x1xf32>
      %87 = arith.mulf %82, %86 : vector<8x1xf32>
      %cst_62 = arith.constant dense<0.000000e+00> : vector<8xf32>
      %88 = vector.multi_reduction <add>, %85, %cst_62 [1] : vector<8x16xf32> to vector<8xf32>
      %89 = vector.shape_cast %88 : vector<8xf32> to vector<8x1xf32>
      %90 = arith.addf %87, %89 : vector<8x1xf32>
      %c0_63 = arith.constant 0 : index
      %c2_64 = arith.constant 2 : index
      %91 = vector.load %arg10[%c0_63, %c2_64] : memref<8x4xf32, #tpu.memory_space<vmem>>, vector<8x1xf32>
      tpu.vector_store %arg10[%c0_63, %c2_64], %90 {strides = array<i32>} : memref<8x4xf32, #tpu.memory_space<vmem>>, vector<8x1xf32>,
      %cst_65 = arith.constant dense<0.000000e+00> : vector<8x8xf32>
      %92 = tpu.matmul %85, %75, %cst_65 {dimension_numbers = #tpu.dot_dimension_numbers<[1], [0], [0], [1], [0, 0, 1, 1], [], []>} : vector<8x16xf32>, vector<16x8xf32>, vector<8x8xf32> -> vector<8x8xf32>
      %c0_66 = arith.constant 0 : index
      %c16_67 = arith.constant 16 : index
      %93 = vector.load %arg11[%c0_66, %c16_67] : memref<8x32xf32, #tpu.memory_space<vmem>>, vector<8x8xf32>
      %94 = vector.broadcast %82 : vector<8x1xf32> to vector<8x8xf32>
      %95 = arith.mulf %94, %93 : vector<8x8xf32>
      %96 = arith.addf %95, %92 : vector<8x8xf32>
      %c0_68 = arith.constant 0 : index
      %c16_69 = arith.constant 16 : index
      %97 = vector.load %arg11[%c0_68, %c16_69] : memref<8x32xf32, #tpu.memory_space<vmem>>, vector<8x8xf32>
      tpu.vector_store %arg11[%c0_68, %c16_69], %96 {strides = array<i32>} : memref<8x32xf32, #tpu.memory_space<vmem>>, vector<8x8xf32>,
      %c0_70 = arith.constant 0 : index
      %c2_71 = arith.constant 2 : index
      %98 = vector.load %arg9[%c0_70, %c2_71] : memref<8x4xf32, #tpu.memory_space<vmem>>, vector<8x1xf32>
      tpu.vector_store %arg9[%c0_70, %c2_71], %80 {strides = array<i32>} : memref<8x4xf32, #tpu.memory_space<vmem>>, vector<8x1xf32>,
      %c0_72 = arith.constant 0 : index
      %c0_73 = arith.constant 0 : index
      %c24 = arith.constant 24 : index
      %99 = vector.load %arg3[%c0_72, %c0_73, %c24] : memref<1x8x32xf32, #tpu.memory_space<vmem>>, vector<1x8x8xf32>
      %100 = vector.shape_cast %99 : vector<1x8x8xf32> to vector<8x8xf32>
      %c0_74 = arith.constant 0 : index
      %c0_75 = arith.constant 0 : index
      %c24_76 = arith.constant 24 : index
      %101 = vector.load %arg4[%c0_74, %c0_75, %c24_76] : memref<1x16x64xf32, #tpu.memory_space<vmem>>, vector<1x16x8xf32>
      %102 = vector.shape_cast %101 : vector<1x16x8xf32> to vector<16x8xf32>
      %c0_77 = arith.constant 0 : index
      %c0_78 = arith.constant 0 : index
      %c56 = arith.constant 56 : index
      %103 = vector.load %arg4[%c0_77, %c0_78, %c56] : memref<1x16x64xf32, #tpu.memory_space<vmem>>, vector<1x16x8xf32>
      %104 = vector.shape_cast %103 : vector<1x16x8xf32> to vector<16x8xf32>
      %cst_79 = arith.constant dense<0.000000e+00> : vector<8x16xf32>
      %105 = tpu.matmul %100, %102, %cst_79 {dimension_numbers = #tpu.dot_dimension_numbers<[1], [1], [0], [0], [0, 0, 1, 0], [], []>} : vector<8x8xf32>, vector<16x8xf32>, vector<8x16xf32> -> vector<8x16xf32>
      %c0_80 = arith.constant 0 : index
      %c3 = arith.constant 3 : index
      %106 = vector.load %arg9[%c0_80, %c3] : memref<8x4xf32, #tpu.memory_space<vmem>>, vector<8x1xf32>
      %cst_81 = arith.constant dense<0xFF800000> : vector<8xf32>
      %107 = vector.multi_reduction <maximumf>, %105, %cst_81 [1] : vector<8x16xf32> to vector<8xf32>
      %108 = vector.shape_cast %107 : vector<8xf32> to vector<8x1xf32>
      %109 = arith.maximumf %106, %108 : vector<8x1xf32>
      %110 = arith.subf %106, %109 : vector<8x1xf32>
      %111 = math.exp %110 : vector<8x1xf32>
      %112 = vector.broadcast %109 : vector<8x1xf32> to vector<8x16xf32>
      %113 = arith.subf %105, %112 : vector<8x16xf32>
      %114 = math.exp %113 : vector<8x16xf32>
      %c0_82 = arith.constant 0 : index
      %c3_83 = arith.constant 3 : index
      %115 = vector.load %arg10[%c0_82, %c3_83] : memref<8x4xf32, #tpu.memory_space<vmem>>, vector<8x1xf32>
      %116 = arith.mulf %111, %115 : vector<8x1xf32>
      %cst_84 = arith.constant dense<0.000000e+00> : vector<8xf32>
      %117 = vector.multi_reduction <add>, %114, %cst_84 [1] : vector<8x16xf32> to vector<8xf32>
      %118 = vector.shape_cast %117 : vector<8xf32> to vector<8x1xf32>
      %119 = arith.addf %116, %118 : vector<8x1xf32>
      %c0_85 = arith.constant 0 : index
      %c3_86 = arith.constant 3 : index
      %120 = vector.load %arg10[%c0_85, %c3_86] : memref<8x4xf32, #tpu.memory_space<vmem>>, vector<8x1xf32>
      tpu.vector_store %arg10[%c0_85, %c3_86], %119 {strides = array<i32>} : memref<8x4xf32, #tpu.memory_space<vmem>>, vector<8x1xf32>,
      %cst_87 = arith.constant dense<0.000000e+00> : vector<8x8xf32>
      %121 = tpu.matmul %114, %104, %cst_87 {dimension_numbers = #tpu.dot_dimension_numbers<[1], [0], [0], [1], [0, 0, 1, 1], [], []>} : vector<8x16xf32>, vector<16x8xf32>, vector<8x8xf32> -> vector<8x8xf32>
      %c0_88 = arith.constant 0 : index
      %c24_89 = arith.constant 24 : index
      %122 = vector.load %arg11[%c0_88, %c24_89] : memref<8x32xf32, #tpu.memory_space<vmem>>, vector<8x8xf32>
      %123 = vector.broadcast %111 : vector<8x1xf32> to vector<8x8xf32>
      %124 = arith.mulf %123, %122 : vector<8x8xf32>
      %125 = arith.addf %124, %121 : vector<8x8xf32>
      %c0_90 = arith.constant 0 : index
      %c24_91 = arith.constant 24 : index
      %126 = vector.load %arg11[%c0_90, %c24_91] : memref<8x32xf32, #tpu.memory_space<vmem>>, vector<8x8xf32>
      tpu.vector_store %arg11[%c0_90, %c24_91], %125 {strides = array<i32>} : memref<8x32xf32, #tpu.memory_space<vmem>>, vector<8x8xf32>,
      %c0_92 = arith.constant 0 : index
      %c3_93 = arith.constant 3 : index
      %127 = vector.load %arg9[%c0_92, %c3_93] : memref<8x4xf32, #tpu.memory_space<vmem>>, vector<8x1xf32>
      tpu.vector_store %arg9[%c0_92, %c3_93], %109 {strides = array<i32>} : memref<8x4xf32, #tpu.memory_space<vmem>>, vector<8x1xf32>,
    } else {
    }
    %c1_i32_2 = arith.constant 1 : i32
    %6 = arith.cmpi sge, %arg2, %c1_i32_2 : i32
    %7 = arith.extui %6 : i1 to i32
    %c0_i32_3 = arith.constant 0 : i32
    %8 = arith.cmpi ne, %7, %c0_i32_3 : i32
    scf.if %8 {
      %c0 = arith.constant 0 : index
      %c0_6 = arith.constant 0 : index
      %c0_7 = arith.constant 0 : index
      %12 = vector.load %arg3[%c0, %c0_6, %c0_7] : memref<1x8x32xf32, #tpu.memory_space<vmem>>, vector<1x8x8xf32>
      %13 = vector.shape_cast %12 : vector<1x8x8xf32> to vector<8x8xf32>
      %c0_8 = arith.constant 0 : index
      %c0_9 = arith.constant 0 : index
      %c0_10 = arith.constant 0 : index
      %14 = vector.load %arg5[%c0_8, %c0_9, %c0_10] : memref<1x8x64xf32, #tpu.memory_space<vmem>>, vector<1x8x8xf32>
      %15 = vector.shape_cast %14 : vector<1x8x8xf32> to vector<8x8xf32>
      %c0_11 = arith.constant 0 : index
      %c0_12 = arith.constant 0 : index
      %c32 = arith.constant 32 : index
      %16 = vector.load %arg5[%c0_11, %c0_12, %c32] : memref<1x8x64xf32, #tpu.memory_space<vmem>>, vector<1x8x8xf32>
      %17 = vector.shape_cast %16 : vector<1x8x8xf32> to vector<8x8xf32>
      %cst = arith.constant dense<0.000000e+00> : vector<8x8xf32>
      %18 = tpu.matmul %13, %15, %cst {dimension_numbers = #tpu.dot_dimension_numbers<[1], [1], [0], [0], [0, 0, 1, 0], [], []>} : vector<8x8xf32>, vector<8x8xf32>, vector<8x8xf32> -> vector<8x8xf32>
      %c0_13 = arith.constant 0 : index
      %c0_14 = arith.constant 0 : index
      %19 = vector.load %arg9[%c0_13, %c0_14] : memref<8x4xf32, #tpu.memory_space<vmem>>, vector<8x1xf32>
      %cst_15 = arith.constant dense<0xFF800000> : vector<8xf32>
      %20 = vector.multi_reduction <maximumf>, %18, %cst_15 [1] : vector<8x8xf32> to vector<8xf32>
      %21 = vector.shape_cast %20 : vector<8xf32> to vector<8x1xf32>
      %22 = arith.maximumf %19, %21 : vector<8x1xf32>
      %23 = arith.subf %19, %22 : vector<8x1xf32>
      %24 = math.exp %23 : vector<8x1xf32>
      %25 = vector.broadcast %22 : vector<8x1xf32> to vector<8x8xf32>
      %26 = arith.subf %18, %25 : vector<8x8xf32>
      %27 = math.exp %26 : vector<8x8xf32>
      %c0_16 = arith.constant 0 : index
      %c0_17 = arith.constant 0 : index
      %28 = vector.load %arg10[%c0_16, %c0_17] : memref<8x4xf32, #tpu.memory_space<vmem>>, vector<8x1xf32>
      %29 = arith.mulf %24, %28 : vector<8x1xf32>
      %cst_18 = arith.constant dense<0.000000e+00> : vector<8xf32>
      %30 = vector.multi_reduction <add>, %27, %cst_18 [1] : vector<8x8xf32> to vector<8xf32>
      %31 = vector.shape_cast %30 : vector<8xf32> to vector<8x1xf32>
      %32 = arith.addf %29, %31 : vector<8x1xf32>
      %c0_19 = arith.constant 0 : index
      %c0_20 = arith.constant 0 : index
      %33 = vector.load %arg10[%c0_19, %c0_20] : memref<8x4xf32, #tpu.memory_space<vmem>>, vector<8x1xf32>
      tpu.vector_store %arg10[%c0_19, %c0_20], %32 {strides = array<i32>} : memref<8x4xf32, #tpu.memory_space<vmem>>, vector<8x1xf32>,
      %cst_21 = arith.constant dense<0.000000e+00> : vector<8x8xf32>
      %34 = tpu.matmul %27, %17, %cst_21 {dimension_numbers = #tpu.dot_dimension_numbers<[1], [0], [0], [1], [0, 0, 1, 1], [], []>} : vector<8x8xf32>, vector<8x8xf32>, vector<8x8xf32> -> vector<8x8xf32>
      %c0_22 = arith.constant 0 : index
      %c0_23 = arith.constant 0 : index
      %35 = vector.load %arg11[%c0_22, %c0_23] : memref<8x32xf32, #tpu.memory_space<vmem>>, vector<8x8xf32>
      %36 = vector.broadcast %24 : vector<8x1xf32> to vector<8x8xf32>
      %37 = arith.mulf %36, %35 : vector<8x8xf32>
      %38 = arith.addf %37, %34 : vector<8x8xf32>
      %c0_24 = arith.constant 0 : index
      %c0_25 = arith.constant 0 : index
      %39 = vector.load %arg11[%c0_24, %c0_25] : memref<8x32xf32, #tpu.memory_space<vmem>>, vector<8x8xf32>
      tpu.vector_store %arg11[%c0_24, %c0_25], %38 {strides = array<i32>} : memref<8x32xf32, #tpu.memory_space<vmem>>, vector<8x8xf32>,
      %c0_26 = arith.constant 0 : index
      %c0_27 = arith.constant 0 : index
      %40 = vector.load %arg9[%c0_26, %c0_27] : memref<8x4xf32, #tpu.memory_space<vmem>>, vector<8x1xf32>
      tpu.vector_store %arg9[%c0_26, %c0_27], %22 {strides = array<i32>} : memref<8x4xf32, #tpu.memory_space<vmem>>, vector<8x1xf32>,
      %c0_28 = arith.constant 0 : index
      %c0_29 = arith.constant 0 : index
      %c8 = arith.constant 8 : index
      %41 = vector.load %arg3[%c0_28, %c0_29, %c8] : memref<1x8x32xf32, #tpu.memory_space<vmem>>, vector<1x8x8xf32>
      %42 = vector.shape_cast %41 : vector<1x8x8xf32> to vector<8x8xf32>
      %c0_30 = arith.constant 0 : index
      %c0_31 = arith.constant 0 : index
      %c8_32 = arith.constant 8 : index
      %43 = vector.load %arg5[%c0_30, %c0_31, %c8_32] : memref<1x8x64xf32, #tpu.memory_space<vmem>>, vector<1x8x8xf32>
      %44 = vector.shape_cast %43 : vector<1x8x8xf32> to vector<8x8xf32>
      %c0_33 = arith.constant 0 : index
      %c0_34 = arith.constant 0 : index
      %c40 = arith.constant 40 : index
      %45 = vector.load %arg5[%c0_33, %c0_34, %c40] : memref<1x8x64xf32, #tpu.memory_space<vmem>>, vector<1x8x8xf32>
      %46 = vector.shape_cast %45 : vector<1x8x8xf32> to vector<8x8xf32>
      %cst_35 = arith.constant dense<0.000000e+00> : vector<8x8xf32>
      %47 = tpu.matmul %42, %44, %cst_35 {dimension_numbers = #tpu.dot_dimension_numbers<[1], [1], [0], [0], [0, 0, 1, 0], [], []>} : vector<8x8xf32>, vector<8x8xf32>, vector<8x8xf32> -> vector<8x8xf32>
      %c0_36 = arith.constant 0 : index
      %c1 = arith.constant 1 : index
      %48 = vector.load %arg9[%c0_36, %c1] : memref<8x4xf32, #tpu.memory_space<vmem>>, vector<8x1xf32>
      %cst_37 = arith.constant dense<0xFF800000> : vector<8xf32>
      %49 = vector.multi_reduction <maximumf>, %47, %cst_37 [1] : vector<8x8xf32> to vector<8xf32>
      %50 = vector.shape_cast %49 : vector<8xf32> to vector<8x1xf32>
      %51 = arith.maximumf %48, %50 : vector<8x1xf32>
      %52 = arith.subf %48, %51 : vector<8x1xf32>
      %53 = math.exp %52 : vector<8x1xf32>
      %54 = vector.broadcast %51 : vector<8x1xf32> to vector<8x8xf32>
      %55 = arith.subf %47, %54 : vector<8x8xf32>
      %56 = math.exp %55 : vector<8x8xf32>
      %c0_38 = arith.constant 0 : index
      %c1_39 = arith.constant 1 : index
      %57 = vector.load %arg10[%c0_38, %c1_39] : memref<8x4xf32, #tpu.memory_space<vmem>>, vector<8x1xf32>
      %58 = arith.mulf %53, %57 : vector<8x1xf32>
      %cst_40 = arith.constant dense<0.000000e+00> : vector<8xf32>
      %59 = vector.multi_reduction <add>, %56, %cst_40 [1] : vector<8x8xf32> to vector<8xf32>
      %60 = vector.shape_cast %59 : vector<8xf32> to vector<8x1xf32>
      %61 = arith.addf %58, %60 : vector<8x1xf32>
      %c0_41 = arith.constant 0 : index
      %c1_42 = arith.constant 1 : index
      %62 = vector.load %arg10[%c0_41, %c1_42] : memref<8x4xf32, #tpu.memory_space<vmem>>, vector<8x1xf32>
      tpu.vector_store %arg10[%c0_41, %c1_42], %61 {strides = array<i32>} : memref<8x4xf32, #tpu.memory_space<vmem>>, vector<8x1xf32>,
      %cst_43 = arith.constant dense<0.000000e+00> : vector<8x8xf32>
      %63 = tpu.matmul %56, %46, %cst_43 {dimension_numbers = #tpu.dot_dimension_numbers<[1], [0], [0], [1], [0, 0, 1, 1], [], []>} : vector<8x8xf32>, vector<8x8xf32>, vector<8x8xf32> -> vector<8x8xf32>
      %c0_44 = arith.constant 0 : index
      %c8_45 = arith.constant 8 : index
      %64 = vector.load %arg11[%c0_44, %c8_45] : memref<8x32xf32, #tpu.memory_space<vmem>>, vector<8x8xf32>
      %65 = vector.broadcast %53 : vector<8x1xf32> to vector<8x8xf32>
      %66 = arith.mulf %65, %64 : vector<8x8xf32>
      %67 = arith.addf %66, %63 : vector<8x8xf32>
      %c0_46 = arith.constant 0 : index
      %c8_47 = arith.constant 8 : index
      %68 = vector.load %arg11[%c0_46, %c8_47] : memref<8x32xf32, #tpu.memory_space<vmem>>, vector<8x8xf32>
      tpu.vector_store %arg11[%c0_46, %c8_47], %67 {strides = array<i32>} : memref<8x32xf32, #tpu.memory_space<vmem>>, vector<8x8xf32>,
      %c0_48 = arith.constant 0 : index
      %c1_49 = arith.constant 1 : index
      %69 = vector.load %arg9[%c0_48, %c1_49] : memref<8x4xf32, #tpu.memory_space<vmem>>, vector<8x1xf32>
      tpu.vector_store %arg9[%c0_48, %c1_49], %51 {strides = array<i32>} : memref<8x4xf32, #tpu.memory_space<vmem>>, vector<8x1xf32>,
      %c0_50 = arith.constant 0 : index
      %c0_51 = arith.constant 0 : index
      %c16 = arith.constant 16 : index
      %70 = vector.load %arg3[%c0_50, %c0_51, %c16] : memref<1x8x32xf32, #tpu.memory_space<vmem>>, vector<1x8x8xf32>
      %71 = vector.shape_cast %70 : vector<1x8x8xf32> to vector<8x8xf32>
      %c0_52 = arith.constant 0 : index
      %c0_53 = arith.constant 0 : index
      %c16_54 = arith.constant 16 : index
      %72 = vector.load %arg5[%c0_52, %c0_53, %c16_54] : memref<1x8x64xf32, #tpu.memory_space<vmem>>, vector<1x8x8xf32>
      %73 = vector.shape_cast %72 : vector<1x8x8xf32> to vector<8x8xf32>
      %c0_55 = arith.constant 0 : index
      %c0_56 = arith.constant 0 : index
      %c48 = arith.constant 48 : index
      %74 = vector.load %arg5[%c0_55, %c0_56, %c48] : memref<1x8x64xf32, #tpu.memory_space<vmem>>, vector<1x8x8xf32>
      %75 = vector.shape_cast %74 : vector<1x8x8xf32> to vector<8x8xf32>
      %cst_57 = arith.constant dense<0.000000e+00> : vector<8x8xf32>
      %76 = tpu.matmul %71, %73, %cst_57 {dimension_numbers = #tpu.dot_dimension_numbers<[1], [1], [0], [0], [0, 0, 1, 0], [], []>} : vector<8x8xf32>, vector<8x8xf32>, vector<8x8xf32> -> vector<8x8xf32>
      %c0_58 = arith.constant 0 : index
      %c2 = arith.constant 2 : index
      %77 = vector.load %arg9[%c0_58, %c2] : memref<8x4xf32, #tpu.memory_space<vmem>>, vector<8x1xf32>
      %cst_59 = arith.constant dense<0xFF800000> : vector<8xf32>
      %78 = vector.multi_reduction <maximumf>, %76, %cst_59 [1] : vector<8x8xf32> to vector<8xf32>
      %79 = vector.shape_cast %78 : vector<8xf32> to vector<8x1xf32>
      %80 = arith.maximumf %77, %79 : vector<8x1xf32>
      %81 = arith.subf %77, %80 : vector<8x1xf32>
      %82 = math.exp %81 : vector<8x1xf32>
      %83 = vector.broadcast %80 : vector<8x1xf32> to vector<8x8xf32>
      %84 = arith.subf %76, %83 : vector<8x8xf32>
      %85 = math.exp %84 : vector<8x8xf32>
      %c0_60 = arith.constant 0 : index
      %c2_61 = arith.constant 2 : index
      %86 = vector.load %arg10[%c0_60, %c2_61] : memref<8x4xf32, #tpu.memory_space<vmem>>, vector<8x1xf32>
      %87 = arith.mulf %82, %86 : vector<8x1xf32>
      %cst_62 = arith.constant dense<0.000000e+00> : vector<8xf32>
      %88 = vector.multi_reduction <add>, %85, %cst_62 [1] : vector<8x8xf32> to vector<8xf32>
      %89 = vector.shape_cast %88 : vector<8xf32> to vector<8x1xf32>
      %90 = arith.addf %87, %89 : vector<8x1xf32>
      %c0_63 = arith.constant 0 : index
      %c2_64 = arith.constant 2 : index
      %91 = vector.load %arg10[%c0_63, %c2_64] : memref<8x4xf32, #tpu.memory_space<vmem>>, vector<8x1xf32>
      tpu.vector_store %arg10[%c0_63, %c2_64], %90 {strides = array<i32>} : memref<8x4xf32, #tpu.memory_space<vmem>>, vector<8x1xf32>,
      %cst_65 = arith.constant dense<0.000000e+00> : vector<8x8xf32>
      %92 = tpu.matmul %85, %75, %cst_65 {dimension_numbers = #tpu.dot_dimension_numbers<[1], [0], [0], [1], [0, 0, 1, 1], [], []>} : vector<8x8xf32>, vector<8x8xf32>, vector<8x8xf32> -> vector<8x8xf32>
      %c0_66 = arith.constant 0 : index
      %c16_67 = arith.constant 16 : index
      %93 = vector.load %arg11[%c0_66, %c16_67] : memref<8x32xf32, #tpu.memory_space<vmem>>, vector<8x8xf32>
      %94 = vector.broadcast %82 : vector<8x1xf32> to vector<8x8xf32>
      %95 = arith.mulf %94, %93 : vector<8x8xf32>
      %96 = arith.addf %95, %92 : vector<8x8xf32>
      %c0_68 = arith.constant 0 : index
      %c16_69 = arith.constant 16 : index
      %97 = vector.load %arg11[%c0_68, %c16_69] : memref<8x32xf32, #tpu.memory_space<vmem>>, vector<8x8xf32>
      tpu.vector_store %arg11[%c0_68, %c16_69], %96 {strides = array<i32>} : memref<8x32xf32, #tpu.memory_space<vmem>>, vector<8x8xf32>,
      %c0_70 = arith.constant 0 : index
      %c2_71 = arith.constant 2 : index
      %98 = vector.load %arg9[%c0_70, %c2_71] : memref<8x4xf32, #tpu.memory_space<vmem>>, vector<8x1xf32>
      tpu.vector_store %arg9[%c0_70, %c2_71], %80 {strides = array<i32>} : memref<8x4xf32, #tpu.memory_space<vmem>>, vector<8x1xf32>,
      %c0_72 = arith.constant 0 : index
      %c0_73 = arith.constant 0 : index
      %c24 = arith.constant 24 : index
      %99 = vector.load %arg3[%c0_72, %c0_73, %c24] : memref<1x8x32xf32, #tpu.memory_space<vmem>>, vector<1x8x8xf32>
      %100 = vector.shape_cast %99 : vector<1x8x8xf32> to vector<8x8xf32>
      %c0_74 = arith.constant 0 : index
      %c0_75 = arith.constant 0 : index
      %c24_76 = arith.constant 24 : index
      %101 = vector.load %arg5[%c0_74, %c0_75, %c24_76] : memref<1x8x64xf32, #tpu.memory_space<vmem>>, vector<1x8x8xf32>
      %102 = vector.shape_cast %101 : vector<1x8x8xf32> to vector<8x8xf32>
      %c0_77 = arith.constant 0 : index
      %c0_78 = arith.constant 0 : index
      %c56 = arith.constant 56 : index
      %103 = vector.load %arg5[%c0_77, %c0_78, %c56] : memref<1x8x64xf32, #tpu.memory_space<vmem>>, vector<1x8x8xf32>
      %104 = vector.shape_cast %103 : vector<1x8x8xf32> to vector<8x8xf32>
      %cst_79 = arith.constant dense<0.000000e+00> : vector<8x8xf32>
      %105 = tpu.matmul %100, %102, %cst_79 {dimension_numbers = #tpu.dot_dimension_numbers<[1], [1], [0], [0], [0, 0, 1, 0], [], []>} : vector<8x8xf32>, vector<8x8xf32>, vector<8x8xf32> -> vector<8x8xf32>
      %c0_80 = arith.constant 0 : index
      %c3 = arith.constant 3 : index
      %106 = vector.load %arg9[%c0_80, %c3] : memref<8x4xf32, #tpu.memory_space<vmem>>, vector<8x1xf32>
      %cst_81 = arith.constant dense<0xFF800000> : vector<8xf32>
      %107 = vector.multi_reduction <maximumf>, %105, %cst_81 [1] : vector<8x8xf32> to vector<8xf32>
      %108 = vector.shape_cast %107 : vector<8xf32> to vector<8x1xf32>
      %109 = arith.maximumf %106, %108 : vector<8x1xf32>
      %110 = arith.subf %106, %109 : vector<8x1xf32>
      %111 = math.exp %110 : vector<8x1xf32>
      %112 = vector.broadcast %109 : vector<8x1xf32> to vector<8x8xf32>
      %113 = arith.subf %105, %112 : vector<8x8xf32>
      %114 = math.exp %113 : vector<8x8xf32>
      %c0_82 = arith.constant 0 : index
      %c3_83 = arith.constant 3 : index
      %115 = vector.load %arg10[%c0_82, %c3_83] : memref<8x4xf32, #tpu.memory_space<vmem>>, vector<8x1xf32>
      %116 = arith.mulf %111, %115 : vector<8x1xf32>
      %cst_84 = arith.constant dense<0.000000e+00> : vector<8xf32>
      %117 = vector.multi_reduction <add>, %114, %cst_84 [1] : vector<8x8xf32> to vector<8xf32>
      %118 = vector.shape_cast %117 : vector<8xf32> to vector<8x1xf32>
      %119 = arith.addf %116, %118 : vector<8x1xf32>
      %c0_85 = arith.constant 0 : index
      %c3_86 = arith.constant 3 : index
      %120 = vector.load %arg10[%c0_85, %c3_86] : memref<8x4xf32, #tpu.memory_space<vmem>>, vector<8x1xf32>
      tpu.vector_store %arg10[%c0_85, %c3_86], %119 {strides = array<i32>} : memref<8x4xf32, #tpu.memory_space<vmem>>, vector<8x1xf32>,
      %cst_87 = arith.constant dense<0.000000e+00> : vector<8x8xf32>
      %121 = tpu.matmul %114, %104, %cst_87 {dimension_numbers = #tpu.dot_dimension_numbers<[1], [0], [0], [1], [0, 0, 1, 1], [], []>} : vector<8x8xf32>, vector<8x8xf32>, vector<8x8xf32> -> vector<8x8xf32>
      %c0_88 = arith.constant 0 : index
      %c24_89 = arith.constant 24 : index
      %122 = vector.load %arg11[%c0_88, %c24_89] : memref<8x32xf32, #tpu.memory_space<vmem>>, vector<8x8xf32>
      %123 = vector.broadcast %111 : vector<8x1xf32> to vector<8x8xf32>
      %124 = arith.mulf %123, %122 : vector<8x8xf32>
      %125 = arith.addf %124, %121 : vector<8x8xf32>
      %c0_90 = arith.constant 0 : index
      %c24_91 = arith.constant 24 : index
      %126 = vector.load %arg11[%c0_90, %c24_91] : memref<8x32xf32, #tpu.memory_space<vmem>>, vector<8x8xf32>
      tpu.vector_store %arg11[%c0_90, %c24_91], %125 {strides = array<i32>} : memref<8x32xf32, #tpu.memory_space<vmem>>, vector<8x8xf32>,
      %c0_92 = arith.constant 0 : index
      %c3_93 = arith.constant 3 : index
      %127 = vector.load %arg9[%c0_92, %c3_93] : memref<8x4xf32, #tpu.memory_space<vmem>>, vector<8x1xf32>
      tpu.vector_store %arg9[%c0_92, %c3_93], %109 {strides = array<i32>} : memref<8x4xf32, #tpu.memory_space<vmem>>, vector<8x1xf32>,
    } else {
    }
    %c1_i32_4 = arith.constant 1 : i32
    %9 = arith.cmpi eq, %arg2, %c1_i32_4 : i32
    %10 = arith.extui %9 : i1 to i32
    %c0_i32_5 = arith.constant 0 : i32
    %11 = arith.cmpi ne, %10, %c0_i32_5 : i32
    scf.if %11 {
      %c0 = arith.constant 0 : index
      %c0_6 = arith.constant 0 : index
      %12 = vector.load %arg10[%c0, %c0_6] : memref<8x4xf32, #tpu.memory_space<vmem>>, vector<8x1xf32>
      %13 = tpu.reciprocal %12 : vector<8x1xf32> -> vector<8x1xf32>
      %c0_7 = arith.constant 0 : index
      %c0_8 = arith.constant 0 : index
      %14 = vector.load %arg11[%c0_7, %c0_8] : memref<8x32xf32, #tpu.memory_space<vmem>>, vector<8x8xf32>
      %15 = vector.broadcast %13 : vector<8x1xf32> to vector<8x8xf32>
      %16 = arith.mulf %14, %15 : vector<8x8xf32>
      %c0_9 = arith.constant 0 : index
      %c0_10 = arith.constant 0 : index
      %17 = vector.load %arg11[%c0_9, %c0_10] : memref<8x32xf32, #tpu.memory_space<vmem>>, vector<8x8xf32>
      tpu.vector_store %arg11[%c0_9, %c0_10], %16 {strides = array<i32>} : memref<8x32xf32, #tpu.memory_space<vmem>>, vector<8x8xf32>,
      %c0_11 = arith.constant 0 : index
      %c1 = arith.constant 1 : index
      %18 = vector.load %arg10[%c0_11, %c1] : memref<8x4xf32, #tpu.memory_space<vmem>>, vector<8x1xf32>
      %19 = tpu.reciprocal %18 : vector<8x1xf32> -> vector<8x1xf32>
      %c0_12 = arith.constant 0 : index
      %c8 = arith.constant 8 : index
      %20 = vector.load %arg11[%c0_12, %c8] : memref<8x32xf32, #tpu.memory_space<vmem>>, vector<8x8xf32>
      %21 = vector.broadcast %19 : vector<8x1xf32> to vector<8x8xf32>
      %22 = arith.mulf %20, %21 : vector<8x8xf32>
      %c0_13 = arith.constant 0 : index
      %c8_14 = arith.constant 8 : index
      %23 = vector.load %arg11[%c0_13, %c8_14] : memref<8x32xf32, #tpu.memory_space<vmem>>, vector<8x8xf32>
      tpu.vector_store %arg11[%c0_13, %c8_14], %22 {strides = array<i32>} : memref<8x32xf32, #tpu.memory_space<vmem>>, vector<8x8xf32>,
      %c0_15 = arith.constant 0 : index
      %c2 = arith.constant 2 : index
      %24 = vector.load %arg10[%c0_15, %c2] : memref<8x4xf32, #tpu.memory_space<vmem>>, vector<8x1xf32>
      %25 = tpu.reciprocal %24 : vector<8x1xf32> -> vector<8x1xf32>
      %c0_16 = arith.constant 0 : index
      %c16 = arith.constant 16 : index
      %26 = vector.load %arg11[%c0_16, %c16] : memref<8x32xf32, #tpu.memory_space<vmem>>, vector<8x8xf32>
      %27 = vector.broadcast %25 : vector<8x1xf32> to vector<8x8xf32>
      %28 = arith.mulf %26, %27 : vector<8x8xf32>
      %c0_17 = arith.constant 0 : index
      %c16_18 = arith.constant 16 : index
      %29 = vector.load %arg11[%c0_17, %c16_18] : memref<8x32xf32, #tpu.memory_space<vmem>>, vector<8x8xf32>
      tpu.vector_store %arg11[%c0_17, %c16_18], %28 {strides = array<i32>} : memref<8x32xf32, #tpu.memory_space<vmem>>, vector<8x8xf32>,
      %c0_19 = arith.constant 0 : index
      %c3 = arith.constant 3 : index
      %30 = vector.load %arg10[%c0_19, %c3] : memref<8x4xf32, #tpu.memory_space<vmem>>, vector<8x1xf32>
      %31 = tpu.reciprocal %30 : vector<8x1xf32> -> vector<8x1xf32>
      %c0_20 = arith.constant 0 : index
      %c24 = arith.constant 24 : index
      %32 = vector.load %arg11[%c0_20, %c24] : memref<8x32xf32, #tpu.memory_space<vmem>>, vector<8x8xf32>
      %33 = vector.broadcast %31 : vector<8x1xf32> to vector<8x8xf32>
      %34 = arith.mulf %32, %33 : vector<8x8xf32>
      %c0_21 = arith.constant 0 : index
      %c24_22 = arith.constant 24 : index
      %35 = vector.load %arg11[%c0_21, %c24_22] : memref<8x32xf32, #tpu.memory_space<vmem>>, vector<8x8xf32>
      tpu.vector_store %arg11[%c0_21, %c24_22], %34 {strides = array<i32>} : memref<8x32xf32, #tpu.memory_space<vmem>>, vector<8x8xf32>,
      %c0_23 = arith.constant 0 : index
      %c0_24 = arith.constant 0 : index
      %36 = vector.load %arg11[%c0_23, %c0_24] : memref<8x32xf32, #tpu.memory_space<vmem>>, vector<8x32xf32>
      %c0_25 = arith.constant 0 : index
      %c0_26 = arith.constant 0 : index
      %37 = vector.load %arg6[%c0_25, %c0_26] : memref<32x32xf32, #tpu.memory_space<vmem>>, vector<32x32xf32>
      %cst = arith.constant dense<0.000000e+00> : vector<8x32xf32>
      %38 = tpu.matmul %36, %37, %cst {dimension_numbers = #tpu.dot_dimension_numbers<[1], [0], [0], [1], [0, 0, 1, 1], [], []>} : vector<8x32xf32>, vector<32x32xf32>, vector<8x32xf32> -> vector<8x32xf32>
      %c0_27 = arith.constant 0 : index
      %c0_28 = arith.constant 0 : index
      %39 = vector.load %arg7[%c0_27, %c0_28] : memref<1x32xf32, #tpu.memory_space<vmem>>, vector<1x32xf32>
      %40 = vector.broadcast %39 : vector<1x32xf32> to vector<8x32xf32>
      %41 = arith.addf %38, %40 : vector<8x32xf32>
      %c0_29 = arith.constant 0 : index
      %c0_30 = arith.constant 0 : index
      %c0_31 = arith.constant 0 : index
      %42 = vector.load %arg8[%c0_29, %c0_30, %c0_31] : memref<1x8x32xf32, #tpu.memory_space<vmem>>, vector<1x8x32xf32>
      %43 = vector.shape_cast %42 : vector<1x8x32xf32> to vector<8x32xf32>
      %44 = vector.shape_cast %41 : vector<8x32xf32> to vector<1x8x32xf32>
      tpu.vector_store %arg8[%c0_29, %c0_30, %c0_31], %44 {strides = array<i32>} : memref<1x8x32xf32, #tpu.memory_space<vmem>>, vector<1x8x32xf32>,
    } else {
    }
    return
  }
  func.func @transform_0(%arg0: i32, %arg1: i32, %arg2: i32) -> (i32, i32, i32) {
    %c0_i32 = arith.constant 0 : i32
    %c0_i32_0 = arith.constant 0 : i32
    return %arg0, %arg1, %c0_i32 : i32, i32, i32
  }
  func.func @transform_1(%arg0: i32, %arg1: i32, %arg2: i32) -> (i32, i32, i32) {
    %c0_i32 = arith.constant 0 : i32
    %0 = arith.minsi %arg2, %c0_i32 : i32
    %c0_i32_0 = arith.constant 0 : i32
    %c0_i32_1 = arith.constant 0 : i32
    return %arg0, %0, %c0_i32_0 : i32, i32, i32
  }
  func.func @transform_2(%arg0: i32, %arg1: i32, %arg2: i32) -> (i32, i32, i32) {
    %c1_i32 = arith.constant 1 : i32
    %0 = arith.subi %arg2, %c1_i32 : i32
    %c0_i32 = arith.constant 0 : i32
    %1 = arith.maxsi %0, %c0_i32 : i32
    %c0_i32_0 = arith.constant 0 : i32
    %c0_i32_1 = arith.constant 0 : i32
    return %arg0, %1, %c0_i32_0 : i32, i32, i32
  }
  func.func @transform_3(%arg0: i32, %arg1: i32, %arg2: i32) -> (i32, i32) {
    %c0_i32 = arith.constant 0 : i32
    %c0_i32_0 = arith.constant 0 : i32
    %c0_i32_1 = arith.constant 0 : i32
    return %c0_i32, %c0_i32_0 : i32, i32
  }
  func.func @transform_4(%arg0: i32, %arg1: i32, %arg2: i32) -> (i32, i32) {
    %c0_i32 = arith.constant 0 : i32
    %c0_i32_0 = arith.constant 0 : i32
    %c0_i32_1 = arith.constant 0 : i32
    return %c0_i32, %c0_i32_0 : i32, i32
  }
  func.func @transform_5(%arg0: i32, %arg1: i32, %arg2: i32) -> (i32, i32, i32) {
    %c0_i32 = arith.constant 0 : i32
    %c0_i32_0 = arith.constant 0 : i32
    return %arg0, %arg1, %c0_i32 : i32, i32, i32
  }
}

module attributes {stable_mosaic.version = 11 : i64} {
  func.func @_dual_attn_kernel(%arg0: i32, %arg1: i32, %arg2: i32, %arg3: memref<1x16x32xf32, #tpu.memory_space<vmem>>, %arg4: memref<1x16x64xf32, #tpu.memory_space<vmem>>, %arg5: memref<1x8x64xf32, #tpu.memory_space<vmem>>, %arg6: memref<32x32xf32, #tpu.memory_space<vmem>>, %arg7: memref<1x32xf32, #tpu.memory_space<vmem>>, %arg8: memref<1x16x32xf32, #tpu.memory_space<vmem>>, %arg9: memref<16x4xf32, #tpu.memory_space<vmem>>, %arg10: memref<16x4xf32, #tpu.memory_space<vmem>>, %arg11: memref<16x32xf32, #tpu.memory_space<vmem>>) attributes {dimension_semantics = [#tpu.dimension_semantics<parallel>, #tpu.dimension_semantics<parallel>, #tpu.dimension_semantics<arbitrary>], iteration_bounds = array<i64: 2, 1, 2>, scalar_prefetch = 0 : i64, scratch_operands = 3 : i64, tpu.core_type = #tpu.core_type<tc>, window_params = [{transform_indices = @transform_0, window_bounds = array<i64: 1, 16, 32>}, {transform_indices = @transform_1, window_bounds = array<i64: 1, 16, 64>}, {transform_indices = @transform_2, window_bounds = array<i64: 1, 8, 64>}, {pipeline_mode = #tpu.pipeline_mode<synchronous>, transform_indices = @transform_3, window_bounds = array<i64: 32, 32>}, {pipeline_mode = #tpu.pipeline_mode<synchronous>, transform_indices = @transform_4, window_bounds = array<i64: 1, 32>}, {transform_indices = @transform_5, window_bounds = array<i64: 1, 16, 32>}]} {
    %c0_i32 = arith.constant 0 : i32
    %0 = arith.cmpi eq, %arg2, %c0_i32 : i32
    %1 = arith.extui %0 : i1 to i32
    %c0_i32_0 = arith.constant 0 : i32
    %2 = arith.cmpi ne, %1, %c0_i32_0 : i32
    scf.if %2 {
      %cst = arith.constant 0xFF800000 : f32
      %12 = vector.broadcast %cst : f32 to vector<16x4xf32>
      %c0 = arith.constant 0 : index
      %c0_6 = arith.constant 0 : index
      %13 = vector.load %arg9[%c0, %c0_6] : memref<16x4xf32, #tpu.memory_space<vmem>>, vector<16x4xf32>
      tpu.vector_store %arg9[%c0, %c0_6], %12 {strides = array<i32>} : memref<16x4xf32, #tpu.memory_space<vmem>>, vector<16x4xf32>,
      %cst_7 = arith.constant 0.000000e+00 : f32
      %14 = vector.broadcast %cst_7 : f32 to vector<16x4xf32>
      %c0_8 = arith.constant 0 : index
      %c0_9 = arith.constant 0 : index
      %15 = vector.load %arg10[%c0_8, %c0_9] : memref<16x4xf32, #tpu.memory_space<vmem>>, vector<16x4xf32>
      tpu.vector_store %arg10[%c0_8, %c0_9], %14 {strides = array<i32>} : memref<16x4xf32, #tpu.memory_space<vmem>>, vector<16x4xf32>,
      %cst_10 = arith.constant 0.000000e+00 : f32
      %16 = vector.broadcast %cst_10 : f32 to vector<16x32xf32>
      %c0_11 = arith.constant 0 : index
      %c0_12 = arith.constant 0 : index
      %17 = vector.load %arg11[%c0_11, %c0_12] : memref<16x32xf32, #tpu.memory_space<vmem>>, vector<16x32xf32>
      tpu.vector_store %arg11[%c0_11, %c0_12], %16 {strides = array<i32>} : memref<16x32xf32, #tpu.memory_space<vmem>>, vector<16x32xf32>,
    } else {
    }
    %c1_i32 = arith.constant 1 : i32
    %3 = arith.cmpi slt, %arg2, %c1_i32 : i32
    %4 = arith.extui %3 : i1 to i32
    %c0_i32_1 = arith.constant 0 : i32
    %5 = arith.cmpi ne, %4, %c0_i32_1 : i32
    scf.if %5 {
      %c0 = arith.constant 0 : index
      %c0_6 = arith.constant 0 : index
      %c0_7 = arith.constant 0 : index
      %12 = vector.load %arg3[%c0, %c0_6, %c0_7] : memref<1x16x32xf32, #tpu.memory_space<vmem>>, vector<1x16x8xf32>
      %13 = vector.shape_cast %12 : vector<1x16x8xf32> to vector<16x8xf32>
      %c0_8 = arith.constant 0 : index
      %c0_9 = arith.constant 0 : index
      %c0_10 = arith.constant 0 : index
      %14 = vector.load %arg4[%c0_8, %c0_9, %c0_10] : memref<1x16x64xf32, #tpu.memory_space<vmem>>, vector<1x16x8xf32>
      %15 = vector.shape_cast %14 : vector<1x16x8xf32> to vector<16x8xf32>
      %c0_11 = arith.constant 0 : index
      %c0_12 = arith.constant 0 : index
      %c32 = arith.constant 32 : index
      %16 = vector.load %arg4[%c0_11, %c0_12, %c32] : memref<1x16x64xf32, #tpu.memory_space<vmem>>, vector<1x16x8xf32>
      %17 = vector.shape_cast %16 : vector<1x16x8xf32> to vector<16x8xf32>
      %cst = arith.constant dense<0.000000e+00> : vector<16x16xf32>
      %18 = tpu.matmul %13, %15, %cst {dimension_numbers = #tpu.dot_dimension_numbers<[1], [1], [0], [0], [0, 0, 1, 0], [], []>} : vector<16x8xf32>, vector<16x8xf32>, vector<16x16xf32> -> vector<16x16xf32>
      %c0_13 = arith.constant 0 : index
      %c0_14 = arith.constant 0 : index
      %19 = vector.load %arg9[%c0_13, %c0_14] : memref<16x4xf32, #tpu.memory_space<vmem>>, vector<16x1xf32>
      %cst_15 = arith.constant dense<0xFF800000> : vector<16xf32>
      %20 = vector.multi_reduction <maximumf>, %18, %cst_15 [1] : vector<16x16xf32> to vector<16xf32>
      %21 = vector.shape_cast %20 : vector<16xf32> to vector<16x1xf32>
      %22 = arith.maximumf %19, %21 : vector<16x1xf32>
      %23 = arith.subf %19, %22 : vector<16x1xf32>
      %24 = math.exp %23 : vector<16x1xf32>
      %25 = vector.broadcast %22 : vector<16x1xf32> to vector<16x16xf32>
      %26 = arith.subf %18, %25 : vector<16x16xf32>
      %27 = math.exp %26 : vector<16x16xf32>
      %c0_16 = arith.constant 0 : index
      %c0_17 = arith.constant 0 : index
      %28 = vector.load %arg10[%c0_16, %c0_17] : memref<16x4xf32, #tpu.memory_space<vmem>>, vector<16x1xf32>
      %29 = arith.mulf %24, %28 : vector<16x1xf32>
      %cst_18 = arith.constant dense<0.000000e+00> : vector<16xf32>
      %30 = vector.multi_reduction <add>, %27, %cst_18 [1] : vector<16x16xf32> to vector<16xf32>
      %31 = vector.shape_cast %30 : vector<16xf32> to vector<16x1xf32>
      %32 = arith.addf %29, %31 : vector<16x1xf32>
      %c0_19 = arith.constant 0 : index
      %c0_20 = arith.constant 0 : index
      %33 = vector.load %arg10[%c0_19, %c0_20] : memref<16x4xf32, #tpu.memory_space<vmem>>, vector<16x1xf32>
      tpu.vector_store %arg10[%c0_19, %c0_20], %32 {strides = array<i32>} : memref<16x4xf32, #tpu.memory_space<vmem>>, vector<16x1xf32>,
      %cst_21 = arith.constant dense<0.000000e+00> : vector<16x8xf32>
      %34 = tpu.matmul %27, %17, %cst_21 {dimension_numbers = #tpu.dot_dimension_numbers<[1], [0], [0], [1], [0, 0, 1, 1], [], []>} : vector<16x16xf32>, vector<16x8xf32>, vector<16x8xf32> -> vector<16x8xf32>
      %c0_22 = arith.constant 0 : index
      %c0_23 = arith.constant 0 : index
      %35 = vector.load %arg11[%c0_22, %c0_23] : memref<16x32xf32, #tpu.memory_space<vmem>>, vector<16x8xf32>
      %36 = vector.broadcast %24 : vector<16x1xf32> to vector<16x8xf32>
      %37 = arith.mulf %36, %35 : vector<16x8xf32>
      %38 = arith.addf %37, %34 : vector<16x8xf32>
      %c0_24 = arith.constant 0 : index
      %c0_25 = arith.constant 0 : index
      %39 = vector.load %arg11[%c0_24, %c0_25] : memref<16x32xf32, #tpu.memory_space<vmem>>, vector<16x8xf32>
      tpu.vector_store %arg11[%c0_24, %c0_25], %38 {strides = array<i32>} : memref<16x32xf32, #tpu.memory_space<vmem>>, vector<16x8xf32>,
      %c0_26 = arith.constant 0 : index
      %c0_27 = arith.constant 0 : index
      %40 = vector.load %arg9[%c0_26, %c0_27] : memref<16x4xf32, #tpu.memory_space<vmem>>, vector<16x1xf32>
      tpu.vector_store %arg9[%c0_26, %c0_27], %22 {strides = array<i32>} : memref<16x4xf32, #tpu.memory_space<vmem>>, vector<16x1xf32>,
      %c0_28 = arith.constant 0 : index
      %c0_29 = arith.constant 0 : index
      %c8 = arith.constant 8 : index
      %41 = vector.load %arg3[%c0_28, %c0_29, %c8] : memref<1x16x32xf32, #tpu.memory_space<vmem>>, vector<1x16x8xf32>
      %42 = vector.shape_cast %41 : vector<1x16x8xf32> to vector<16x8xf32>
      %c0_30 = arith.constant 0 : index
      %c0_31 = arith.constant 0 : index
      %c8_32 = arith.constant 8 : index
      %43 = vector.load %arg4[%c0_30, %c0_31, %c8_32] : memref<1x16x64xf32, #tpu.memory_space<vmem>>, vector<1x16x8xf32>
      %44 = vector.shape_cast %43 : vector<1x16x8xf32> to vector<16x8xf32>
      %c0_33 = arith.constant 0 : index
      %c0_34 = arith.constant 0 : index
      %c40 = arith.constant 40 : index
      %45 = vector.load %arg4[%c0_33, %c0_34, %c40] : memref<1x16x64xf32, #tpu.memory_space<vmem>>, vector<1x16x8xf32>
      %46 = vector.shape_cast %45 : vector<1x16x8xf32> to vector<16x8xf32>
      %cst_35 = arith.constant dense<0.000000e+00> : vector<16x16xf32>
      %47 = tpu.matmul %42, %44, %cst_35 {dimension_numbers = #tpu.dot_dimension_numbers<[1], [1], [0], [0], [0, 0, 1, 0], [], []>} : vector<16x8xf32>, vector<16x8xf32>, vector<16x16xf32> -> vector<16x16xf32>
      %c0_36 = arith.constant 0 : index
      %c1 = arith.constant 1 : index
      %48 = vector.load %arg9[%c0_36, %c1] : memref<16x4xf32, #tpu.memory_space<vmem>>, vector<16x1xf32>
      %cst_37 = arith.constant dense<0xFF800000> : vector<16xf32>
      %49 = vector.multi_reduction <maximumf>, %47, %cst_37 [1] : vector<16x16xf32> to vector<16xf32>
      %50 = vector.shape_cast %49 : vector<16xf32> to vector<16x1xf32>
      %51 = arith.maximumf %48, %50 : vector<16x1xf32>
      %52 = arith.subf %48, %51 : vector<16x1xf32>
      %53 = math.exp %52 : vector<16x1xf32>
      %54 = vector.broadcast %51 : vector<16x1xf32> to vector<16x16xf32>
      %55 = arith.subf %47, %54 : vector<16x16xf32>
      %56 = math.exp %55 : vector<16x16xf32>
      %c0_38 = arith.constant 0 : index
      %c1_39 = arith.constant 1 : index
      %57 = vector.load %arg10[%c0_38, %c1_39] : memref<16x4xf32, #tpu.memory_space<vmem>>, vector<16x1xf32>
      %58 = arith.mulf %53, %57 : vector<16x1xf32>
      %cst_40 = arith.constant dense<0.000000e+00> : vector<16xf32>
      %59 = vector.multi_reduction <add>, %56, %cst_40 [1] : vector<16x16xf32> to vector<16xf32>
      %60 = vector.shape_cast %59 : vector<16xf32> to vector<16x1xf32>
      %61 = arith.addf %58, %60 : vector<16x1xf32>
      %c0_41 = arith.constant 0 : index
      %c1_42 = arith.constant 1 : index
      %62 = vector.load %arg10[%c0_41, %c1_42] : memref<16x4xf32, #tpu.memory_space<vmem>>, vector<16x1xf32>
      tpu.vector_store %arg10[%c0_41, %c1_42], %61 {strides = array<i32>} : memref<16x4xf32, #tpu.memory_space<vmem>>, vector<16x1xf32>,
      %cst_43 = arith.constant dense<0.000000e+00> : vector<16x8xf32>
      %63 = tpu.matmul %56, %46, %cst_43 {dimension_numbers = #tpu.dot_dimension_numbers<[1], [0], [0], [1], [0, 0, 1, 1], [], []>} : vector<16x16xf32>, vector<16x8xf32>, vector<16x8xf32> -> vector<16x8xf32>
      %c0_44 = arith.constant 0 : index
      %c8_45 = arith.constant 8 : index
      %64 = vector.load %arg11[%c0_44, %c8_45] : memref<16x32xf32, #tpu.memory_space<vmem>>, vector<16x8xf32>
      %65 = vector.broadcast %53 : vector<16x1xf32> to vector<16x8xf32>
      %66 = arith.mulf %65, %64 : vector<16x8xf32>
      %67 = arith.addf %66, %63 : vector<16x8xf32>
      %c0_46 = arith.constant 0 : index
      %c8_47 = arith.constant 8 : index
      %68 = vector.load %arg11[%c0_46, %c8_47] : memref<16x32xf32, #tpu.memory_space<vmem>>, vector<16x8xf32>
      tpu.vector_store %arg11[%c0_46, %c8_47], %67 {strides = array<i32>} : memref<16x32xf32, #tpu.memory_space<vmem>>, vector<16x8xf32>,
      %c0_48 = arith.constant 0 : index
      %c1_49 = arith.constant 1 : index
      %69 = vector.load %arg9[%c0_48, %c1_49] : memref<16x4xf32, #tpu.memory_space<vmem>>, vector<16x1xf32>
      tpu.vector_store %arg9[%c0_48, %c1_49], %51 {strides = array<i32>} : memref<16x4xf32, #tpu.memory_space<vmem>>, vector<16x1xf32>,
      %c0_50 = arith.constant 0 : index
      %c0_51 = arith.constant 0 : index
      %c16 = arith.constant 16 : index
      %70 = vector.load %arg3[%c0_50, %c0_51, %c16] : memref<1x16x32xf32, #tpu.memory_space<vmem>>, vector<1x16x8xf32>
      %71 = vector.shape_cast %70 : vector<1x16x8xf32> to vector<16x8xf32>
      %c0_52 = arith.constant 0 : index
      %c0_53 = arith.constant 0 : index
      %c16_54 = arith.constant 16 : index
      %72 = vector.load %arg4[%c0_52, %c0_53, %c16_54] : memref<1x16x64xf32, #tpu.memory_space<vmem>>, vector<1x16x8xf32>
      %73 = vector.shape_cast %72 : vector<1x16x8xf32> to vector<16x8xf32>
      %c0_55 = arith.constant 0 : index
      %c0_56 = arith.constant 0 : index
      %c48 = arith.constant 48 : index
      %74 = vector.load %arg4[%c0_55, %c0_56, %c48] : memref<1x16x64xf32, #tpu.memory_space<vmem>>, vector<1x16x8xf32>
      %75 = vector.shape_cast %74 : vector<1x16x8xf32> to vector<16x8xf32>
      %cst_57 = arith.constant dense<0.000000e+00> : vector<16x16xf32>
      %76 = tpu.matmul %71, %73, %cst_57 {dimension_numbers = #tpu.dot_dimension_numbers<[1], [1], [0], [0], [0, 0, 1, 0], [], []>} : vector<16x8xf32>, vector<16x8xf32>, vector<16x16xf32> -> vector<16x16xf32>
      %c0_58 = arith.constant 0 : index
      %c2 = arith.constant 2 : index
      %77 = vector.load %arg9[%c0_58, %c2] : memref<16x4xf32, #tpu.memory_space<vmem>>, vector<16x1xf32>
      %cst_59 = arith.constant dense<0xFF800000> : vector<16xf32>
      %78 = vector.multi_reduction <maximumf>, %76, %cst_59 [1] : vector<16x16xf32> to vector<16xf32>
      %79 = vector.shape_cast %78 : vector<16xf32> to vector<16x1xf32>
      %80 = arith.maximumf %77, %79 : vector<16x1xf32>
      %81 = arith.subf %77, %80 : vector<16x1xf32>
      %82 = math.exp %81 : vector<16x1xf32>
      %83 = vector.broadcast %80 : vector<16x1xf32> to vector<16x16xf32>
      %84 = arith.subf %76, %83 : vector<16x16xf32>
      %85 = math.exp %84 : vector<16x16xf32>
      %c0_60 = arith.constant 0 : index
      %c2_61 = arith.constant 2 : index
      %86 = vector.load %arg10[%c0_60, %c2_61] : memref<16x4xf32, #tpu.memory_space<vmem>>, vector<16x1xf32>
      %87 = arith.mulf %82, %86 : vector<16x1xf32>
      %cst_62 = arith.constant dense<0.000000e+00> : vector<16xf32>
      %88 = vector.multi_reduction <add>, %85, %cst_62 [1] : vector<16x16xf32> to vector<16xf32>
      %89 = vector.shape_cast %88 : vector<16xf32> to vector<16x1xf32>
      %90 = arith.addf %87, %89 : vector<16x1xf32>
      %c0_63 = arith.constant 0 : index
      %c2_64 = arith.constant 2 : index
      %91 = vector.load %arg10[%c0_63, %c2_64] : memref<16x4xf32, #tpu.memory_space<vmem>>, vector<16x1xf32>
      tpu.vector_store %arg10[%c0_63, %c2_64], %90 {strides = array<i32>} : memref<16x4xf32, #tpu.memory_space<vmem>>, vector<16x1xf32>,
      %cst_65 = arith.constant dense<0.000000e+00> : vector<16x8xf32>
      %92 = tpu.matmul %85, %75, %cst_65 {dimension_numbers = #tpu.dot_dimension_numbers<[1], [0], [0], [1], [0, 0, 1, 1], [], []>} : vector<16x16xf32>, vector<16x8xf32>, vector<16x8xf32> -> vector<16x8xf32>
      %c0_66 = arith.constant 0 : index
      %c16_67 = arith.constant 16 : index
      %93 = vector.load %arg11[%c0_66, %c16_67] : memref<16x32xf32, #tpu.memory_space<vmem>>, vector<16x8xf32>
      %94 = vector.broadcast %82 : vector<16x1xf32> to vector<16x8xf32>
      %95 = arith.mulf %94, %93 : vector<16x8xf32>
      %96 = arith.addf %95, %92 : vector<16x8xf32>
      %c0_68 = arith.constant 0 : index
      %c16_69 = arith.constant 16 : index
      %97 = vector.load %arg11[%c0_68, %c16_69] : memref<16x32xf32, #tpu.memory_space<vmem>>, vector<16x8xf32>
      tpu.vector_store %arg11[%c0_68, %c16_69], %96 {strides = array<i32>} : memref<16x32xf32, #tpu.memory_space<vmem>>, vector<16x8xf32>,
      %c0_70 = arith.constant 0 : index
      %c2_71 = arith.constant 2 : index
      %98 = vector.load %arg9[%c0_70, %c2_71] : memref<16x4xf32, #tpu.memory_space<vmem>>, vector<16x1xf32>
      tpu.vector_store %arg9[%c0_70, %c2_71], %80 {strides = array<i32>} : memref<16x4xf32, #tpu.memory_space<vmem>>, vector<16x1xf32>,
      %c0_72 = arith.constant 0 : index
      %c0_73 = arith.constant 0 : index
      %c24 = arith.constant 24 : index
      %99 = vector.load %arg3[%c0_72, %c0_73, %c24] : memref<1x16x32xf32, #tpu.memory_space<vmem>>, vector<1x16x8xf32>
      %100 = vector.shape_cast %99 : vector<1x16x8xf32> to vector<16x8xf32>
      %c0_74 = arith.constant 0 : index
      %c0_75 = arith.constant 0 : index
      %c24_76 = arith.constant 24 : index
      %101 = vector.load %arg4[%c0_74, %c0_75, %c24_76] : memref<1x16x64xf32, #tpu.memory_space<vmem>>, vector<1x16x8xf32>
      %102 = vector.shape_cast %101 : vector<1x16x8xf32> to vector<16x8xf32>
      %c0_77 = arith.constant 0 : index
      %c0_78 = arith.constant 0 : index
      %c56 = arith.constant 56 : index
      %103 = vector.load %arg4[%c0_77, %c0_78, %c56] : memref<1x16x64xf32, #tpu.memory_space<vmem>>, vector<1x16x8xf32>
      %104 = vector.shape_cast %103 : vector<1x16x8xf32> to vector<16x8xf32>
      %cst_79 = arith.constant dense<0.000000e+00> : vector<16x16xf32>
      %105 = tpu.matmul %100, %102, %cst_79 {dimension_numbers = #tpu.dot_dimension_numbers<[1], [1], [0], [0], [0, 0, 1, 0], [], []>} : vector<16x8xf32>, vector<16x8xf32>, vector<16x16xf32> -> vector<16x16xf32>
      %c0_80 = arith.constant 0 : index
      %c3 = arith.constant 3 : index
      %106 = vector.load %arg9[%c0_80, %c3] : memref<16x4xf32, #tpu.memory_space<vmem>>, vector<16x1xf32>
      %cst_81 = arith.constant dense<0xFF800000> : vector<16xf32>
      %107 = vector.multi_reduction <maximumf>, %105, %cst_81 [1] : vector<16x16xf32> to vector<16xf32>
      %108 = vector.shape_cast %107 : vector<16xf32> to vector<16x1xf32>
      %109 = arith.maximumf %106, %108 : vector<16x1xf32>
      %110 = arith.subf %106, %109 : vector<16x1xf32>
      %111 = math.exp %110 : vector<16x1xf32>
      %112 = vector.broadcast %109 : vector<16x1xf32> to vector<16x16xf32>
      %113 = arith.subf %105, %112 : vector<16x16xf32>
      %114 = math.exp %113 : vector<16x16xf32>
      %c0_82 = arith.constant 0 : index
      %c3_83 = arith.constant 3 : index
      %115 = vector.load %arg10[%c0_82, %c3_83] : memref<16x4xf32, #tpu.memory_space<vmem>>, vector<16x1xf32>
      %116 = arith.mulf %111, %115 : vector<16x1xf32>
      %cst_84 = arith.constant dense<0.000000e+00> : vector<16xf32>
      %117 = vector.multi_reduction <add>, %114, %cst_84 [1] : vector<16x16xf32> to vector<16xf32>
      %118 = vector.shape_cast %117 : vector<16xf32> to vector<16x1xf32>
      %119 = arith.addf %116, %118 : vector<16x1xf32>
      %c0_85 = arith.constant 0 : index
      %c3_86 = arith.constant 3 : index
      %120 = vector.load %arg10[%c0_85, %c3_86] : memref<16x4xf32, #tpu.memory_space<vmem>>, vector<16x1xf32>
      tpu.vector_store %arg10[%c0_85, %c3_86], %119 {strides = array<i32>} : memref<16x4xf32, #tpu.memory_space<vmem>>, vector<16x1xf32>,
      %cst_87 = arith.constant dense<0.000000e+00> : vector<16x8xf32>
      %121 = tpu.matmul %114, %104, %cst_87 {dimension_numbers = #tpu.dot_dimension_numbers<[1], [0], [0], [1], [0, 0, 1, 1], [], []>} : vector<16x16xf32>, vector<16x8xf32>, vector<16x8xf32> -> vector<16x8xf32>
      %c0_88 = arith.constant 0 : index
      %c24_89 = arith.constant 24 : index
      %122 = vector.load %arg11[%c0_88, %c24_89] : memref<16x32xf32, #tpu.memory_space<vmem>>, vector<16x8xf32>
      %123 = vector.broadcast %111 : vector<16x1xf32> to vector<16x8xf32>
      %124 = arith.mulf %123, %122 : vector<16x8xf32>
      %125 = arith.addf %124, %121 : vector<16x8xf32>
      %c0_90 = arith.constant 0 : index
      %c24_91 = arith.constant 24 : index
      %126 = vector.load %arg11[%c0_90, %c24_91] : memref<16x32xf32, #tpu.memory_space<vmem>>, vector<16x8xf32>
      tpu.vector_store %arg11[%c0_90, %c24_91], %125 {strides = array<i32>} : memref<16x32xf32, #tpu.memory_space<vmem>>, vector<16x8xf32>,
      %c0_92 = arith.constant 0 : index
      %c3_93 = arith.constant 3 : index
      %127 = vector.load %arg9[%c0_92, %c3_93] : memref<16x4xf32, #tpu.memory_space<vmem>>, vector<16x1xf32>
      tpu.vector_store %arg9[%c0_92, %c3_93], %109 {strides = array<i32>} : memref<16x4xf32, #tpu.memory_space<vmem>>, vector<16x1xf32>,
    } else {
    }
    %c1_i32_2 = arith.constant 1 : i32
    %6 = arith.cmpi sge, %arg2, %c1_i32_2 : i32
    %7 = arith.extui %6 : i1 to i32
    %c0_i32_3 = arith.constant 0 : i32
    %8 = arith.cmpi ne, %7, %c0_i32_3 : i32
    scf.if %8 {
      %c0 = arith.constant 0 : index
      %c0_6 = arith.constant 0 : index
      %c0_7 = arith.constant 0 : index
      %12 = vector.load %arg3[%c0, %c0_6, %c0_7] : memref<1x16x32xf32, #tpu.memory_space<vmem>>, vector<1x16x8xf32>
      %13 = vector.shape_cast %12 : vector<1x16x8xf32> to vector<16x8xf32>
      %c0_8 = arith.constant 0 : index
      %c0_9 = arith.constant 0 : index
      %c0_10 = arith.constant 0 : index
      %14 = vector.load %arg5[%c0_8, %c0_9, %c0_10] : memref<1x8x64xf32, #tpu.memory_space<vmem>>, vector<1x8x8xf32>
      %15 = vector.shape_cast %14 : vector<1x8x8xf32> to vector<8x8xf32>
      %c0_11 = arith.constant 0 : index
      %c0_12 = arith.constant 0 : index
      %c32 = arith.constant 32 : index
      %16 = vector.load %arg5[%c0_11, %c0_12, %c32] : memref<1x8x64xf32, #tpu.memory_space<vmem>>, vector<1x8x8xf32>
      %17 = vector.shape_cast %16 : vector<1x8x8xf32> to vector<8x8xf32>
      %cst = arith.constant dense<0.000000e+00> : vector<16x8xf32>
      %18 = tpu.matmul %13, %15, %cst {dimension_numbers = #tpu.dot_dimension_numbers<[1], [1], [0], [0], [0, 0, 1, 0], [], []>} : vector<16x8xf32>, vector<8x8xf32>, vector<16x8xf32> -> vector<16x8xf32>
      %c0_13 = arith.constant 0 : index
      %c0_14 = arith.constant 0 : index
      %19 = vector.load %arg9[%c0_13, %c0_14] : memref<16x4xf32, #tpu.memory_space<vmem>>, vector<16x1xf32>
      %cst_15 = arith.constant dense<0xFF800000> : vector<16xf32>
      %20 = vector.multi_reduction <maximumf>, %18, %cst_15 [1] : vector<16x8xf32> to vector<16xf32>
      %21 = vector.shape_cast %20 : vector<16xf32> to vector<16x1xf32>
      %22 = arith.maximumf %19, %21 : vector<16x1xf32>
      %23 = arith.subf %19, %22 : vector<16x1xf32>
      %24 = math.exp %23 : vector<16x1xf32>
      %25 = vector.broadcast %22 : vector<16x1xf32> to vector<16x8xf32>
      %26 = arith.subf %18, %25 : vector<16x8xf32>
      %27 = math.exp %26 : vector<16x8xf32>
      %c0_16 = arith.constant 0 : index
      %c0_17 = arith.constant 0 : index
      %28 = vector.load %arg10[%c0_16, %c0_17] : memref<16x4xf32, #tpu.memory_space<vmem>>, vector<16x1xf32>
      %29 = arith.mulf %24, %28 : vector<16x1xf32>
      %cst_18 = arith.constant dense<0.000000e+00> : vector<16xf32>
      %30 = vector.multi_reduction <add>, %27, %cst_18 [1] : vector<16x8xf32> to vector<16xf32>
      %31 = vector.shape_cast %30 : vector<16xf32> to vector<16x1xf32>
      %32 = arith.addf %29, %31 : vector<16x1xf32>
      %c0_19 = arith.constant 0 : index
      %c0_20 = arith.constant 0 : index
      %33 = vector.load %arg10[%c0_19, %c0_20] : memref<16x4xf32, #tpu.memory_space<vmem>>, vector<16x1xf32>
      tpu.vector_store %arg10[%c0_19, %c0_20], %32 {strides = array<i32>} : memref<16x4xf32, #tpu.memory_space<vmem>>, vector<16x1xf32>,
      %cst_21 = arith.constant dense<0.000000e+00> : vector<16x8xf32>
      %34 = tpu.matmul %27, %17, %cst_21 {dimension_numbers = #tpu.dot_dimension_numbers<[1], [0], [0], [1], [0, 0, 1, 1], [], []>} : vector<16x8xf32>, vector<8x8xf32>, vector<16x8xf32> -> vector<16x8xf32>
      %c0_22 = arith.constant 0 : index
      %c0_23 = arith.constant 0 : index
      %35 = vector.load %arg11[%c0_22, %c0_23] : memref<16x32xf32, #tpu.memory_space<vmem>>, vector<16x8xf32>
      %36 = vector.broadcast %24 : vector<16x1xf32> to vector<16x8xf32>
      %37 = arith.mulf %36, %35 : vector<16x8xf32>
      %38 = arith.addf %37, %34 : vector<16x8xf32>
      %c0_24 = arith.constant 0 : index
      %c0_25 = arith.constant 0 : index
      %39 = vector.load %arg11[%c0_24, %c0_25] : memref<16x32xf32, #tpu.memory_space<vmem>>, vector<16x8xf32>
      tpu.vector_store %arg11[%c0_24, %c0_25], %38 {strides = array<i32>} : memref<16x32xf32, #tpu.memory_space<vmem>>, vector<16x8xf32>,
      %c0_26 = arith.constant 0 : index
      %c0_27 = arith.constant 0 : index
      %40 = vector.load %arg9[%c0_26, %c0_27] : memref<16x4xf32, #tpu.memory_space<vmem>>, vector<16x1xf32>
      tpu.vector_store %arg9[%c0_26, %c0_27], %22 {strides = array<i32>} : memref<16x4xf32, #tpu.memory_space<vmem>>, vector<16x1xf32>,
      %c0_28 = arith.constant 0 : index
      %c0_29 = arith.constant 0 : index
      %c8 = arith.constant 8 : index
      %41 = vector.load %arg3[%c0_28, %c0_29, %c8] : memref<1x16x32xf32, #tpu.memory_space<vmem>>, vector<1x16x8xf32>
      %42 = vector.shape_cast %41 : vector<1x16x8xf32> to vector<16x8xf32>
      %c0_30 = arith.constant 0 : index
      %c0_31 = arith.constant 0 : index
      %c8_32 = arith.constant 8 : index
      %43 = vector.load %arg5[%c0_30, %c0_31, %c8_32] : memref<1x8x64xf32, #tpu.memory_space<vmem>>, vector<1x8x8xf32>
      %44 = vector.shape_cast %43 : vector<1x8x8xf32> to vector<8x8xf32>
      %c0_33 = arith.constant 0 : index
      %c0_34 = arith.constant 0 : index
      %c40 = arith.constant 40 : index
      %45 = vector.load %arg5[%c0_33, %c0_34, %c40] : memref<1x8x64xf32, #tpu.memory_space<vmem>>, vector<1x8x8xf32>
      %46 = vector.shape_cast %45 : vector<1x8x8xf32> to vector<8x8xf32>
      %cst_35 = arith.constant dense<0.000000e+00> : vector<16x8xf32>
      %47 = tpu.matmul %42, %44, %cst_35 {dimension_numbers = #tpu.dot_dimension_numbers<[1], [1], [0], [0], [0, 0, 1, 0], [], []>} : vector<16x8xf32>, vector<8x8xf32>, vector<16x8xf32> -> vector<16x8xf32>
      %c0_36 = arith.constant 0 : index
      %c1 = arith.constant 1 : index
      %48 = vector.load %arg9[%c0_36, %c1] : memref<16x4xf32, #tpu.memory_space<vmem>>, vector<16x1xf32>
      %cst_37 = arith.constant dense<0xFF800000> : vector<16xf32>
      %49 = vector.multi_reduction <maximumf>, %47, %cst_37 [1] : vector<16x8xf32> to vector<16xf32>
      %50 = vector.shape_cast %49 : vector<16xf32> to vector<16x1xf32>
      %51 = arith.maximumf %48, %50 : vector<16x1xf32>
      %52 = arith.subf %48, %51 : vector<16x1xf32>
      %53 = math.exp %52 : vector<16x1xf32>
      %54 = vector.broadcast %51 : vector<16x1xf32> to vector<16x8xf32>
      %55 = arith.subf %47, %54 : vector<16x8xf32>
      %56 = math.exp %55 : vector<16x8xf32>
      %c0_38 = arith.constant 0 : index
      %c1_39 = arith.constant 1 : index
      %57 = vector.load %arg10[%c0_38, %c1_39] : memref<16x4xf32, #tpu.memory_space<vmem>>, vector<16x1xf32>
      %58 = arith.mulf %53, %57 : vector<16x1xf32>
      %cst_40 = arith.constant dense<0.000000e+00> : vector<16xf32>
      %59 = vector.multi_reduction <add>, %56, %cst_40 [1] : vector<16x8xf32> to vector<16xf32>
      %60 = vector.shape_cast %59 : vector<16xf32> to vector<16x1xf32>
      %61 = arith.addf %58, %60 : vector<16x1xf32>
      %c0_41 = arith.constant 0 : index
      %c1_42 = arith.constant 1 : index
      %62 = vector.load %arg10[%c0_41, %c1_42] : memref<16x4xf32, #tpu.memory_space<vmem>>, vector<16x1xf32>
      tpu.vector_store %arg10[%c0_41, %c1_42], %61 {strides = array<i32>} : memref<16x4xf32, #tpu.memory_space<vmem>>, vector<16x1xf32>,
      %cst_43 = arith.constant dense<0.000000e+00> : vector<16x8xf32>
      %63 = tpu.matmul %56, %46, %cst_43 {dimension_numbers = #tpu.dot_dimension_numbers<[1], [0], [0], [1], [0, 0, 1, 1], [], []>} : vector<16x8xf32>, vector<8x8xf32>, vector<16x8xf32> -> vector<16x8xf32>
      %c0_44 = arith.constant 0 : index
      %c8_45 = arith.constant 8 : index
      %64 = vector.load %arg11[%c0_44, %c8_45] : memref<16x32xf32, #tpu.memory_space<vmem>>, vector<16x8xf32>
      %65 = vector.broadcast %53 : vector<16x1xf32> to vector<16x8xf32>
      %66 = arith.mulf %65, %64 : vector<16x8xf32>
      %67 = arith.addf %66, %63 : vector<16x8xf32>
      %c0_46 = arith.constant 0 : index
      %c8_47 = arith.constant 8 : index
      %68 = vector.load %arg11[%c0_46, %c8_47] : memref<16x32xf32, #tpu.memory_space<vmem>>, vector<16x8xf32>
      tpu.vector_store %arg11[%c0_46, %c8_47], %67 {strides = array<i32>} : memref<16x32xf32, #tpu.memory_space<vmem>>, vector<16x8xf32>,
      %c0_48 = arith.constant 0 : index
      %c1_49 = arith.constant 1 : index
      %69 = vector.load %arg9[%c0_48, %c1_49] : memref<16x4xf32, #tpu.memory_space<vmem>>, vector<16x1xf32>
      tpu.vector_store %arg9[%c0_48, %c1_49], %51 {strides = array<i32>} : memref<16x4xf32, #tpu.memory_space<vmem>>, vector<16x1xf32>,
      %c0_50 = arith.constant 0 : index
      %c0_51 = arith.constant 0 : index
      %c16 = arith.constant 16 : index
      %70 = vector.load %arg3[%c0_50, %c0_51, %c16] : memref<1x16x32xf32, #tpu.memory_space<vmem>>, vector<1x16x8xf32>
      %71 = vector.shape_cast %70 : vector<1x16x8xf32> to vector<16x8xf32>
      %c0_52 = arith.constant 0 : index
      %c0_53 = arith.constant 0 : index
      %c16_54 = arith.constant 16 : index
      %72 = vector.load %arg5[%c0_52, %c0_53, %c16_54] : memref<1x8x64xf32, #tpu.memory_space<vmem>>, vector<1x8x8xf32>
      %73 = vector.shape_cast %72 : vector<1x8x8xf32> to vector<8x8xf32>
      %c0_55 = arith.constant 0 : index
      %c0_56 = arith.constant 0 : index
      %c48 = arith.constant 48 : index
      %74 = vector.load %arg5[%c0_55, %c0_56, %c48] : memref<1x8x64xf32, #tpu.memory_space<vmem>>, vector<1x8x8xf32>
      %75 = vector.shape_cast %74 : vector<1x8x8xf32> to vector<8x8xf32>
      %cst_57 = arith.constant dense<0.000000e+00> : vector<16x8xf32>
      %76 = tpu.matmul %71, %73, %cst_57 {dimension_numbers = #tpu.dot_dimension_numbers<[1], [1], [0], [0], [0, 0, 1, 0], [], []>} : vector<16x8xf32>, vector<8x8xf32>, vector<16x8xf32> -> vector<16x8xf32>
      %c0_58 = arith.constant 0 : index
      %c2 = arith.constant 2 : index
      %77 = vector.load %arg9[%c0_58, %c2] : memref<16x4xf32, #tpu.memory_space<vmem>>, vector<16x1xf32>
      %cst_59 = arith.constant dense<0xFF800000> : vector<16xf32>
      %78 = vector.multi_reduction <maximumf>, %76, %cst_59 [1] : vector<16x8xf32> to vector<16xf32>
      %79 = vector.shape_cast %78 : vector<16xf32> to vector<16x1xf32>
      %80 = arith.maximumf %77, %79 : vector<16x1xf32>
      %81 = arith.subf %77, %80 : vector<16x1xf32>
      %82 = math.exp %81 : vector<16x1xf32>
      %83 = vector.broadcast %80 : vector<16x1xf32> to vector<16x8xf32>
      %84 = arith.subf %76, %83 : vector<16x8xf32>
      %85 = math.exp %84 : vector<16x8xf32>
      %c0_60 = arith.constant 0 : index
      %c2_61 = arith.constant 2 : index
      %86 = vector.load %arg10[%c0_60, %c2_61] : memref<16x4xf32, #tpu.memory_space<vmem>>, vector<16x1xf32>
      %87 = arith.mulf %82, %86 : vector<16x1xf32>
      %cst_62 = arith.constant dense<0.000000e+00> : vector<16xf32>
      %88 = vector.multi_reduction <add>, %85, %cst_62 [1] : vector<16x8xf32> to vector<16xf32>
      %89 = vector.shape_cast %88 : vector<16xf32> to vector<16x1xf32>
      %90 = arith.addf %87, %89 : vector<16x1xf32>
      %c0_63 = arith.constant 0 : index
      %c2_64 = arith.constant 2 : index
      %91 = vector.load %arg10[%c0_63, %c2_64] : memref<16x4xf32, #tpu.memory_space<vmem>>, vector<16x1xf32>
      tpu.vector_store %arg10[%c0_63, %c2_64], %90 {strides = array<i32>} : memref<16x4xf32, #tpu.memory_space<vmem>>, vector<16x1xf32>,
      %cst_65 = arith.constant dense<0.000000e+00> : vector<16x8xf32>
      %92 = tpu.matmul %85, %75, %cst_65 {dimension_numbers = #tpu.dot_dimension_numbers<[1], [0], [0], [1], [0, 0, 1, 1], [], []>} : vector<16x8xf32>, vector<8x8xf32>, vector<16x8xf32> -> vector<16x8xf32>
      %c0_66 = arith.constant 0 : index
      %c16_67 = arith.constant 16 : index
      %93 = vector.load %arg11[%c0_66, %c16_67] : memref<16x32xf32, #tpu.memory_space<vmem>>, vector<16x8xf32>
      %94 = vector.broadcast %82 : vector<16x1xf32> to vector<16x8xf32>
      %95 = arith.mulf %94, %93 : vector<16x8xf32>
      %96 = arith.addf %95, %92 : vector<16x8xf32>
      %c0_68 = arith.constant 0 : index
      %c16_69 = arith.constant 16 : index
      %97 = vector.load %arg11[%c0_68, %c16_69] : memref<16x32xf32, #tpu.memory_space<vmem>>, vector<16x8xf32>
      tpu.vector_store %arg11[%c0_68, %c16_69], %96 {strides = array<i32>} : memref<16x32xf32, #tpu.memory_space<vmem>>, vector<16x8xf32>,
      %c0_70 = arith.constant 0 : index
      %c2_71 = arith.constant 2 : index
      %98 = vector.load %arg9[%c0_70, %c2_71] : memref<16x4xf32, #tpu.memory_space<vmem>>, vector<16x1xf32>
      tpu.vector_store %arg9[%c0_70, %c2_71], %80 {strides = array<i32>} : memref<16x4xf32, #tpu.memory_space<vmem>>, vector<16x1xf32>,
      %c0_72 = arith.constant 0 : index
      %c0_73 = arith.constant 0 : index
      %c24 = arith.constant 24 : index
      %99 = vector.load %arg3[%c0_72, %c0_73, %c24] : memref<1x16x32xf32, #tpu.memory_space<vmem>>, vector<1x16x8xf32>
      %100 = vector.shape_cast %99 : vector<1x16x8xf32> to vector<16x8xf32>
      %c0_74 = arith.constant 0 : index
      %c0_75 = arith.constant 0 : index
      %c24_76 = arith.constant 24 : index
      %101 = vector.load %arg5[%c0_74, %c0_75, %c24_76] : memref<1x8x64xf32, #tpu.memory_space<vmem>>, vector<1x8x8xf32>
      %102 = vector.shape_cast %101 : vector<1x8x8xf32> to vector<8x8xf32>
      %c0_77 = arith.constant 0 : index
      %c0_78 = arith.constant 0 : index
      %c56 = arith.constant 56 : index
      %103 = vector.load %arg5[%c0_77, %c0_78, %c56] : memref<1x8x64xf32, #tpu.memory_space<vmem>>, vector<1x8x8xf32>
      %104 = vector.shape_cast %103 : vector<1x8x8xf32> to vector<8x8xf32>
      %cst_79 = arith.constant dense<0.000000e+00> : vector<16x8xf32>
      %105 = tpu.matmul %100, %102, %cst_79 {dimension_numbers = #tpu.dot_dimension_numbers<[1], [1], [0], [0], [0, 0, 1, 0], [], []>} : vector<16x8xf32>, vector<8x8xf32>, vector<16x8xf32> -> vector<16x8xf32>
      %c0_80 = arith.constant 0 : index
      %c3 = arith.constant 3 : index
      %106 = vector.load %arg9[%c0_80, %c3] : memref<16x4xf32, #tpu.memory_space<vmem>>, vector<16x1xf32>
      %cst_81 = arith.constant dense<0xFF800000> : vector<16xf32>
      %107 = vector.multi_reduction <maximumf>, %105, %cst_81 [1] : vector<16x8xf32> to vector<16xf32>
      %108 = vector.shape_cast %107 : vector<16xf32> to vector<16x1xf32>
      %109 = arith.maximumf %106, %108 : vector<16x1xf32>
      %110 = arith.subf %106, %109 : vector<16x1xf32>
      %111 = math.exp %110 : vector<16x1xf32>
      %112 = vector.broadcast %109 : vector<16x1xf32> to vector<16x8xf32>
      %113 = arith.subf %105, %112 : vector<16x8xf32>
      %114 = math.exp %113 : vector<16x8xf32>
      %c0_82 = arith.constant 0 : index
      %c3_83 = arith.constant 3 : index
      %115 = vector.load %arg10[%c0_82, %c3_83] : memref<16x4xf32, #tpu.memory_space<vmem>>, vector<16x1xf32>
      %116 = arith.mulf %111, %115 : vector<16x1xf32>
      %cst_84 = arith.constant dense<0.000000e+00> : vector<16xf32>
      %117 = vector.multi_reduction <add>, %114, %cst_84 [1] : vector<16x8xf32> to vector<16xf32>
      %118 = vector.shape_cast %117 : vector<16xf32> to vector<16x1xf32>
      %119 = arith.addf %116, %118 : vector<16x1xf32>
      %c0_85 = arith.constant 0 : index
      %c3_86 = arith.constant 3 : index
      %120 = vector.load %arg10[%c0_85, %c3_86] : memref<16x4xf32, #tpu.memory_space<vmem>>, vector<16x1xf32>
      tpu.vector_store %arg10[%c0_85, %c3_86], %119 {strides = array<i32>} : memref<16x4xf32, #tpu.memory_space<vmem>>, vector<16x1xf32>,
      %cst_87 = arith.constant dense<0.000000e+00> : vector<16x8xf32>
      %121 = tpu.matmul %114, %104, %cst_87 {dimension_numbers = #tpu.dot_dimension_numbers<[1], [0], [0], [1], [0, 0, 1, 1], [], []>} : vector<16x8xf32>, vector<8x8xf32>, vector<16x8xf32> -> vector<16x8xf32>
      %c0_88 = arith.constant 0 : index
      %c24_89 = arith.constant 24 : index
      %122 = vector.load %arg11[%c0_88, %c24_89] : memref<16x32xf32, #tpu.memory_space<vmem>>, vector<16x8xf32>
      %123 = vector.broadcast %111 : vector<16x1xf32> to vector<16x8xf32>
      %124 = arith.mulf %123, %122 : vector<16x8xf32>
      %125 = arith.addf %124, %121 : vector<16x8xf32>
      %c0_90 = arith.constant 0 : index
      %c24_91 = arith.constant 24 : index
      %126 = vector.load %arg11[%c0_90, %c24_91] : memref<16x32xf32, #tpu.memory_space<vmem>>, vector<16x8xf32>
      tpu.vector_store %arg11[%c0_90, %c24_91], %125 {strides = array<i32>} : memref<16x32xf32, #tpu.memory_space<vmem>>, vector<16x8xf32>,
      %c0_92 = arith.constant 0 : index
      %c3_93 = arith.constant 3 : index
      %127 = vector.load %arg9[%c0_92, %c3_93] : memref<16x4xf32, #tpu.memory_space<vmem>>, vector<16x1xf32>
      tpu.vector_store %arg9[%c0_92, %c3_93], %109 {strides = array<i32>} : memref<16x4xf32, #tpu.memory_space<vmem>>, vector<16x1xf32>,
    } else {
    }
    %c1_i32_4 = arith.constant 1 : i32
    %9 = arith.cmpi eq, %arg2, %c1_i32_4 : i32
    %10 = arith.extui %9 : i1 to i32
    %c0_i32_5 = arith.constant 0 : i32
    %11 = arith.cmpi ne, %10, %c0_i32_5 : i32
    scf.if %11 {
      %c0 = arith.constant 0 : index
      %c0_6 = arith.constant 0 : index
      %12 = vector.load %arg10[%c0, %c0_6] : memref<16x4xf32, #tpu.memory_space<vmem>>, vector<16x1xf32>
      %13 = tpu.reciprocal %12 : vector<16x1xf32> -> vector<16x1xf32>
      %c0_7 = arith.constant 0 : index
      %c0_8 = arith.constant 0 : index
      %14 = vector.load %arg11[%c0_7, %c0_8] : memref<16x32xf32, #tpu.memory_space<vmem>>, vector<16x8xf32>
      %15 = vector.broadcast %13 : vector<16x1xf32> to vector<16x8xf32>
      %16 = arith.mulf %14, %15 : vector<16x8xf32>
      %c0_9 = arith.constant 0 : index
      %c0_10 = arith.constant 0 : index
      %17 = vector.load %arg11[%c0_9, %c0_10] : memref<16x32xf32, #tpu.memory_space<vmem>>, vector<16x8xf32>
      tpu.vector_store %arg11[%c0_9, %c0_10], %16 {strides = array<i32>} : memref<16x32xf32, #tpu.memory_space<vmem>>, vector<16x8xf32>,
      %c0_11 = arith.constant 0 : index
      %c1 = arith.constant 1 : index
      %18 = vector.load %arg10[%c0_11, %c1] : memref<16x4xf32, #tpu.memory_space<vmem>>, vector<16x1xf32>
      %19 = tpu.reciprocal %18 : vector<16x1xf32> -> vector<16x1xf32>
      %c0_12 = arith.constant 0 : index
      %c8 = arith.constant 8 : index
      %20 = vector.load %arg11[%c0_12, %c8] : memref<16x32xf32, #tpu.memory_space<vmem>>, vector<16x8xf32>
      %21 = vector.broadcast %19 : vector<16x1xf32> to vector<16x8xf32>
      %22 = arith.mulf %20, %21 : vector<16x8xf32>
      %c0_13 = arith.constant 0 : index
      %c8_14 = arith.constant 8 : index
      %23 = vector.load %arg11[%c0_13, %c8_14] : memref<16x32xf32, #tpu.memory_space<vmem>>, vector<16x8xf32>
      tpu.vector_store %arg11[%c0_13, %c8_14], %22 {strides = array<i32>} : memref<16x32xf32, #tpu.memory_space<vmem>>, vector<16x8xf32>,
      %c0_15 = arith.constant 0 : index
      %c2 = arith.constant 2 : index
      %24 = vector.load %arg10[%c0_15, %c2] : memref<16x4xf32, #tpu.memory_space<vmem>>, vector<16x1xf32>
      %25 = tpu.reciprocal %24 : vector<16x1xf32> -> vector<16x1xf32>
      %c0_16 = arith.constant 0 : index
      %c16 = arith.constant 16 : index
      %26 = vector.load %arg11[%c0_16, %c16] : memref<16x32xf32, #tpu.memory_space<vmem>>, vector<16x8xf32>
      %27 = vector.broadcast %25 : vector<16x1xf32> to vector<16x8xf32>
      %28 = arith.mulf %26, %27 : vector<16x8xf32>
      %c0_17 = arith.constant 0 : index
      %c16_18 = arith.constant 16 : index
      %29 = vector.load %arg11[%c0_17, %c16_18] : memref<16x32xf32, #tpu.memory_space<vmem>>, vector<16x8xf32>
      tpu.vector_store %arg11[%c0_17, %c16_18], %28 {strides = array<i32>} : memref<16x32xf32, #tpu.memory_space<vmem>>, vector<16x8xf32>,
      %c0_19 = arith.constant 0 : index
      %c3 = arith.constant 3 : index
      %30 = vector.load %arg10[%c0_19, %c3] : memref<16x4xf32, #tpu.memory_space<vmem>>, vector<16x1xf32>
      %31 = tpu.reciprocal %30 : vector<16x1xf32> -> vector<16x1xf32>
      %c0_20 = arith.constant 0 : index
      %c24 = arith.constant 24 : index
      %32 = vector.load %arg11[%c0_20, %c24] : memref<16x32xf32, #tpu.memory_space<vmem>>, vector<16x8xf32>
      %33 = vector.broadcast %31 : vector<16x1xf32> to vector<16x8xf32>
      %34 = arith.mulf %32, %33 : vector<16x8xf32>
      %c0_21 = arith.constant 0 : index
      %c24_22 = arith.constant 24 : index
      %35 = vector.load %arg11[%c0_21, %c24_22] : memref<16x32xf32, #tpu.memory_space<vmem>>, vector<16x8xf32>
      tpu.vector_store %arg11[%c0_21, %c24_22], %34 {strides = array<i32>} : memref<16x32xf32, #tpu.memory_space<vmem>>, vector<16x8xf32>,
      %c0_23 = arith.constant 0 : index
      %c0_24 = arith.constant 0 : index
      %36 = vector.load %arg11[%c0_23, %c0_24] : memref<16x32xf32, #tpu.memory_space<vmem>>, vector<16x32xf32>
      %c0_25 = arith.constant 0 : index
      %c0_26 = arith.constant 0 : index
      %37 = vector.load %arg6[%c0_25, %c0_26] : memref<32x32xf32, #tpu.memory_space<vmem>>, vector<32x32xf32>
      %cst = arith.constant dense<0.000000e+00> : vector<16x32xf32>
      %38 = tpu.matmul %36, %37, %cst {dimension_numbers = #tpu.dot_dimension_numbers<[1], [0], [0], [1], [0, 0, 1, 1], [], []>} : vector<16x32xf32>, vector<32x32xf32>, vector<16x32xf32> -> vector<16x32xf32>
      %c0_27 = arith.constant 0 : index
      %c0_28 = arith.constant 0 : index
      %39 = vector.load %arg7[%c0_27, %c0_28] : memref<1x32xf32, #tpu.memory_space<vmem>>, vector<1x32xf32>
      %40 = vector.broadcast %39 : vector<1x32xf32> to vector<16x32xf32>
      %41 = arith.addf %38, %40 : vector<16x32xf32>
      %c0_29 = arith.constant 0 : index
      %c0_30 = arith.constant 0 : index
      %c0_31 = arith.constant 0 : index
      %42 = vector.load %arg8[%c0_29, %c0_30, %c0_31] : memref<1x16x32xf32, #tpu.memory_space<vmem>>, vector<1x16x32xf32>
      %43 = vector.shape_cast %42 : vector<1x16x32xf32> to vector<16x32xf32>
      %44 = vector.shape_cast %41 : vector<16x32xf32> to vector<1x16x32xf32>
      tpu.vector_store %arg8[%c0_29, %c0_30, %c0_31], %44 {strides = array<i32>} : memref<1x16x32xf32, #tpu.memory_space<vmem>>, vector<1x16x32xf32>,
    } else {
    }
    return
  }
  func.func @transform_0(%arg0: i32, %arg1: i32, %arg2: i32) -> (i32, i32, i32) {
    %c0_i32 = arith.constant 0 : i32
    %c0_i32_0 = arith.constant 0 : i32
    return %arg0, %arg1, %c0_i32 : i32, i32, i32
  }
  func.func @transform_1(%arg0: i32, %arg1: i32, %arg2: i32) -> (i32, i32, i32) {
    %c0_i32 = arith.constant 0 : i32
    %0 = arith.minsi %arg2, %c0_i32 : i32
    %c0_i32_0 = arith.constant 0 : i32
    %c0_i32_1 = arith.constant 0 : i32
    return %arg0, %0, %c0_i32_0 : i32, i32, i32
  }
  func.func @transform_2(%arg0: i32, %arg1: i32, %arg2: i32) -> (i32, i32, i32) {
    %c1_i32 = arith.constant 1 : i32
    %0 = arith.subi %arg2, %c1_i32 : i32
    %c0_i32 = arith.constant 0 : i32
    %1 = arith.maxsi %0, %c0_i32 : i32
    %c0_i32_0 = arith.constant 0 : i32
    %c0_i32_1 = arith.constant 0 : i32
    return %arg0, %1, %c0_i32_0 : i32, i32, i32
  }
  func.func @transform_3(%arg0: i32, %arg1: i32, %arg2: i32) -> (i32, i32) {
    %c0_i32 = arith.constant 0 : i32
    %c0_i32_0 = arith.constant 0 : i32
    %c0_i32_1 = arith.constant 0 : i32
    return %c0_i32, %c0_i32_0 : i32, i32
  }
  func.func @transform_4(%arg0: i32, %arg1: i32, %arg2: i32) -> (i32, i32) {
    %c0_i32 = arith.constant 0 : i32
    %c0_i32_0 = arith.constant 0 : i32
    %c0_i32_1 = arith.constant 0 : i32
    return %c0_i32, %c0_i32_0 : i32, i32
  }
  func.func @transform_5(%arg0: i32, %arg1: i32, %arg2: i32) -> (i32, i32, i32) {
    %c0_i32 = arith.constant 0 : i32
    %c0_i32_0 = arith.constant 0 : i32
    return %arg0, %arg1, %c0_i32 : i32, i32, i32
  }
}

</mosaic_0001>

<bundles_post_ra>
// kernel: dual_attention_forward.7
= control target key start
LH: loop header
LB: loop body
LE: loop exit
PB: predicated region body
PF: predicated region fallthrough
CT: control target
= control target key end

     0   :  { %vm32_vm0 = vcmask 261120   ;;  %vm15_vm1 = vcmask 523264   ;;  %v193_v3 = vmov 0.0   ;;  %s261_s1 = inlined_call_operand.vmem [shape: f32[32,64], index: 1, kind: input, shape index: {}]   ;;  %s262_s0 = inlined_call_operand.vmem [shape: f32[32,32], index: 0, kind: input, shape index: {}]   ;;  %s263_s2 = inlined_call_operand.vmem [shape: f32[32,64], index: 2, kind: output, shape index: {}]  }
   0x1   :  { %v28_v0 = vld [vmem:[%s261_s1] sm:$0xff]  ;;  %v29_v1 = vld [vmem:[%s261_s1 + $0x8] sm:$0xff]  ;;  %v30_v2 = vld [vmem:[%s261_s1 + $0x10] sm:$0xff]  ;;  %17 = vst.msk [vmem:[#allocation2 + $0x8] sm:$0xff] %vm15_vm1, %v193_v3 }
   0x2   :  { %16 = vst.msk [vmem:[#allocation2] sm:$0xff] %vm15_vm1, %v193_v3  ;;  %18 = vst.msk [vmem:[#allocation2 + $0x10] sm:$0xff] %vm15_vm1, %v193_v3  ;;  %v180_v4 = vpack.c.bf16 %v29_v1, %v28_v0  ;;  %v31_v5 = vld [vmem:[%s261_s1 + $0x18] sm:$0xff]  ;;  %v24_v6 = vld [vmem:[%s262_s0] sm:$0xff] }
   0x3   :  { %19 = vst.msk [vmem:[#allocation2 + $0x18] sm:$0xff] %vm15_vm1, %v193_v3  ;;  %v26_v7 = vld [vmem:[%s262_s0 + $0x10] sm:$0xff]  ;;  %v184_v8 = vpack.c.bf16 %v31_v5, %v30_v2  ;;  %174 = vmatprep.mubr.msk.f32.mxu0 %vm32_vm0, %v24_v6  ;;  %v25_v9 = vld [vmem:[%s262_s0 + $0x8] sm:$0xff]  ;;  %v27_v10 = vld [vmem:[%s262_s0 + $0x18] sm:$0xff] }
   0x4   :  { %177 = vmatprep.mubr.msk.f32.mxu1 %vm32_vm0, %v26_v7  ;;  %181 = vmatprep.subr.bf16.mxu0 %v180_v4 }
   0x5   :  { %188 = vmatprep.subr.bf16.mxu1 %v180_v4  ;;  %183 = vmatpush3.bf16.msra.mxu0 %v180_v4 }
   0x6   :  { %190 = vmatpush3.bf16.msra.mxu1 %v180_v4  ;;  %185 = vmatprep.subr.bf16.mxu0 %v184_v8 }
   0x7   :  { %189 = vmatprep.subr.bf16.mxu1 %v184_v8 }
   0x8   :  { %v21_v11 = vld [vmem:[#allocation2 + $0x8] sm:$0xff] }
   0x9   :  { %187 = vmatpush3.bf16.msra.mxu0 %v184_v8  ;;  %v20_v13 = vld [vmem:[#allocation2] sm:$0xff]  ;;  %v22_v14 = vld [vmem:[#allocation2 + $0x10] sm:$0xff] }
   0xa   :  { %191 = vmatpush3.bf16.msra.mxu1 %v184_v8  ;;  %v23_v12 = vld [vmem:[#allocation2 + $0x18] sm:$0xff] }
   0xc   :  { %175 = vmatmul.mubr.msk.f32.vlgmr.msra.gmra.mrb[0].mxu0 %vm32_vm0, %v25_v9 }
   0xd   :  { %178 = vmatmul.mubr.msk.f32.vlgmr.msra.gmra.mrb[0].mxu1 %vm32_vm0, %v27_v10 }
  0xdf   :  { %v176_v15 = vpop.f32.mrb[0].mxu0 }
  0xe0   :  { %v179_v16 = vpop.f32.mrb[0].mxu1  ;;  %v131_v17 = vadd.f32 %v176_v15, %v21_v11  ;;  %v111_v19 = vpop.f32.mrb[1].mxu0 }
  0xe1   :  { %v133_v18 = vadd.f32 %v179_v16, %v23_v12  ;;  %v121_v20 = vpop.f32.mrb[1].mxu1  ;;  %v130_v21 = vadd.f32 %v111_v19, %v20_v13 }
  0xe2   :  { %v132_v22 = vadd.f32 %v121_v20, %v22_v14  ;;  %136 = vst.msk [vmem:[#allocation2 + $0x8] sm:$0xff] %vm15_vm1, %v131_v17 }
  0xe3   :  { %138 = vst.msk [vmem:[#allocation2 + $0x18] sm:$0xff] %vm15_vm1, %v133_v18  ;;  %135 = vst.msk [vmem:[#allocation2] sm:$0xff] %vm15_vm1, %v130_v21 }
  0xe4   :  { %137 = vst.msk [vmem:[#allocation2 + $0x10] sm:$0xff] %vm15_vm1, %v132_v22 }
  0xe9   :  { %v143_v23 = vld [vmem:[#allocation2 + $0x8] sm:$0xff] }
  0xea   :  { %v145_v24 = vld [vmem:[#allocation2 + $0x18] sm:$0xff]  ;;  %147 = vst.msk [vmem:[%s263_s2 + $0x8] sm:$0xff] %vm15_vm1, %v143_v23  ;;  %v142_v25 = vld [vmem:[#allocation2] sm:$0xff] }
  0xeb   :  { %149 = vst.msk [vmem:[%s263_s2 + $0x18] sm:$0xff] %vm15_vm1, %v145_v24  ;;  %v144_v26 = vld [vmem:[#allocation2 + $0x10] sm:$0xff]  ;;  %146 = vst.msk [vmem:[%s263_s2] sm:$0xff] %vm15_vm1, %v142_v25 }
  0xec   :  { %148 = vst.msk [vmem:[%s263_s2 + $0x10] sm:$0xff] %vm15_vm1, %v144_v26 }

// kernel: dual_attention_forward.6
= control target key start
LH: loop header
LB: loop body
LE: loop exit
PB: predicated region body
PF: predicated region fallthrough
CT: control target
= control target key end

     0   :  { %vm15_vm0 = vcmask 261120   ;;  %v192_v3 = vmov 0.0   ;;  %s260_s1 = inlined_call_operand.vmem [shape: f32[32,32], index: 1, kind: input, shape index: {}]   ;;  %s261_s0 = inlined_call_operand.vmem [shape: f32[32,32], index: 0, kind: input, shape index: {}]   ;;  %s262_s2 = inlined_call_operand.vmem [shape: f32[32,32], index: 2, kind: output, shape index: {}]  }
   0x1   :  { %v28_v0 = vld [vmem:[%s260_s1] sm:$0xff]  ;;  %v29_v1 = vld [vmem:[%s260_s1 + $0x8] sm:$0xff]  ;;  %v30_v2 = vld [vmem:[%s260_s1 + $0x10] sm:$0xff]  ;;  %17 = vst.msk [vmem:[#allocation2 + $0x8] sm:$0xff] %vm15_vm0, %v192_v3 }
   0x2   :  { %16 = vst.msk [vmem:[#allocation2] sm:$0xff] %vm15_vm0, %v192_v3  ;;  %18 = vst.msk [vmem:[#allocation2 + $0x10] sm:$0xff] %vm15_vm0, %v192_v3  ;;  %v179_v4 = vpack.c.bf16 %v29_v1, %v28_v0  ;;  %v31_v5 = vld [vmem:[%s260_s1 + $0x18] sm:$0xff]  ;;  %v24_v6 = vld [vmem:[%s261_s0] sm:$0xff] }
   0x3   :  { %19 = vst.msk [vmem:[#allocation2 + $0x18] sm:$0xff] %vm15_vm0, %v192_v3  ;;  %v26_v7 = vld [vmem:[%s261_s0 + $0x10] sm:$0xff]  ;;  %v183_v8 = vpack.c.bf16 %v31_v5, %v30_v2  ;;  %173 = vmatprep.mubr.msk.f32.mxu0 %vm15_vm0, %v24_v6  ;;  %v25_v9 = vld [vmem:[%s261_s0 + $0x8] sm:$0xff]  ;;  %v27_v10 = vld [vmem:[%s261_s0 + $0x18] sm:$0xff] }
   0x4   :  { %176 = vmatprep.mubr.msk.f32.mxu1 %vm15_vm0, %v26_v7  ;;  %180 = vmatprep.subr.bf16.mxu0 %v179_v4 }
   0x5   :  { %187 = vmatprep.subr.bf16.mxu1 %v179_v4  ;;  %182 = vmatpush3.bf16.msra.mxu0 %v179_v4 }
   0x6   :  { %189 = vmatpush3.bf16.msra.mxu1 %v179_v4  ;;  %184 = vmatprep.subr.bf16.mxu0 %v183_v8 }
   0x7   :  { %188 = vmatprep.subr.bf16.mxu1 %v183_v8 }
   0x8   :  { %v21_v11 = vld [vmem:[#allocation2 + $0x8] sm:$0xff] }
   0x9   :  { %186 = vmatpush3.bf16.msra.mxu0 %v183_v8  ;;  %v20_v13 = vld [vmem:[#allocation2] sm:$0xff]  ;;  %v22_v14 = vld [vmem:[#allocation2 + $0x10] sm:$0xff] }
   0xa   :  { %190 = vmatpush3.bf16.msra.mxu1 %v183_v8  ;;  %v23_v12 = vld [vmem:[#allocation2 + $0x18] sm:$0xff] }
   0xc   :  { %174 = vmatmul.mubr.msk.f32.vlgmr.msra.gmra.mrb[0].mxu0 %vm15_vm0, %v25_v9 }
   0xd   :  { %177 = vmatmul.mubr.msk.f32.vlgmr.msra.gmra.mrb[0].mxu1 %vm15_vm0, %v27_v10 }
  0xdf   :  { %v175_v15 = vpop.f32.mrb[0].mxu0 }
  0xe0   :  { %v178_v16 = vpop.f32.mrb[0].mxu1  ;;  %v131_v17 = vadd.f32 %v175_v15, %v21_v11  ;;  %v111_v19 = vpop.f32.mrb[1].mxu0 }
  0xe1   :  { %v133_v18 = vadd.f32 %v178_v16, %v23_v12  ;;  %v121_v20 = vpop.f32.mrb[1].mxu1  ;;  %v130_v21 = vadd.f32 %v111_v19, %v20_v13 }
  0xe2   :  { %v132_v22 = vadd.f32 %v121_v20, %v22_v14  ;;  %135 = vst.msk [vmem:[#allocation2 + $0x8] sm:$0xff] %vm15_vm0, %v131_v17 }
  0xe3   :  { %137 = vst.msk [vmem:[#allocation2 + $0x18] sm:$0xff] %vm15_vm0, %v133_v18  ;;  %134 = vst.msk [vmem:[#allocation2] sm:$0xff] %vm15_vm0, %v130_v21 }
  0xe4   :  { %136 = vst.msk [vmem:[#allocation2 + $0x10] sm:$0xff] %vm15_vm0, %v132_v22 }
  0xe9   :  { %v142_v23 = vld [vmem:[#allocation2 + $0x8] sm:$0xff] }
  0xea   :  { %v144_v24 = vld [vmem:[#allocation2 + $0x18] sm:$0xff]  ;;  %146 = vst.msk [vmem:[%s262_s2 + $0x8] sm:$0xff] %vm15_vm0, %v142_v23  ;;  %v141_v25 = vld [vmem:[#allocation2] sm:$0xff] }
  0xeb   :  { %148 = vst.msk [vmem:[%s262_s2 + $0x18] sm:$0xff] %vm15_vm0, %v144_v24  ;;  %v143_v26 = vld [vmem:[#allocation2 + $0x10] sm:$0xff]  ;;  %145 = vst.msk [vmem:[%s262_s2] sm:$0xff] %vm15_vm0, %v141_v25 }
  0xec   :  { %147 = vst.msk [vmem:[%s262_s2 + $0x10] sm:$0xff] %vm15_vm0, %v143_v26 }

// kernel: dual_attention_forward.8
= control target key start
LH: loop header
LB: loop body
LE: loop exit
PB: predicated region body
PF: predicated region fallthrough
CT: control target
= control target key end

     0   :  { %vm15_vm0 = vcmask 261120   ;;  %v151_v3 = vmov 0.0   ;;  %s199_s1 = inlined_call_operand.vmem [shape: f32[32,32], index: 1, kind: input, shape index: {}]   ;;  %s200_s0 = inlined_call_operand.vmem [shape: f32[16,32], index: 0, kind: input, shape index: {}]   ;;  %s201_s2 = inlined_call_operand.vmem [shape: f32[16,32], index: 2, kind: output, shape index: {}]  }
   0x1   :  { %v22_v0 = vld [vmem:[%s199_s1] sm:$0xff]  ;;  %v23_v1 = vld [vmem:[%s199_s1 + $0x8] sm:$0xff]  ;;  %v24_v2 = vld [vmem:[%s199_s1 + $0x10] sm:$0xff]  ;;  %17 = vst.msk [vmem:[#allocation2 + $0x8] sm:$0xff] %vm15_vm0, %v151_v3 }
   0x2   :  { %16 = vst.msk [vmem:[#allocation2] sm:$0xff] %vm15_vm0, %v151_v3  ;;  %v142_v4 = vpack.c.bf16 %v23_v1, %v22_v0  ;;  %v25_v5 = vld [vmem:[%s199_s1 + $0x18] sm:$0xff]  ;;  %v20_v6 = vld [vmem:[%s200_s0] sm:$0xff]  ;;  %v21_v8 = vld [vmem:[%s200_s0 + $0x8] sm:$0xff] }
   0x3   :  { %v146_v7 = vpack.c.bf16 %v25_v5, %v24_v2  ;;  %139 = vmatprep.mubr.msk.f32.mxu0 %vm15_vm0, %v20_v6 }
   0x4   :  { %143 = vmatprep.subr.bf16.mxu0 %v142_v4 }
   0x5   :  { %145 = vmatpush3.bf16.msra.mxu0 %v142_v4 }
   0x6   :  { %147 = vmatprep.subr.bf16.mxu0 %v146_v7 }
   0x8   :  { %v19_v9 = vld [vmem:[#allocation2 + $0x8] sm:$0xff] }
   0x9   :  { %149 = vmatpush3.bf16.msra.mxu0 %v146_v7  ;;  %v18_v10 = vld [vmem:[#allocation2] sm:$0xff] }
   0xc   :  { %140 = vmatmul.mubr.msk.f32.vlgmr.msra.gmra.mrb[0].mxu0 %vm15_vm0, %v21_v8 }
  0xdf   :  { %v141_v11 = vpop.f32.mrb[0].mxu0 }
  0xe0   :  { %v109_v12 = vadd.f32 %v141_v11, %v19_v9  ;;  %v99_v13 = vpop.f32.mrb[1].mxu0 }
  0xe1   :  { %v108_v14 = vadd.f32 %v99_v13, %v18_v10 }
  0xe2   :  { %111 = vst.msk [vmem:[#allocation2 + $0x8] sm:$0xff] %vm15_vm0, %v109_v12 }
  0xe3   :  { %110 = vst.msk [vmem:[#allocation2] sm:$0xff] %vm15_vm0, %v108_v14 }
  0xe9   :  { %v116_v15 = vld [vmem:[#allocation2 + $0x8] sm:$0xff] }
  0xea   :  { %118 = vst.msk [vmem:[%s201_s2 + $0x8] sm:$0xff] %vm15_vm0, %v116_v15  ;;  %v115_v16 = vld [vmem:[#allocation2] sm:$0xff] }
  0xeb   :  { %117 = vst.msk [vmem:[%s201_s2] sm:$0xff] %vm15_vm0, %v115_v16 }

// kernel: dual_attention_forward.9
= control target key start
LH: loop header
LB: loop body
LE: loop exit
PB: predicated region body
PF: predicated region fallthrough
CT: control target
= control target key end

     0   :  { %vm26_vm0 = vcmask 261120   ;;  %vm15_vm1 = vcmask 523264   ;;  %v152_v3 = vmov 0.0   ;;  %s200_s1 = inlined_call_operand.vmem [shape: f32[32,64], index: 1, kind: input, shape index: {}]   ;;  %s201_s0 = inlined_call_operand.vmem [shape: f32[16,32], index: 0, kind: input, shape index: {}]   ;;  %s202_s2 = inlined_call_operand.vmem [shape: f32[16,64], index: 2, kind: output, shape index: {}]  }
   0x1   :  { %v22_v0 = vld [vmem:[%s200_s1] sm:$0xff]  ;;  %v23_v1 = vld [vmem:[%s200_s1 + $0x8] sm:$0xff]  ;;  %v24_v2 = vld [vmem:[%s200_s1 + $0x10] sm:$0xff]  ;;  %17 = vst.msk [vmem:[#allocation2 + $0x8] sm:$0xff] %vm15_vm1, %v152_v3 }
   0x2   :  { %16 = vst.msk [vmem:[#allocation2] sm:$0xff] %vm15_vm1, %v152_v3  ;;  %v143_v4 = vpack.c.bf16 %v23_v1, %v22_v0  ;;  %v25_v5 = vld [vmem:[%s200_s1 + $0x18] sm:$0xff]  ;;  %v20_v6 = vld [vmem:[%s201_s0] sm:$0xff]  ;;  %v21_v8 = vld [vmem:[%s201_s0 + $0x8] sm:$0xff] }
   0x3   :  { %v147_v7 = vpack.c.bf16 %v25_v5, %v24_v2  ;;  %140 = vmatprep.mubr.msk.f32.mxu0 %vm26_vm0, %v20_v6 }
   0x4   :  { %144 = vmatprep.subr.bf16.mxu0 %v143_v4 }
   0x5   :  { %146 = vmatpush3.bf16.msra.mxu0 %v143_v4 }
   0x6   :  { %148 = vmatprep.subr.bf16.mxu0 %v147_v7 }
   0x8   :  { %v19_v9 = vld [vmem:[#allocation2 + $0x8] sm:$0xff] }
   0x9   :  { %150 = vmatpush3.bf16.msra.mxu0 %v147_v7  ;;  %v18_v10 = vld [vmem:[#allocation2] sm:$0xff] }
   0xc   :  { %141 = vmatmul.mubr.msk.f32.vlgmr.msra.gmra.mrb[0].mxu0 %vm26_vm0, %v21_v8 }
  0xdf   :  { %v142_v11 = vpop.f32.mrb[0].mxu0 }
  0xe0   :  { %v109_v12 = vadd.f32 %v142_v11, %v19_v9  ;;  %v99_v13 = vpop.f32.mrb[1].mxu0 }
  0xe1   :  { %v108_v14 = vadd.f32 %v99_v13, %v18_v10 }
  0xe2   :  { %112 = vst.msk [vmem:[#allocation2 + $0x8] sm:$0xff] %vm15_vm1, %v109_v12 }
  0xe3   :  { %111 = vst.msk [vmem:[#allocation2] sm:$0xff] %vm15_vm1, %v108_v14 }
  0xe9   :  { %v117_v15 = vld [vmem:[#allocation2 + $0x8] sm:$0xff] }
  0xea   :  { %119 = vst.msk [vmem:[%s202_s2 + $0x8] sm:$0xff] %vm15_vm1, %v117_v15  ;;  %v116_v16 = vld [vmem:[#allocation2] sm:$0xff] }
  0xeb   :  { %118 = vst.msk [vmem:[%s202_s2] sm:$0xff] %vm15_vm1, %v116_v16 }

// kernel: dual_attention_forward.11
= control target key start
LH: loop header
LB: loop body
LE: loop exit
PB: predicated region body
PF: predicated region fallthrough
CT: control target
= control target key end

     0   :  { %10 = vsyncpa [#allocation6], 0  ;;  %s3223_s0 = inlined_call_operand.vmem [shape: f32[2,8,32], index: 0, kind: input, shape index: {}]   ;;  %s3224_s1 = inlined_call_operand.vmem [shape: f32[2,16,64], index: 1, kind: input, shape index: {}]   ;;  %s3225_s2 = inlined_call_operand.vmem [shape: f32[2,8,64], index: 2, kind: input, shape index: {}]   ;;  %s3226_s3 = inlined_call_operand.vmem [shape: f32[32,32], index: 3, kind: input, shape index: {}]   ;;  %s3227_s4 = inlined_call_operand.vmem [shape: f32[1,32], index: 4, kind: input, shape index: {}]   ;;  %s3228_s5 = inlined_call_operand.hbm [shape: f32[2,8,32], index: 5, kind: output, shape index: {}]  }
   0x1   :  { %12 = vsyncpa [#allocation6 + $0x1], 0  ;;  %s2838_s18 = smov 0   ;;  %s2840_s19 = smov 0  }
   0x2   :  { %s2842_s20 = smov 0   ;;  %s2844_s21 = smov 0  }
   0x3   :  { %s2846_s22 = smov 0   ;;  %s2848_s23 = smov 0  }
   0x4   :  { %s2850_s24 = smov 0   ;;  %s2852_s25 = smov 0  }
   0x5 LB: > { %3234 = sst [smem:[#allocation8_spill]] %s2743_s20  ;;  %s2223_s26 = sadd.s32 4294967295, %s2763_s25   ;;  %s2763_s25 = sphi %s2852_s25, %s18_s25   ;;  %s2759_s24 = sphi %s2850_s24, %s3250_s24   ;;  %s2755_s23 = sphi %s2848_s23, %s3249_s23   ;;  %s2751_s22 = sphi %s2846_s22, %s3248_s22   ;;  %s2747_s21 = sphi %s2844_s21, %s3247_s21   ;;  %s2743_s20 = sphi %s2842_s20, %s3246_s20   ;;  %s2739_s19 = sphi %s2840_s19, %s3252_s19   ;;  %s2735_s18 = sphi %s2838_s18, %s3251_s18  }
   0x6   : > { %3235 = sst [smem:[#allocation9_spill]] %s2755_s23  ;;  %s2224_s27 = sadd.s32 4294967294, %s2763_s25  }
   0x7   : > { %3236 = sst [smem:[#allocation10_spill]] %s2759_s24  ;;  %s30_s28 = sadd.s32 1, %s2755_s23 }
   0x8   : > { %p31_p0 = scmp.ge.s32.totalorder %s30_s28, 2  ;;  %s37_s29 = sadd.s32 1, %s2759_s24 }
   0x9   : > { %p192_p1 = scmp.ne.s32.totalorder %s2743_s20, %s2739_s19  ;;  %p193_p2 = scmp.eq.s32.totalorder %s2223_s26, 3 }
   0xa   : > { %s3254_s28 = smov (%p31_p0, %s30_s28), 0  ;;  %s3256_s29 = smov (!%p31_p0, %s37_s29), %s2759_s24 }
   0xb   : > { %3237 = sst [smem:[#allocation11_spill]] %s3254_s28  ;;  %p2887_p3 = por %p193_p2, %p192_p1 }
   0xc   : > { %p198_p4 = scmp.ne.s32.totalorder %s2739_s19, %s2735_s18  ;;  %p39_p5 = scmp.ge.s32.totalorder %s3256_s29, 2 }
   0xd   : > { %p199_p6 = scmp.eq.s32.totalorder %s2224_s27, 3  ;;  %p2229_p7 = scmp.ge.s32.totalorder %s2763_s25, 1 }
   0xe   : > { %p266_p8 = scmp.lt.s32.totalorder %s2763_s25, 5  ;;  %s3258_s29 = smov (%p39_p5, %s3256_s29), 0 }
   0xf   : > { %3239 = sst [smem:[#allocation12_spill]] %s3258_s29  ;;  %p2897_p9 = por %p199_p6, %p198_p4 }
  0x10   : > { %p267_p10 = pnand %p2229_p7, %p266_p8  ;;  %s177_s7 = ssub.s32 %s2759_s24, %s3258_s29 }
  0x11   : > { %s182_s8 = sadd.s32 1, %s2743_s20  ;;  %p180_p11 = scmp.eq.s32.totalorder %s177_s7, 0 }
  0x12   : > { %270 = sbr.rel (%p267_p10) target bundleno = 4243 (0x1093), region = 40  ;;  %s3230_s10 = sand.u32 (!%p267_p10), 1, %s2739_s19  }
  0x13   : > { %s2905_s9 = scalar_select %p180_p11, %s2743_s20, %s182_s8  }
  0x14   : > { %p317_p12 = scmp.lt.s32.totalorder (!%p267_p10), %s2751_s22, 1  ;;  %s2911_s11 = sshll.u32 (!%p267_p10), %s3230_s10, 3 }
  0x15   : > { %3241 = sst [smem:[#allocation13_spill]] %s2905_s9  ;;  %p324_p13 = scmp.lt.s32.totalorder (!%p267_p10), %s2747_s21, 0 }
  0x16   : > { %s316_s20 = scalar_lea.vmem (!%p267_p10), [#allocation5], %s2911_s11  ;;  %p2242_p1 = scmp.ne.s32.totalorder (!%p267_p10), %s2747_s21, 0 }
  0x19   : > { %s318_s12 = scalar_select %p317_p12, %s2751_s22, 1 }
  0x1a   : > { %s325_s13 = scalar_select %p324_p13, %s2747_s21, 0 }
  0x1b   : > { %s2231_s14 = sshll.u32 %s318_s12, 3  ;;  %s2233_s29 = sshll.u32 %s318_s12, 1  ;;  %vm355_vm0 = vcmask (!%p2242_p1), 31744   ;;  %vm358_vm1 = vcmask (!%p2242_p1), 261120   ;;  %v2765_v0 = vmov (!%p2242_p1), -inf   ;;  %v2766_v1 = vmov (!%p2242_p1), 0.0  }
  0x1c   : > { %s2919_s17 = scalar_lea.vmem %s3223_s0, %s2231_s14  ;;  %s2232_s26 = sshll.u32 %s325_s13, 1  ;;  %356 = vst.msk [vmem:[#allocation2] sm:$0xff] (!%p2242_p1), %vm355_vm0, %v2765_v0  ;;  %357 = vst.msk [vmem:[#allocation3] sm:$0xff] (!%p2242_p1), %vm355_vm0, %v2766_v1 }
  0x1d   : > { %p329_p0 = scmp.lt.s32.totalorder %s2232_s26, 1  ;;  %s2924_s8 = scalar_lea.vmem %s3225_s2, %s2231_s14  ;;  %359 = vst.msk [vmem:[#allocation4] sm:$0xff] (!%p2242_p1), %vm358_vm1, %v2766_v1 }
  0x1e   : > { %354 = sbr.rel (%p2242_p1) target bundleno = 37 (0x25), region = 44 }
  0x1f   : > { %s3260_s26 = smov (!%p329_p0, %s2232_s26), 1 }
  0x20   : > { %s332_s10 = sadd.s32 %s2233_s29, %s3260_s26 }
  0x21   : > { %s2234_s28 = sshll.u32 %s332_s10, 3 }
  0x22   : > { %s334_s9 = scalar_lea.vmem %s3224_s1, %s2234_s28 }
  0x25 PF: > { %p2243_p2 = scmp.ge.s32.totalorder %s2747_s21, 1 }
  0x26   : > { %v365_v2 = vld [vmem:[%s334_s9] sm:$0xff] (!%p2243_p2)  ;;  %v366_v3 = vld [vmem:[%s334_s9 + $0x8] sm:$0xff] (!%p2243_p2)  ;;  %vm367_vm2 = vcmask (!%p2243_p2), 64512   ;;  %v2767_v4 = vmov (!%p2243_p2), 0.0|0.0   ;;  %vm2768_vm4 = vmmov (!%p2243_p2), 0   ;;  %v2769_v7 = vmov (!%p2243_p2), 0.0  }
  0x27   : > { %363 = sbr.rel (%p2243_p2) target bundleno = 2403 (0x963), region = 48  ;;  %2432 = vmatprep.subr.bf16.mxu0 (!%p2243_p2), %v2767_v4  ;;  %v2433_v5 = vpack.c.bf16 (!%p2243_p2), %v366_v3, %v365_v2  ;;  %vm2935_vm3 = vmpackc.low (!%p2243_p2), %vm367_vm2, %vm367_vm2  ;;  %2329 = vmatprep.mubr.msk.f32.mxu0 (!%p2243_p2), %vm2768_vm4, %v2769_v7  ;;  %v2948_v8 = vld [vmem:[%s2919_s17] sm:$0xff] (!%p2243_p2)  ;;  %vm448_vm5 = vcmask (!%p2243_p2), 130048   ;;  %v2770_v12 = vmov (!%p2243_p2), 0   ;;  %v2956_v13 = vpack.i.bf16 (!%p2243_p2), %v366_v3, %v365_v2  ;;  %s2771_s23 = smov (!%p2243_p2), 96  }
  0x28   : > { %2436 = vmatprep.subr.bf16.mxu1 (!%p2243_p2), %v2767_v4  ;;  %2336 = vmatprep.mubr.msk.f32.mxu1 (!%p2243_p2), %vm2768_vm4, %v2769_v7  ;;  %s2772_s24 = smov (!%p2243_p2), 120   ;;  %v2961_v14 = vld [vmem:[#allocation2] sm:$0xff] (!%p2243_p2)  ;;  %vm470_vm6 = vcmask (!%p2243_p2), 7168   ;;  %v2773_v36 = vmov (!%p2243_p2), 1   ;;  %s2774_s28 = smov (!%p2243_p2), 88   ;;  %vm671_vm7 = vcmask (!%p2243_p2), 15368  }
  0x29   : > { %2435 = vmatpush3.bf16.xpose.msk.msra.mxu0 (!%p2243_p2), %vm2935_vm3, %v2433_v5  ;;  %2579 = vset.pattern.permute.xlu0 (!%p2243_p2), %v2770_v12  ;;  %s2775_s29 = smov (!%p2243_p2), 112   ;;  %v2776_v59 = vmov (!%p2243_p2), 2   ;;  %vm877_vm8 = vcmask (!%p2243_p2), 23568   ;;  %s2777_s9 = smov (!%p2243_p2), 80   ;;  %vm1083_vm9 = vcmask (!%p2243_p2), 31768   ;;  %vm764_vm10 = vcmask (!%p2243_p2), 130112  }
  0x2a   : > { %2443 = vmatprep.subr.bf16.mxu0 (!%p2243_p2), %v2767_v4  ;;  %2581 = vrot.lane.b32.xlu1 (!%p2243_p2), %v2956_v13, %s2771_s23  ;;  %s2778_s10 = smov (!%p2243_p2), 104   ;;  %s2780_s12 = smov (!%p2243_p2), 72   ;;  %vm970_vm11 = vcmask (!%p2243_p2), 195712   ;;  %vm1176_vm12 = vcmask (!%p2243_p2), 261312  }
  0x2b   : > { %2601 = vset.pattern.permute.xlu1 (!%p2243_p2), %v2776_v59  ;;  %s2781_s13 = smov (!%p2243_p2), 8   ;;  %s2782_s14 = smov (!%p2243_p2), 16  }
  0x2c   : > { %s2783_s15 = smov (!%p2243_p2), 24  }
  0x2e   : > { %2586 = vrot.lane.b32.xlu1 %v2956_v13, %s2772_s24 }
  0x30   : > { %2330 = vmatmul.mubr.msk.f32.vlgmr.msra.gmra.mrb[0].mxu0 %vm367_vm2, %v2948_v8 }
  0x31   : > { %2350 = vmatprep.mubr.msk.f32.mxu0 %vm2768_vm4, %v2769_v7 }
  0x32   : > { %565 = vrot.lane.b32.xlu1 %v2948_v8, %s2772_s24 }
  0x9c   : > { %v2582_v18 = vpop.permute.xlu1 %2581 }
  0x9d   : > { %v2584_v19 = vunpack.i.h.bf16 %v2582_v18  ;;  %v2583_v20 = vunpack.i.l.bf16 %v2582_v18 }
  0x9f   : > { %v2437_v21 = vpack.c.bf16 %v2584_v19, %v2583_v20 }
  0xa0   : > { %v2587_v25 = vpop.permute.xlu1 %2586 }
  0xa1   : > { %2438 = vmatpush3.bf16.msra.mxu1 %v2437_v21  ;;  %v2589_v26 = vunpack.i.h.bf16 %v2587_v25  ;;  %v2588_v27 = vunpack.i.l.bf16 %v2587_v25 }
  0xa2   : > { %2439 = vmatprep.subr.bf16.mxu1 %v2767_v4 }
  0xa3   : > { %v2440_v28 = vpack.c.bf16 %v2589_v26, %v2588_v27 }
  0xa4   : > { %v566_v30 = vpop.permute.xlu1 %565 }
 0x103   : > { %v443_v9 = vpop.f32.mrb[0].mxu0 }
 0x104   : > { %v2331_v10 = vpop.f32.mrb[1].mxu0  ;;  %v449_v11 = vsel %vm448_vm5, %v443_v9, -inf }
 0x105   : > { %450 = vmax.xlane.f32.xlu0 %v449_v11 }
 0x192   : > { %v451_v15 = vpop.xlane.xlu0 %450 }
 0x193   : > { %v2964_v16 = vmax.f32 %v2961_v14, %v451_v15 }
 0x195   : > { %v453_v17 = vsub.f32 %v2961_v14, %v2964_v16  ;;  %560 = vst.msk [vmem:[#allocation2] sm:$0xff] %vm470_vm6, %v2964_v16  ;;  %458 = vperm.xlu0 %2579, %v2964_v16  }
 0x199   : > { %2590 = vset.pattern.permute.xlu0 %v2773_v36 }
 0x19c   : > { %v2988_v38 = vld [vmem:[#allocation2] sm:$0xff] }
 0x214   : > { %v459_v22 = vpop.permute.xlu0 %458 }
 0x215   : > { %v461_v23 = vsub.f32 %v443_v9, %v459_v22 }
 0x217   : > { %v462_v24 = vmul.f32 1.442695, %v461_v23 }
 0x219   : > { %2622 = vpow2.f32 %v462_v24 }
 0x223   : > { %v2972_v29 = vpop.eup %2622 }
 0x224   : > { %2337 = vmatmul.mubr.msk.f32.vlgmr.msra.gmra.mrb[0].mxu1 %vm448_vm5, %v2972_v29 }
 0x225   : > { %2442 = vmatpush3.bf16.xpose.msk.msra.mxu1 %vm2935_vm3, %v2440_v28  ;;  %2343 = vmatprep.mubr.msk.f32.mxu1 %vm2768_vm4, %v2769_v7 }
 0x226   : > { %2450 = vmatprep.subr.bf16.mxu1 %v2767_v4 }
 0x22c   : > { %2344 = vmatmul.mubr.msk.f32.vlgmr.msra.gmra.mrb[2].mxu1 %vm367_vm2, %v566_v30 }
 0x22d   : > { %2364 = vmatprep.mubr.msk.f32.mxu1 %vm2768_vm4, %v2769_v7 }
 0x2f7   : > { %v2984_v31 = vpop.f32.mrb[0].mxu1 }
 0x2f8   : > { %v2338_v32 = vpop.f32.mrb[1].mxu1 }
 0x2ff   : > { %v645_v33 = vpop.f32.mrb[2].mxu1 }
 0x300   : > { %v2345_v34 = vpop.f32.mrb[3].mxu1  ;;  %v650_v35 = vsel %vm448_vm5, %v645_v33, -inf }
 0x301   : > { %651 = vmax.xlane.f32.xlu1 %v650_v35 }
 0x312   : > { %2592 = vrot.lane.b32.xlu1 %v2956_v13, %s2774_s28 }
 0x38e   : > { %v652_v37 = vpop.xlane.xlu1 %651 }
 0x38f   : > { %v2991_v39 = vmax.f32 %v2988_v38, %v652_v37 }
 0x391   : > { %v654_v40 = vsub.f32 %v2988_v38, %v2991_v39  ;;  %766 = vst.msk [vmem:[#allocation2] sm:$0xff] %vm671_vm7, %v2991_v39  ;;  %659 = vperm.xlu0 %2590, %v2991_v39  }
 0x392   : > { %v2593_v41 = vpop.permute.xlu1 %2592 }
 0x393   : > { %v2595_v42 = vunpack.i.h.bf16 %v2593_v41  ;;  %v2594_v43 = vunpack.i.l.bf16 %v2593_v41  ;;  %v655_v6 = vmul.f32 1.442695, %v654_v40 }
 0x395   : > { %2597 = vrot.lane.b32.xlu0 %v2956_v13, %s2775_s29  ;;  %v2444_v44 = vpack.c.bf16 %v2595_v42, %v2594_v43 }
 0x397   : > { %2445 = vmatpush3.bf16.msra.mxu0 %v2444_v44 }
 0x398   : > { %2446 = vmatprep.subr.bf16.mxu0 %v2767_v4  ;;  %v855_v60 = vld [vmem:[#allocation2] sm:$0xff] }
 0x399   : > { %771 = vrot.lane.b32.xlu0 %v2948_v8, %s2775_s29 }
 0x410   : > { %v660_v45 = vpop.permute.xlu0 %659 }
 0x411   : > { %v662_v46 = vsub.f32 %v645_v33, %v660_v45 }
 0x413   : > { %v663_v47 = vmul.f32 1.442695, %v662_v46  ;;  %v551_v46 = vld [vmem:[#allocation4] sm:$0xff] }
 0x414   : > { %v2598_v48 = vpop.permute.xlu0 %2597 }
 0x415   : > { %2624 = vpow2.f32 %v663_v47  ;;  %v2600_v49 = vunpack.i.h.bf16 %v2598_v48  ;;  %v2599_v50 = vunpack.i.l.bf16 %v2598_v48 }
 0x417   : > { %v2447_v51 = vpack.c.bf16 %v2600_v49, %v2599_v50 }
 0x418   : > { %v772_v53 = vpop.permute.xlu0 %771 }
 0x41f   : > { %v3001_v52 = vpop.eup %2624 }
 0x420   : > { %2351 = vmatmul.mubr.msk.f32.vlgmr.msra.gmra.mrb[2].mxu0 %vm448_vm5, %v3001_v52  ;;  %v667_v14 = vsel %vm448_vm5, %v3001_v52, 0.0 }
 0x421   : > { %2449 = vmatpush3.bf16.xpose.msk.msra.mxu0 %vm2935_vm3, %v2447_v51  ;;  %2357 = vmatprep.mubr.msk.f32.mxu0 %vm2768_vm4, %v2769_v7 }
 0x422   : > { %2457 = vmatprep.subr.bf16.mxu0 %v2767_v4 }
 0x428   : > { %2358 = vmatmul.mubr.msk.f32.vlgmr.msra.gmra.mrb[4].mxu0 %vm367_vm2, %v772_v53 }
 0x429   : > { %2378 = vmatprep.mubr.msk.f32.mxu0 %vm2768_vm4, %v2769_v7 }
 0x4f3   : > { %v3013_v54 = vpop.f32.mrb[2].mxu0 }
 0x4f4   : > { %v2352_v55 = vpop.f32.mrb[3].mxu0 }
 0x4fb   : > { %v851_v56 = vpop.f32.mrb[4].mxu0 }
 0x4fc   : > { %v2359_v57 = vpop.f32.mrb[5].mxu0  ;;  %v856_v58 = vsel %vm448_vm5, %v851_v56, -inf }
 0x4fd   : > { %857 = vmax.xlane.f32.xlu0 %v856_v58 }
 0x58a   : > { %v858_v61 = vpop.xlane.xlu0 %857 }
 0x58b   : > { %v859_v62 = vmax.f32 %v855_v60, %v858_v61 }
 0x58d   : > { %v860_v63 = vsub.f32 %v855_v60, %v859_v62  ;;  %972 = vst.msk [vmem:[#allocation2] sm:$0xff] %vm877_vm8, %v859_v62  ;;  %865 = vperm.xlu1 %2601, %v859_v62  }
 0x58f   : > { %v861_v26 = vmul.f32 1.442695, %v860_v63 }
 0x591   : > { %2603 = vrot.lane.b32.xlu1 %v2956_v13, %s2777_s9 }
 0x592   : > { %2619 = vset.pattern.permute.xlu1 %v2773_v36 }
 0x594   : > { %v1061_v30 = vld [vmem:[#allocation2] sm:$0xff] }
 0x595   : > { %2608 = vrot.lane.b32.xlu1 %v2956_v13, %s2778_s10 }
 0x599   : > { %977 = vrot.lane.b32.xlu1 %v2948_v8, %s2778_s10 }
 0x60c   : > { %v866_v0 = vpop.permute.xlu1 %865 }
 0x60d   : > { %v868_v1 = vsub.f32 %v851_v56, %v866_v0 }
 0x60f   : > { %v869_v2 = vmul.f32 1.442695, %v868_v1 }
 0x610   : > { %v2604_v3 = vpop.permute.xlu1 %2603 }
 0x611   : > { %2626 = vpow2.f32 %v869_v2  ;;  %v2606_v5 = vunpack.i.h.bf16 %v2604_v3  ;;  %v2605_v9 = vunpack.i.l.bf16 %v2604_v3 }
 0x612   : > { %2628 = vpow2.f32 %v655_v6 }
 0x613   : > { %v2451_v10 = vpack.c.bf16 %v2606_v5, %v2605_v9  ;;  %2630 = vpow2.f32 %v861_v26 }
 0x614   : > { %v2609_v11 = vpop.permute.xlu1 %2608 }
 0x615   : > { %2452 = vmatpush3.bf16.msra.mxu1 %v2451_v10  ;;  %v2611_v15 = vunpack.i.h.bf16 %v2609_v11  ;;  %v2610_v18 = vunpack.i.l.bf16 %v2609_v11 }
 0x616   : > { %2453 = vmatprep.subr.bf16.mxu1 %v2767_v4  ;;  %v2779_v4 = vmov 3  }
 0x617   : > { %v2454_v19 = vpack.c.bf16 %v2611_v15, %v2610_v18  ;;  %2612 = vset.pattern.permute.xlu0 %v2779_v4 }
 0x618   : > { %v978_v8 = vpop.permute.xlu1 %977 }
 0x61b   : > { %v2627_v20 = vpop.eup %2626 }
 0x61c   : > { %2365 = vmatmul.mubr.msk.f32.vlgmr.msra.gmra.mrb[4].mxu1 %vm448_vm5, %v2627_v20  ;;  %v2629_v27 = vpop.eup %2628  ;;  %v873_v16 = vsel %vm448_vm5, %v2627_v20, 0.0 }
 0x61d   : > { %2371 = vmatprep.mubr.msk.f32.mxu1 %vm2768_vm4, %v2769_v7  ;;  %v466_v7 = vsel %vm448_vm5, %v2972_v29, 0.0  ;;  %v3034_v28 = vpop.eup %2630 }
 0x61e   : > { %2456 = vmatpush3.bf16.xpose.msk.msra.mxu1 %vm2935_vm3, %v2454_v19 }
 0x625   : > { %2372 = vmatmul.mubr.msk.f32.vlgmr.msra.gmra.mrb[6].mxu1 %vm367_vm2, %v978_v8 }
 0x6ef   : > { %v954_v21 = vpop.f32.mrb[4].mxu1 }
 0x6f0   : > { %v2366_v22 = vpop.f32.mrb[5].mxu1 }
 0x6f8   : > { %v1057_v23 = vpop.f32.mrb[6].mxu1 }
 0x6f9   : > { %v2373_v24 = vpop.f32.mrb[7].mxu1  ;;  %v1062_v25 = vsel %vm448_vm5, %v1057_v23, -inf }
 0x6fa   : > { %1063 = vmax.xlane.f32.xlu1 %v1062_v25 }
 0x70b   : > { %2614 = vrot.lane.b32.xlu1 %v2956_v13, %s2780_s12  ;;  %v454_v13 = vmul.f32 1.442695, %v453_v17  ;;  %v464_v17 = vld [vmem:[#allocation3] sm:$0xff] }
 0x70d   : > { %2632 = vpow2.f32 %v454_v13 }
 0x717   : > { %v2633_v36 = vpop.eup %2632 }
 0x718   : > { %v465_v38 = vmul.f32 %v2633_v36, %v464_v17 }
 0x72f   : > { %467 = vadd.xlane.f32.xlu1 %v466_v7 }
 0x740   : > { %755 = vperm.xlu1 %2619, %v2629_v27  }
 0x744   : > { %2620 = vset.pattern.permute.xlu1 %v2776_v59 }
 0x745   : > { %961 = vperm.xlu1 %2620, %v3034_v28  }
 0x787   : > { %v1064_v29 = vpop.xlane.xlu1 %1063 }
 0x788   : > { %v1065_v32 = vmax.f32 %v1061_v30, %v1064_v29 }
 0x78a   : > { %1178 = vst.msk [vmem:[#allocation2] sm:$0xff] %vm1083_vm9, %v1065_v32  ;;  %1071 = vperm.xlu0 %2612, %v1065_v32   ;;  %v1066_v40 = vsub.f32 %v1061_v30, %v1065_v32 }
 0x78b   : > { %v2615_v33 = vpop.permute.xlu1 %2614 }
 0x78c   : > { %v2617_v34 = vunpack.i.h.bf16 %v2615_v33  ;;  %v2616_v35 = vunpack.i.l.bf16 %v2615_v33  ;;  %v1067_v42 = vmul.f32 1.442695, %v1066_v40 }
 0x78e   : > { %2618 = vset.pattern.permute.xlu0 %v2770_v12  ;;  %v2458_v37 = vpack.c.bf16 %v2617_v34, %v2616_v35  ;;  %2634 = vpow2.f32 %v1067_v42 }
 0x78f   : > { %554 = vperm.xlu0 %2618, %v2633_v36  }
 0x790   : > { %2459 = vmatpush3.bf16.msra.mxu0 %v2458_v37 }
 0x793   : > { %2621 = vset.pattern.permute.xlu0 %v2779_v4 }
 0x798   : > { %v2635_v12 = vpop.eup %2634 }
 0x7ae   : > { %668 = vadd.xlane.f32.xlu0 %v667_v14 }
 0x7b2   : > { %874 = vadd.xlane.f32.xlu0 %v873_v16 }
 0x7bc   : > { %v468_v39 = vpop.xlane.xlu1 %467 }
 0x7bd   : > { %v469_v41 = vadd.f32 %v468_v39, %v465_v38 }
 0x7bf   : > { %471 = vst.msk [vmem:[#allocation3] sm:$0xff] %vm470_vm6, %v469_v41 }
 0x7c0   : > { %v756_v58 = vpop.permute.xlu1 %755 }
 0x7c4   : > { %v962_v0 = vpop.permute.xlu1 %961 }
 0x7c6   : > { %v665_v52 = vld [vmem:[#allocation3] sm:$0xff] }
 0x7c7   : > { %v666_v53 = vmul.f32 %v2629_v27, %v665_v52 }
 0x7c8   : > { %760 = vrot.lane.b32.xlu0 %v3013_v54, %s2781_s13 }
 0x7cc   : > { %966 = vrot.lane.b32.xlu0 %v954_v21, %s2782_s14 }
 0x7d0   : > { %1167 = vperm.xlu0 %2621, %v2635_v12  }
 0x809   : > { %v1072_v43 = vpop.permute.xlu0 %1071 }
 0x80a   : > { %v1074_v44 = vsub.f32 %v1057_v23, %v1072_v43 }
 0x80c   : > { %v1075_v45 = vmul.f32 1.442695, %v1074_v44 }
 0x80e   : > { %2636 = vpow2.f32 %v1075_v45  ;;  %v555_v47 = vpop.permute.xlu0 %554 }
 0x80f   : > { %v557_v48 = vmul.f32 %v555_v47, %v551_v46 }
 0x811   : > { %v558_v49 = vadd.f32 %v557_v48, %v2984_v31 }
 0x813   : > { %559 = vst.msk [vmem:[#allocation4] sm:$0xff] %vm367_vm2, %v558_v49 }
 0x818   : > { %v2637_v50 = vpop.eup %2636 }
 0x819   : > { %2379 = vmatmul.mubr.msk.f32.vlgmr.msra.gmra.mrb[6].mxu0 %vm448_vm5, %v2637_v50  ;;  %v1079_v51 = vsel %vm448_vm5, %v2637_v50, 0.0 }
 0x81a   : > { %1080 = vadd.xlane.f32.xlu1 %v1079_v51  ;;  %v752_v57 = vld [vmem:[#allocation4] sm:$0xff] }
 0x81b   : > { %v758_v59 = vmul.f32 %v756_v58, %v752_v57 }
 0x83b   : > { %v669_v54 = vpop.xlane.xlu0 %668 }
 0x83c   : > { %v670_v55 = vadd.f32 %v669_v54, %v666_v53 }
 0x83e   : > { %672 = vst.msk [vmem:[#allocation3] sm:$0xff] %vm671_vm7, %v670_v55 }
 0x83f   : > { %v875_v56 = vpop.xlane.xlu0 %874 }
 0x843   : > { %v761_v31 = vpop.permute.xlu0 %760 }
 0x844   : > { %v763_v60 = vadd.f32 %v761_v31, %v758_v59 }
 0x845   : > { %v871_v61 = vld [vmem:[#allocation3] sm:$0xff] }
 0x846   : > { %v872_v62 = vmul.f32 %v3034_v28, %v871_v61  ;;  %765 = vst.msk [vmem:[#allocation4] sm:$0xff] %vm764_vm10, %v763_v60 }
 0x847   : > { %v967_v3 = vpop.permute.xlu0 %966 }
 0x848   : > { %v876_v63 = vadd.f32 %v875_v56, %v872_v62 }
 0x84a   : > { %878 = vst.msk [vmem:[#allocation3] sm:$0xff] %vm877_vm8, %v876_v63 }
 0x84d   : > { %v958_v1 = vld [vmem:[#allocation4] sm:$0xff] }
 0x84e   : > { %v964_v2 = vmul.f32 %v962_v0, %v958_v1 }
 0x84f   : > { %v1168_v20 = vpop.permute.xlu0 %1167 }
 0x850   : > { %v969_v5 = vadd.f32 %v967_v3, %v964_v2 }
 0x851   : > { %v1077_v9 = vld [vmem:[#allocation3] sm:$0xff] }
 0x852   : > { %971 = vst.msk [vmem:[#allocation4] sm:$0xff] %vm970_vm11, %v969_v5  ;;  %v1078_v10 = vmul.f32 %v2635_v12, %v1077_v9 }
 0x859   : > { %v1164_v8 = vld [vmem:[#allocation4] sm:$0xff] }
 0x85a   : > { %v1170_v21 = vmul.f32 %v1168_v20, %v1164_v8 }
 0x8a7   : > { %v1081_v11 = vpop.xlane.xlu1 %1080 }
 0x8a8   : > { %v1082_v15 = vadd.f32 %v1081_v11, %v1078_v10 }
 0x8aa   : > { %1084 = vst.msk [vmem:[#allocation3] sm:$0xff] %vm1083_vm9, %v1082_v15 }
 0x8ec   : > { %v1160_v18 = vpop.f32.mrb[6].mxu0 }
 0x8ed   : > { %1172 = vrot.lane.b32.xlu0 %v1160_v18, %s2783_s15  ;;  %v2380_v19 = vpop.f32.mrb[7].mxu0 }
 0x95f   : > { %v1173_v22 = vpop.permute.xlu0 %1172 }
 0x960   : > { %v1175_v23 = vadd.f32 %v1173_v22, %v1170_v21 }
 0x962   : > { %1177 = vst.msk [vmem:[#allocation4] sm:$0xff] %vm1176_vm12, %v1175_v23 }
 0x963 PF: > { %p2260_p4 = scmp.lt.s32.totalorder %s2747_s21, 1 }
 0x964   : > { %v3057_v24 = vld [vmem:[%s2924_s8] sm:$0xff] (!%p2260_p4)  ;;  %vm1185_vm13 = vcmask (!%p2260_p4), 64512   ;;  %v2784_v25 = vmov (!%p2260_p4), 0.0   ;;  %vm2785_vm14 = vmmov (!%p2260_p4), 0   ;;  %v2786_v27 = vmov (!%p2260_p4), 0   ;;  %s2787_s16 = smov (!%p2260_p4), 96  }
 0x965   : > { %1182 = sbr.rel (%p2260_p4) target bundleno = 3822 (0xeee), region = 52  ;;  %2381 = vmatprep.subr.mxu0 (!%p2260_p4), %v2784_v25  ;;  %2383 = vmatprep.mubr.msk.f32.mxu0 (!%p2260_p4), %vm2785_vm14, %v2784_v25  ;;  %v1183_v4 = vld [vmem:[%s2919_s17] sm:$0xff] (!%p2260_p4)  ;;  %s2788_s17 = smov (!%p2260_p4), 120   ;;  %vm1284_vm15 = vcmask (!%p2260_p4), 7168   ;;  %v2791_v50 = vmov (!%p2260_p4), 1   ;;  %v2792_v51 = vmov (!%p2260_p4), 2  }
 0x966   : > { %2382 = vmatpush3.xpose.msk.msra.mxu0 (!%p2260_p4), %vm1185_vm13, %v3057_v24  ;;  %2386 = vmatprep.subr.mxu1 (!%p2260_p4), %v2784_v25  ;;  %s2789_s26 = smov (!%p2260_p4), 112   ;;  %s2790_s27 = smov (!%p2260_p4), 104   ;;  %v1262_v28 = vld [vmem:[#allocation2] sm:$0xff] (!%p2260_p4)  ;;  %vm1476_vm0 = vcmask (!%p2260_p4), 15368   ;;  %v2794_v58 = vmov (!%p2260_p4), 3   ;;  %vm1673_vm1 = vcmask (!%p2260_p4), 23568  }
 0x967   : > { %2388 = vmatprep.mubr.msk.f32.mxu1 (!%p2260_p4), %vm2785_vm14, %v2784_v25  ;;  %2396 = vmatprep.subr.mxu0 (!%p2260_p4), %v2784_v25  ;;  %s2793_s7 = smov (!%p2260_p4), 88   ;;  %vm1870_vm2 = vcmask (!%p2260_p4), 31768   ;;  %s2795_s8 = smov (!%p2260_p4), 80   ;;  %vm1566_vm3 = vcmask (!%p2260_p4), 130112   ;;  %vm1763_vm4 = vcmask (!%p2260_p4), 195712   ;;  %vm1960_vm5 = vcmask (!%p2260_p4), 261312  }
 0x968   : > { %2638 = vset.pattern.permute.xlu0 (!%p2260_p4), %v2786_v27  ;;  %1286 = vrot.lane.b32.xlu1 (!%p2260_p4), %v3057_v24, %s2787_s16  ;;  %s2796_s23 = smov (!%p2260_p4), 72   ;;  %s2797_s24 = smov (!%p2260_p4), 8  }
 0x969   : > { %2384 = vmatmul.mubr.msk.f32.vlgmr.msra.gmra.mrb[0].mxu0 (!%p2260_p4), %vm1185_vm13, %v1183_v4  ;;  %2639 = vset.pattern.permute.xlu1 (!%p2260_p4), %v2791_v50  ;;  %v1362_v22 = vld [vmem:[#allocation4] sm:$0xff] (!%p2260_p4)  ;;  %s2798_s28 = smov (!%p2260_p4), 24   ;;  %s2799_s29 = smov (!%p2260_p4), 16  }
 0x96a   : > { %2398 = vmatprep.mubr.msk.f32.mxu0 (!%p2260_p4), %vm2785_vm14, %v2784_v25 }
 0x96c   : > { %1378 = vrot.lane.b32.xlu1 %v3057_v24, %s2788_s17 }
 0x970   : > { %1375 = vrot.lane.b32.xlu1 %v1183_v4, %s2788_s17 }
 0x974   : > { %1575 = vrot.lane.b32.xlu1 %v3057_v24, %s2789_s26 }
 0x978   : > { %1572 = vrot.lane.b32.xlu1 %v1183_v4, %s2789_s26 }
 0x97c   : > { %1772 = vrot.lane.b32.xlu1 %v3057_v24, %s2790_s27 }
 0x980   : > { %1769 = vrot.lane.b32.xlu1 %v1183_v4, %s2790_s27 }
 0x9da   : > { %v1287_v32 = vpop.permute.xlu1 %1286 }
 0x9db   : > { %2387 = vmatpush3.msra.mxu1 %v1287_v32 }
 0x9dc   : > { %2391 = vmatprep.subr.mxu1 %v2784_v25 }
 0x9de   : > { %v1379_v33 = vpop.permute.xlu1 %1378 }
 0x9e2   : > { %v1376_v37 = vpop.permute.xlu1 %1375 }
 0x9e6   : > { %v1576_v14 = vpop.permute.xlu1 %1575 }
 0x9ea   : > { %v1573_v17 = vpop.permute.xlu1 %1572 }
 0x9ee   : > { %v1773_v38 = vpop.permute.xlu1 %1772 }
 0x9f2   : > { %v1770_v39 = vpop.permute.xlu1 %1769 }
 0xa3c   : > { %v1258_v7 = vpop.f32.mrb[0].mxu0 }
 0xa3d   : > { %v2385_v6 = vpop.f32.mrb[1].mxu0  ;;  %v1263_v26 = vsel %vm1185_vm13, %v1258_v7, -inf }
 0xa3e   : > { %1264 = vmax.xlane.f32.xlu0 %v1263_v26 }
 0xacb   : > { %v1265_v13 = vpop.xlane.xlu0 %1264 }
 0xacc   : > { %v1266_v29 = vmax.f32 %v1262_v28, %v1265_v13 }
 0xace   : > { %v1267_v30 = vsub.f32 %v1262_v28, %v1266_v29  ;;  %1371 = vst.msk [vmem:[#allocation2] sm:$0xff] %vm1284_vm15, %v1266_v29  ;;  %1272 = vperm.xlu0 %2638, %v1266_v29  }
 0xad0   : > { %v1268_v55 = vmul.f32 1.442695, %v1267_v30 }
 0xad2   : > { %2640 = vset.pattern.permute.xlu0 %v2792_v51 }
 0xad5   : > { %v1454_v53 = vld [vmem:[#allocation2] sm:$0xff] }
 0xb4d   : > { %v1273_v34 = vpop.permute.xlu0 %1272 }
 0xb4e   : > { %v1275_v35 = vsub.f32 %v1258_v7, %v1273_v34 }
 0xb50   : > { %v1276_v36 = vmul.f32 1.442695, %v1275_v35 }
 0xb52   : > { %2646 = vpow2.f32 %v1276_v36  ;;  %v1278_v36 = vld [vmem:[#allocation3] sm:$0xff] }
 0xb53   : > { %2648 = vpow2.f32 %v1268_v55 }
 0xb5c   : > { %v3080_v16 = vpop.eup %2646 }
 0xb5d   : > { %2389 = vmatmul.mubr.msk.f32.vlgmr.msra.gmra.mrb[0].mxu1 %vm1185_vm13, %v3080_v16  ;;  %v3115_v62 = vpop.eup %2648  ;;  %v1280_v5 = vsel %vm1185_vm13, %v3080_v16, 0.0 }
 0xb5e   : > { %2392 = vmatpush3.xpose.msk.msra.mxu1 %vm1185_vm13, %v1379_v33  ;;  %2393 = vmatprep.mubr.msk.f32.mxu1 %vm2785_vm14, %v2784_v25 }
 0xb5f   : > { %2401 = vmatprep.subr.mxu1 %v2784_v25 }
 0xb61   : > { %2394 = vmatmul.mubr.msk.f32.vlgmr.msra.gmra.mrb[2].mxu1 %vm1185_vm13, %v1376_v37  ;;  %v1279_v37 = vmul.f32 %v3115_v62, %v1278_v36 }
 0xb62   : > { %2402 = vmatpush3.xpose.msk.msra.mxu1 %vm1185_vm13, %v1576_v14  ;;  %2403 = vmatprep.mubr.msk.f32.mxu1 %vm2785_vm14, %v2784_v25 }
 0xb63   : > { %2411 = vmatprep.subr.mxu1 %v2784_v25 }
 0xb65   : > { %2404 = vmatmul.mubr.msk.f32.vlgmr.msra.gmra.mrb[4].mxu1 %vm1185_vm13, %v1573_v17 }
 0xb66   : > { %2412 = vmatpush3.xpose.msk.msra.mxu1 %vm1185_vm13, %v1773_v38  ;;  %2413 = vmatprep.mubr.msk.f32.mxu1 %vm2785_vm14, %v2784_v25 }
 0xb69   : > { %2414 = vmatmul.mubr.msk.f32.vlgmr.msra.gmra.mrb[6].mxu1 %vm1185_vm13, %v1770_v39 }
 0xc30   : > { %v3098_v40 = vpop.f32.mrb[0].mxu1 }
 0xc31   : > { %v2390_v41 = vpop.f32.mrb[1].mxu1 }
 0xc34   : > { %v3100_v42 = vpop.f32.mrb[2].mxu1 }
 0xc35   : > { %v2395_v12 = vpop.f32.mrb[3].mxu1  ;;  %v1455_v43 = vsel %vm1185_vm13, %v3100_v42, -inf }
 0xc36   : > { %1456 = vmax.xlane.f32.xlu1 %v1455_v43 }
 0xc38   : > { %v3104_v44 = vpop.f32.mrb[4].mxu1 }
 0xc39   : > { %v1652_v45 = vsel %vm1185_vm13, %v3104_v44, -inf  ;;  %v2405_v46 = vpop.f32.mrb[5].mxu1 }
 0xc3a   : > { %1653 = vmax.xlane.f32.xlu0 %v1652_v45 }
 0xc3c   : > { %v3108_v47 = vpop.f32.mrb[6].mxu1 }
 0xc3d   : > { %v1849_v48 = vsel %vm1185_vm13, %v3108_v47, -inf  ;;  %v2415_v49 = vpop.f32.mrb[7].mxu1 }
 0xc3e   : > { %1850 = vmax.xlane.f32.xlu1 %v1849_v48 }
 0xcc3   : > { %v1457_v52 = vpop.xlane.xlu1 %1456 }
 0xcc4   : > { %v1458_v54 = vmax.f32 %v1454_v53, %v1457_v52 }
 0xcc6   : > { %v1459_v56 = vsub.f32 %v1454_v53, %v1458_v54  ;;  %1568 = vst.msk [vmem:[#allocation2] sm:$0xff] %vm1476_vm0, %v1458_v54  ;;  %1464 = vperm.xlu1 %2639, %v1458_v54  }
 0xcc7   : > { %v1654_v57 = vpop.xlane.xlu0 %1653 }
 0xcc8   : > { %v1460_v9 = vmul.f32 1.442695, %v1459_v56 }
 0xcca   : > { %1478 = vrot.lane.b32.xlu1 %v3057_v24, %s2793_s7 }
 0xccb   : > { %2641 = vset.pattern.permute.xlu1 %v2794_v58  ;;  %v1851_v63 = vpop.xlane.xlu1 %1850 }
 0xccd   : > { %v1651_v59 = vld [vmem:[#allocation2] sm:$0xff] }
 0xcce   : > { %v1655_v31 = vmax.f32 %v1651_v59, %v1654_v57 }
 0xcd0   : > { %v1656_v60 = vsub.f32 %v1651_v59, %v1655_v31  ;;  %1765 = vst.msk [vmem:[#allocation2] sm:$0xff] %vm1673_vm1, %v1655_v31  ;;  %1661 = vperm.xlu0 %2640, %v1655_v31  }
 0xcd2   : > { %v1657_v61 = vmul.f32 1.442695, %v1656_v60 }
 0xcd4   : > { %2650 = vpow2.f32 %v1657_v61  ;;  %2642 = vset.pattern.permute.xlu0 %v2786_v27 }
 0xcd5   : > { %1365 = vperm.xlu0 %2642, %v3115_v62   ;;  %2652 = vpow2.f32 %v1460_v9 }
 0xcd7   : > { %v1848_v0 = vld [vmem:[#allocation2] sm:$0xff] }
 0xcd8   : > { %v1852_v1 = vmax.f32 %v1848_v0, %v1851_v63 }
 0xcd9   : > { %2644 = vset.pattern.permute.xlu0 %v2792_v51 }
 0xcda   : > { %v1853_v2 = vsub.f32 %v1848_v0, %v1852_v1  ;;  %1962 = vst.msk [vmem:[#allocation2] sm:$0xff] %vm1870_vm2, %v1852_v1  ;;  %1858 = vperm.xlu1 %2641, %v1852_v1  }
 0xcdc   : > { %v1854_v13 = vmul.f32 1.442695, %v1853_v2 }
 0xcde   : > { %v3120_v3 = vpop.eup %2650  ;;  %1675 = vrot.lane.b32.xlu1 %v3057_v24, %s2795_s8 }
 0xcdf   : > { %1754 = vperm.xlu0 %2644, %v3120_v3   ;;  %2643 = vset.pattern.permute.xlu1 %v2791_v50  ;;  %v2653_v10 = vpop.eup %2652 }
 0xce2   : > { %1872 = vrot.lane.b32.xlu1 %v3057_v24, %s2796_s23 }
 0xce3   : > { %2645 = vset.pattern.permute.xlu0 %v2794_v58 }
 0xd06   : > { %1281 = vadd.xlane.f32.xlu1 %v1280_v5 }
 0xd17   : > { %1557 = vperm.xlu1 %2643, %v2653_v10  }
 0xd45   : > { %v1465_v11 = vpop.permute.xlu1 %1464 }
 0xd46   : > { %v1467_v15 = vsub.f32 %v3100_v42, %v1465_v11 }
 0xd48   : > { %v1468_v18 = vmul.f32 1.442695, %v1467_v15 }
 0xd49   : > { %v1479_v19 = vpop.permute.xlu1 %1478 }
 0xd4a   : > { %2654 = vpow2.f32 %v1468_v18  ;;  %2397 = vmatpush3.msra.mxu0 %v1479_v19 }
 0xd4b   : > { %2406 = vmatprep.subr.mxu0 %v2784_v25 }
 0xd4f   : > { %v1662_v20 = vpop.permute.xlu0 %1661 }
 0xd50   : > { %v1664_v8 = vsub.f32 %v3104_v44, %v1662_v20 }
 0xd52   : > { %v1665_v21 = vmul.f32 1.442695, %v1664_v8 }
 0xd54   : > { %v2655_v23 = vpop.eup %2654  ;;  %2656 = vpow2.f32 %v1665_v21  ;;  %v1366_v24 = vpop.permute.xlu0 %1365 }
 0xd55   : > { %v1368_v4 = vmul.f32 %v1366_v24, %v1362_v22  ;;  %2399 = vmatmul.mubr.msk.f32.vlgmr.msra.gmra.mrb[2].mxu0 %vm1185_vm13, %v2655_v23  ;;  %v1472_v7 = vsel %vm1185_vm13, %v2655_v23, 0.0 }
 0xd56   : > { %1473 = vadd.xlane.f32.xlu0 %v1472_v7  ;;  %2408 = vmatprep.mubr.msk.f32.mxu0 %vm2785_vm14, %v2784_v25 }
 0xd57   : > { %v1369_v6 = vadd.f32 %v1368_v4, %v3098_v40 }
 0xd59   : > { %1370 = vst.msk [vmem:[#allocation4] sm:$0xff] %vm1185_vm13, %v1369_v6  ;;  %v1859_v26 = vpop.permute.xlu1 %1858 }
 0xd5a   : > { %v1861_v27 = vsub.f32 %v3108_v47, %v1859_v26 }
 0xd5c   : > { %v1862_v28 = vmul.f32 1.442695, %v1861_v27 }
 0xd5d   : > { %v1676_v29 = vpop.permute.xlu1 %1675 }
 0xd5e   : > { %v2657_v30 = vpop.eup %2656  ;;  %2658 = vpow2.f32 %v1862_v28  ;;  %2407 = vmatpush3.msra.mxu0 %v1676_v29  ;;  %v1755_v17 = vpop.permute.xlu0 %1754 }
 0xd5f   : > { %2409 = vmatmul.mubr.msk.f32.vlgmr.msra.gmra.mrb[4].mxu0 %vm1185_vm13, %v2657_v30  ;;  %v1669_v32 = vsel %vm1185_vm13, %v2657_v30, 0.0  ;;  %2416 = vmatprep.subr.mxu0 %v2784_v25  ;;  %2660 = vpow2.f32 %v1854_v13 }
 0xd60   : > { %1670 = vadd.xlane.f32.xlu1 %v1669_v32  ;;  %2418 = vmatprep.mubr.msk.f32.mxu0 %vm2785_vm14, %v2784_v25  ;;  %v1554_v52 = vld [vmem:[#allocation4] sm:$0xff] }
 0xd61   : > { %v1873_v33 = vpop.permute.xlu1 %1872 }
 0xd62   : > { %2417 = vmatpush3.msra.mxu0 %v1873_v33 }
 0xd68   : > { %v2659_v34 = vpop.eup %2658 }
 0xd69   : > { %2419 = vmatmul.mubr.msk.f32.vlgmr.msra.gmra.mrb[6].mxu0 %vm1185_vm13, %v2659_v34  ;;  %v2661_v35 = vpop.eup %2660  ;;  %v1866_v51 = vsel %vm1185_vm13, %v2659_v34, 0.0 }
 0xd6c   : > { %1951 = vperm.xlu0 %2645, %v2661_v35  }
 0xd93   : > { %v1282_v14 = vpop.xlane.xlu1 %1281 }
 0xd94   : > { %v1283_v16 = vadd.f32 %v1282_v14, %v1279_v37 }
 0xd96   : > { %1285 = vst.msk [vmem:[#allocation3] sm:$0xff] %vm1284_vm15, %v1283_v16 }
 0xd97   : > { %v1558_v41 = vpop.permute.xlu1 %1557 }
 0xd98   : > { %v1560_v53 = vmul.f32 %v1558_v41, %v1554_v52 }
 0xd9d   : > { %v1470_v38 = vld [vmem:[#allocation3] sm:$0xff] }
 0xd9e   : > { %v1471_v39 = vmul.f32 %v2653_v10, %v1470_v38 }
 0xde3   : > { %v1474_v40 = vpop.xlane.xlu0 %1473 }
 0xde4   : > { %v1475_v25 = vadd.f32 %v1474_v40, %v1471_v39 }
 0xde6   : > { %1477 = vst.msk [vmem:[#allocation3] sm:$0xff] %vm1476_vm0, %v1475_v25 }
 0xdeb   : > { %v1952_v63 = vpop.permute.xlu0 %1951 }
 0xded   : > { %v1667_v42 = vld [vmem:[#allocation3] sm:$0xff]  ;;  %v1671_v43 = vpop.xlane.xlu1 %1670 }
 0xdee   : > { %v1668_v12 = vmul.f32 %v3120_v3, %v1667_v42 }
 0xdf0   : > { %v1672_v44 = vadd.f32 %v1671_v43, %v1668_v12 }
 0xdf2   : > { %1674 = vst.msk [vmem:[#allocation3] sm:$0xff] %vm1673_vm1, %v1672_v44 }
 0xdf9   : > { %v1864_v56 = vld [vmem:[#allocation3] sm:$0xff] }
 0xdfa   : > { %v1865_v57 = vmul.f32 %v2661_v35, %v1864_v56 }
 0xe28   : > { %v1550_v45 = vpop.f32.mrb[2].mxu0 }
 0xe29   : > { %1562 = vrot.lane.b32.xlu1 %v1550_v45, %s2797_s24  ;;  %v2400_v46 = vpop.f32.mrb[3].mxu0 }
 0xe32   : > { %v1747_v47 = vpop.f32.mrb[4].mxu0 }
 0xe33   : > { %v2410_v48 = vpop.f32.mrb[5].mxu0 }
 0xe3c   : > { %v1944_v49 = vpop.f32.mrb[6].mxu0 }
 0xe3d   : > { %1956 = vrot.lane.b32.xlu0 %v1944_v49, %s2798_s28  ;;  %v2420_v50 = vpop.f32.mrb[7].mxu0 }
 0xe4d   : > { %1867 = vadd.xlane.f32.xlu1 %v1866_v51 }
 0xe5e   : > { %1759 = vrot.lane.b32.xlu1 %v1747_v47, %s2799_s29 }
 0xe9b   : > { %v1563_v54 = vpop.permute.xlu1 %1562 }
 0xe9c   : > { %v1565_v55 = vadd.f32 %v1563_v54, %v1560_v53 }
 0xe9e   : > { %1567 = vst.msk [vmem:[#allocation4] sm:$0xff] %vm1566_vm3, %v1565_v55 }
 0xea5   : > { %v1751_v59 = vld [vmem:[#allocation4] sm:$0xff] }
 0xea6   : > { %v1757_v60 = vmul.f32 %v1755_v17, %v1751_v59 }
 0xeaf   : > { %v1957_v2 = vpop.permute.xlu0 %1956 }
 0xeda   : > { %v1868_v58 = vpop.xlane.xlu1 %1867 }
 0xedb   : > { %v1869_v31 = vadd.f32 %v1868_v58, %v1865_v57 }
 0xedd   : > { %1871 = vst.msk [vmem:[#allocation3] sm:$0xff] %vm1870_vm2, %v1869_v31 }
 0xede   : > { %v1760_v61 = vpop.permute.xlu1 %1759 }
 0xedf   : > { %v1762_v62 = vadd.f32 %v1760_v61, %v1757_v60 }
 0xee1   : > { %1764 = vst.msk [vmem:[#allocation4] sm:$0xff] %vm1763_vm4, %v1762_v62 }
 0xee8   : > { %v1948_v0 = vld [vmem:[#allocation4] sm:$0xff] }
 0xee9   : > { %v1954_v1 = vmul.f32 %v1952_v63, %v1948_v0 }
 0xeeb   : > { %v1959_v3 = vadd.f32 %v1957_v2, %v1954_v1 }
 0xeed   : > { %1961 = vst.msk [vmem:[#allocation4] sm:$0xff] %vm1960_vm5, %v1959_v3 }
 0xeee PF: > { %p2273_p5 = scmp.ne.s32.totalorder %s2747_s21, 1 }
 0xeef   : > { %v1967_v5 = vld [vmem:[#allocation3] sm:$0xff] (!%p2273_p5)  ;;  %v2800_v9 = vmov (!%p2273_p5), 0   ;;  %v2801_v10 = vmov (!%p2273_p5), 2   ;;  %v2802_v15 = vmov (!%p2273_p5), 1   ;;  %v2803_v18 = vmov (!%p2273_p5), 3   ;;  %v2012_v19 = vld [vmem:[%s3226_s3] sm:$0xff] (!%p2273_p5) }
 0xef0   : > { %1966 = sbr.rel (%p2273_p5) target bundleno = 4218 (0x107a), region = 56  ;;  %2662 = vset.pattern.permute.xlu0 (!%p2273_p5), %v2800_v9  ;;  %2667 = vrcp.f32 (!%p2273_p5), %v1967_v5  ;;  %2664 = vset.pattern.permute.xlu1 (!%p2273_p5), %v2801_v10  ;;  %v2013_v20 = vld [vmem:[%s3226_s3 + $0x8] sm:$0xff] (!%p2273_p5)  ;;  %v2804_v21 = vmov (!%p2273_p5), 0.0|0.0   ;;  %v2014_v22 = vld [vmem:[%s3226_s3 + $0x10] sm:$0xff] (!%p2273_p5)  ;;  %v2015_v23 = vld [vmem:[%s3226_s3 + $0x18] sm:$0xff] (!%p2273_p5)  ;;  %vm2805_vm6 = vmmov (!%p2273_p5), 0  }
 0xef1   : > { %v2461_v8 = vpack.c.bf16 (!%p2273_p5), %v2013_v20, %v2012_v19  ;;  %2460 = vmatprep.subr.bf16.mxu0 (!%p2273_p5), %v2804_v21  ;;  %v2464_v24 = vpack.c.bf16 (!%p2273_p5), %v2015_v23, %v2014_v22  ;;  %v2806_v4 = vmov (!%p2273_p5), 0.0   ;;  %vm1976_vm7 = vcmask (!%p2273_p5), 64512   ;;  %v2274_v37 = vld [vmem:[%s3227_s4] ss:$0 sm:$0xff] (!%p2273_p5) }
 0xef2   : > { %2429 = vmatprep.mubr.msk.f32.mxu0 (!%p2273_p5), %vm2805_vm6, %v2806_v4  ;;  %vm1987_vm8 = vcmask (!%p2273_p5), 130112   ;;  %vm1998_vm9 = vcmask (!%p2273_p5), 195712   ;;  %vm2009_vm10 = vcmask (!%p2273_p5), 261312   ;;  %vm2023_vm11 = vcmask (!%p2273_p5), 261120  }
 0xef3   : > { %2462 = vmatpush3.bf16.msra.mxu0 (!%p2273_p5), %v2461_v8 }
 0xef4   : > { %2463 = vmatprep.subr.bf16.mxu0 (!%p2273_p5), %v2804_v21  ;;  %v1969_v7 = vld [vmem:[#allocation4] sm:$0xff] (!%p2273_p5) }
 0xef7   : > { %2465 = vmatpush3.bf16.msra.mxu0 %v2464_v24 }
 0xefa   : > { %v2668_v11 = vpop.eup %2667 }
 0xefb   : > { %1972 = vperm.xlu0 %2662, %v2668_v11   ;;  %1994 = vperm.xlu1 %2664, %v2668_v11  }
 0xeff   : > { %2663 = vset.pattern.permute.xlu0 %v2802_v15  ;;  %2665 = vset.pattern.permute.xlu1 %v2803_v18 }
 0xf00   : > { %1983 = vperm.xlu0 %2663, %v2668_v11   ;;  %2005 = vperm.xlu1 %2665, %v2668_v11  }
 0xf04   : > { %2666 = vset.pattern.permute.xlu0 %v2803_v18 }
 0xf7a   : > { %v1973_v6 = vpop.permute.xlu0 %1972  ;;  %v1995_v29 = vpop.permute.xlu1 %1994 }
 0xf7b   : > { %v1975_v26 = vmul.f32 %v1973_v6, %v1969_v7 }
 0xf7d   : > { %1977 = vst.msk [vmem:[#allocation4] sm:$0xff] %vm1976_vm7, %v1975_v26 }
 0xf7f   : > { %v1984_v27 = vpop.permute.xlu0 %1983  ;;  %v2006_v33 = vpop.permute.xlu1 %2005 }
 0xf84   : > { %v1980_v28 = vld [vmem:[#allocation4] sm:$0xff] }
 0xf85   : > { %v1986_v13 = vmul.f32 %v1984_v27, %v1980_v28 }
 0xf87   : > { %1988 = vst.msk [vmem:[#allocation4] sm:$0xff] %vm1987_vm8, %v1986_v13 }
 0xf8e   : > { %v1991_v30 = vld [vmem:[#allocation4] sm:$0xff] }
 0xf8f   : > { %v1997_v32 = vmul.f32 %v1995_v29, %v1991_v30 }
 0xf91   : > { %1999 = vst.msk [vmem:[#allocation4] sm:$0xff] %vm1998_vm9, %v1997_v32 }
 0xf98   : > { %v2002_v34 = vld [vmem:[#allocation4] sm:$0xff] }
 0xf99   : > { %v2008_v35 = vmul.f32 %v2006_v33, %v2002_v34 }
 0xf9b   : > { %2010 = vst.msk [vmem:[#allocation4] sm:$0xff] %vm2009_vm10, %v2008_v35 }
 0xfa2   : > { %v2011_v36 = vld [vmem:[#allocation4] sm:$0xff] }
 0xfa3   : > { %2430 = vmatmul.mubr.msk.f32.vlgmr.msra.gmra.mrb[0].mxu0 %vm2023_vm11, %v2011_v36 }
0x1076   : > { %v2093_v14 = vpop.f32.mrb[0].mxu0 }
0x1077   : > { %v2094_v16 = vadd.f32 %v2274_v37, %v2093_v14  ;;  %v2431_v17 = vpop.f32.mrb[1].mxu0 }
0x1079   : > { %2097 = vst.msk [vmem:[%s316_s20] sm:$0xff] %vm2023_vm11, %v2094_v16 }
0x107a PF: > { %s2277_s27 = sshll.u32 %s2751_s22, 7  ;;  %s2113_s24 = sshll.u32 %s316_s20, 4  ;;  %s2114_s24 = int_to_ptr.vmem [resolvable:$true] %s2113_s24 }
0x107b   : > { %s3172_s23 = scalar_lea.hbm %s3228_s5, %s2277_s27  ;;  %s3244_s28 = sand.u32 1, %s2739_s19  }
0x107c   : > { %s2099_s29 = scalar_lea.sflag [#allocation6], %s3244_s28  ;;  %s2669_s9 = scalar_lea.vmem %s2114_s24, 128 }
0x107d   : > { %p2670_p6 = scmp.ne.s32.totalorder %s2114_s24, %s2669_s9  ;;  %s2807_s10 = smov [#allocation5]  }
0x107e   : > { %s2673_s21 = sshll.u32 %s2807_s10, 4  ;;  %s2674_s21 = int_to_ptr.vmem [resolvable:$false] %s2673_s21 }
0x107f   : > { %p2671_p7 = pnand %p2670_p6, %p2887_p3  ;;  %s2675_s12 = scalar_lea.vmem %s2674_s21, 256 }
0x1080   : > { %p2676_p10 = scmp.lt.s32.totalorder %s2114_s24, %s2674_s21  ;;  %p2677_p11 = scmp.lt.s32.totalorder %s2675_s12, %s2669_s9 }
0x1081   : > { %p2672_p8 = pneg %p2671_p7 }
0x1082   : > { %p2678_p12 = por %p2677_p11, %p2676_p10 }
0x1084   : > { %p2679_p13 = pnand %p2678_p12, %p2672_p8 }
0x1086   : > { %2682 = shalt.err (!%p2679_p13)
}
0x1087   : > { %s2683_s20 = scalar_lea.hbm %s3172_s23, 128  ;;  %s2687_s13 = scalar_lea.hbm %s3228_s5, 256 }
0x1088   : > { %p2684_p0 = scmp.ne.s32.totalorder %s3172_s23, %s2683_s20  ;;  %p2688_p4 = scmp.lt.u32.totalorder %s3172_s23, %s3228_s5 }
0x1089   : > { %p2689_p5 = scmp.lt.u32.totalorder %s2687_s13, %s2683_s20  ;;  %p2691_p7 = scmp.lt.u32.totalorder %s2683_s20, %s3172_s23 }
0x108a   : > { %p2685_p1 = pnand %p2684_p0, %p2887_p3 }
0x108b   : > { %p2690_p6 = por %p2689_p5, %p2688_p4 }
0x108c   : > { %p2686_p2 = pneg %p2685_p1 }
0x108d   : > { %p2692_p8 = por %p2691_p7, %p2690_p6 }
0x108f   : > { %p2693_p10 = pnand %p2692_p8, %p2686_p2 }
0x1091   : > { %2696 = shalt.err (!%p2693_p10)
}
0x1092   : > { %2466 = dma.vmem_to_hbm [thread:$0]  (%p2887_p3), %s2114_s24, 128, %s3172_s23, %s2099_s29  }
0x1093 PF: > { %p2472_p11 = scmp.ge.s32.totalorder %s2763_s25, 2  ;;  %s2125_s16 = sand.u32 1, %s2735_s18  }
0x1094   : > { %s2126_s17 = scalar_lea.sflag [#allocation6], %s2125_s16 }
0x1095   : > { %p2469_p12 = pnand %p2472_p11, %p2897_p9 }
0x1097   : > { %2730 = dma.done.wait (!%p2469_p12), %s2126_s17, 128  }
0x1098   : > { %2732 = vsyncadd (!%p2469_p12), %s2126_s17, 4294967168  ;;  %s18_s25 = sadd.s32 1, %s2763_s25   ;;  %s3245_s26 = sld [smem:[#allocation8_spill]] }
0x1099   : > { %p15_p13 = scmp.ge.s32.totalorder %s18_s25, 6   ;;  %s3246_s20 = sld [smem:[#allocation13_spill]] }
0x109a   : > { %s3247_s21 = sld [smem:[#allocation9_spill]]  ;;  %s3248_s22 = sld [smem:[#allocation10_spill]] }
0x109b   : > { %s3249_s23 = sld [smem:[#allocation11_spill]]  ;;  %s3250_s24 = sld [smem:[#allocation12_spill]] }
0x109c   : > { %s3251_s18 = smov %s2739_s19  ;;  %17 = sbr.rel (!%p15_p13) target bundleno = 5 (0x5), region = 97 }
0x109e   : > { %s3252_s19 = smov %s3245_s26 }
0x10a3   :  { %2131 = vsyncpa [#allocation6], 1 }
0x10a4   :  { %2133 = vsyncpa [#allocation6 + $0x1], 1 }

// kernel: dual_attention_forward.10
= control target key start
LH: loop header
LB: loop body
LE: loop exit
PB: predicated region body
PF: predicated region fallthrough
CT: control target
= control target key end

     0   :  { %10 = vsyncpa [#allocation6], 0  ;;  %s4093_s0 = inlined_call_operand.vmem [shape: f32[2,16,32], index: 0, kind: input, shape index: {}]   ;;  %s4094_s1 = inlined_call_operand.vmem [shape: f32[2,16,64], index: 1, kind: input, shape index: {}]   ;;  %s4095_s2 = inlined_call_operand.vmem [shape: f32[2,8,64], index: 2, kind: input, shape index: {}]   ;;  %s4096_s3 = inlined_call_operand.vmem [shape: f32[32,32], index: 3, kind: input, shape index: {}]   ;;  %s4097_s4 = inlined_call_operand.vmem [shape: f32[1,32], index: 4, kind: input, shape index: {}]   ;;  %s4098_s5 = inlined_call_operand.hbm [shape: f32[2,16,32], index: 5, kind: output, shape index: {}]  }
   0x1   :  { %12 = vsyncpa [#allocation6 + $0x1], 0  ;;  %s3430_s18 = smov 0   ;;  %s3432_s19 = smov 0  }
   0x2   :  { %s3434_s20 = smov 0   ;;  %s3436_s21 = smov 0  }
   0x3   :  { %s3438_s22 = smov 0   ;;  %s3440_s23 = smov 0  }
   0x4   :  { %s3442_s24 = smov 0   ;;  %s3444_s25 = smov 0  }
   0x5 LB: > { %4105 = sst [smem:[#allocation8_spill]] %s3341_s20  ;;  %s2730_s26 = sadd.s32 4294967295, %s3361_s25   ;;  %s3361_s25 = sphi %s3444_s25, %s18_s25   ;;  %s3357_s24 = sphi %s3442_s24, %s4123_s24   ;;  %s3353_s23 = sphi %s3440_s23, %s4122_s23   ;;  %s3349_s22 = sphi %s3438_s22, %s4121_s22   ;;  %s3345_s21 = sphi %s3436_s21, %s4120_s21   ;;  %s3341_s20 = sphi %s3434_s20, %s4119_s20   ;;  %s3337_s19 = sphi %s3432_s19, %s4125_s19   ;;  %s3333_s18 = sphi %s3430_s18, %s4124_s18  }
   0x6   : > { %4106 = sst [smem:[#allocation9_spill]] %s3353_s23  ;;  %s2731_s27 = sadd.s32 4294967294, %s3361_s25  }
   0x7   : > { %4107 = sst [smem:[#allocation10_spill]] %s3357_s24  ;;  %s30_s28 = sadd.s32 1, %s3353_s23 }
   0x8   : > { %p31_p0 = scmp.ge.s32.totalorder %s30_s28, 2  ;;  %s37_s29 = sadd.s32 1, %s3357_s24 }
   0x9   : > { %p192_p1 = scmp.ne.s32.totalorder %s3341_s20, %s3337_s19  ;;  %p193_p2 = scmp.eq.s32.totalorder %s2730_s26, 3 }
   0xa   : > { %s4127_s28 = smov (%p31_p0, %s30_s28), 0  ;;  %s4129_s29 = smov (!%p31_p0, %s37_s29), %s3357_s24 }
   0xb   : > { %4108 = sst [smem:[#allocation11_spill]] %s4127_s28  ;;  %p3479_p3 = por %p193_p2, %p192_p1 }
   0xc   : > { %p198_p4 = scmp.ne.s32.totalorder %s3337_s19, %s3333_s18  ;;  %p39_p5 = scmp.ge.s32.totalorder %s4129_s29, 2 }
   0xd   : > { %p199_p6 = scmp.eq.s32.totalorder %s2731_s27, 3  ;;  %p2736_p7 = scmp.ge.s32.totalorder %s3361_s25, 1 }
   0xe   : > { %p269_p8 = scmp.lt.s32.totalorder %s3361_s25, 5  ;;  %s4131_s29 = smov (%p39_p5, %s4129_s29), 0 }
   0xf   : > { %4110 = sst [smem:[#allocation12_spill]] %s4131_s29  ;;  %p3489_p9 = por %p199_p6, %p198_p4 }
  0x10   : > { %p270_p10 = pnand %p2736_p7, %p269_p8  ;;  %s177_s7 = ssub.s32 %s3357_s24, %s4131_s29 }
  0x11   : > { %s4111_s6 = scalar_select %p3489_p9, 1, 0 }
  0x12   : > { %s182_s8 = sadd.s32 1, %s3341_s20  ;;  %p180_p11 = scmp.eq.s32.totalorder %s177_s7, 0 }
  0x13   : > { %4112 = sst [smem:[#allocation13_spill]] %s4111_s6  ;;  %273 = sbr.rel (%p270_p10) target bundleno = 4256 (0x10a0), region = 40 }
  0x14   : > { %s3497_s9 = scalar_select %p180_p11, %s3341_s20, %s182_s8  }
  0x15   : > { %s4100_s10 = sand.u32 (!%p270_p10), 1, %s3337_s19   ;;  %p323_p12 = scmp.lt.s32.totalorder (!%p270_p10), %s3349_s22, 1 }
  0x16   : > { %4113 = sst [smem:[#allocation14_spill]] %s3497_s9  ;;  %s2737_s11 = sshll.u32 (!%p270_p10), %s4100_s10, 4 }
  0x17   : > { %p332_p13 = scmp.lt.s32.totalorder (!%p270_p10), %s3345_s21, 0  ;;  %s3519_s6 = scalar_lea.vmem (!%p270_p10), [#allocation5], %s2737_s11 }
  0x18   : > { %p2750_p1 = scmp.ne.s32.totalorder (!%p270_p10), %s3345_s21, 0 }
  0x1a   : > { %s324_s12 = scalar_select %p323_p12, %s3349_s22, 1 }
  0x1b   : > { %s333_s13 = scalar_select %p332_p13, %s3345_s21, 0 }
  0x1c   : > { %s2806_s14 = sshll.u32 %s324_s12, 4  ;;  %s2749_s27 = sshll.u32 %s324_s12, 3  ;;  %vm364_vm0 = vcmask (!%p2750_p1), 31744   ;;  %vm369_vm1 = vcmask (!%p2750_p1), 261120   ;;  %v3363_v0 = vmov (!%p2750_p1), -inf   ;;  %v3364_v1 = vmov (!%p2750_p1), 0.0  }
  0x1d   : > { %s3509_s17 = scalar_lea.vmem %s4093_s0, %s2806_s14  ;;  %s2740_s26 = sshll.u32 %s333_s13, 1  ;;  %365 = vst.msk [vmem:[#allocation2] sm:$0xff] (!%p2750_p1), %vm364_vm0, %v3363_v0  ;;  %366 = vst.msk [vmem:[#allocation2 + $0x8] sm:$0xff] (!%p2750_p1), %vm364_vm0, %v3363_v0 }
  0x1e   : > { %p337_p0 = scmp.lt.s32.totalorder %s2740_s26, 1  ;;  %s2741_s7 = sshll.u32 %s324_s12, 1  ;;  %367 = vst.msk [vmem:[#allocation3] sm:$0xff] (!%p2750_p1), %vm364_vm0, %v3364_v1  ;;  %368 = vst.msk [vmem:[#allocation3 + $0x8] sm:$0xff] (!%p2750_p1), %vm364_vm0, %v3364_v1 }
  0x1f   : > { %s3514_s28 = scalar_lea.vmem %s4095_s2, %s2749_s27  ;;  %363 = sbr.rel (%p2750_p1) target bundleno = 38 (0x26), region = 44  ;;  %370 = vst.msk [vmem:[#allocation4] sm:$0xff] (!%p2750_p1), %vm369_vm1, %v3364_v1  ;;  %371 = vst.msk [vmem:[#allocation4 + $0x8] sm:$0xff] (!%p2750_p1), %vm369_vm1, %v3364_v1 }
  0x20   : > { %s4133_s26 = smov (!%p337_p0, %s2740_s26), 1 }
  0x21   : > { %s340_s10 = sadd.s32 %s2741_s7, %s4133_s26 }
  0x22   : > { %s2742_s24 = sshll.u32 %s340_s10, 3 }
  0x23   : > { %s342_s20 = scalar_lea.vmem %s4094_s1, %s2742_s24 }
  0x26 PF: > { %p2751_p2 = scmp.ge.s32.totalorder %s3345_s21, 1 }
  0x27   : > { %v378_v2 = vld [vmem:[%s342_s20] sm:$0xff] (!%p2751_p2)  ;;  %v379_v3 = vld [vmem:[%s342_s20 + $0x8] sm:$0xff] (!%p2751_p2)  ;;  %vm380_vm2 = vcmask (!%p2751_p2), 64512   ;;  %vm470_vm4 = vcmask (!%p2751_p2), 130048   ;;  %v3365_v13 = vmov (!%p2751_p2), 0   ;;  %s3366_s20 = smov (!%p2751_p2), 96  }
  0x28   : > { %375 = sbr.rel (%p2751_p2) target bundleno = 2418 (0x972), region = 48  ;;  %v3524_v4 = vld [vmem:[%s3509_s17] sm:$0xff] (!%p2751_p2)  ;;  %vm3528_vm3 = vmpackc.low (!%p2751_p2), %vm380_vm2, %vm380_vm2  ;;  %v3532_v6 = vpack.i.bf16 (!%p2751_p2), %v379_v3, %v378_v2  ;;  %v2977_v7 = vpack.c.bf16 (!%p2751_p2), %v379_v3, %v378_v2  ;;  %v3541_v8 = vld [vmem:[%s3509_s17 + $0x8] sm:$0xff] (!%p2751_p2)  ;;  %3132 = vset.pattern.permute.xlu1 (!%p2751_p2), %v3365_v13  ;;  %vm513_vm5 = vcmask (!%p2751_p2), 7168   ;;  %s3367_s23 = smov (!%p2751_p2), 120   ;;  %v3368_v46 = vmov (!%p2751_p2), 1  }
  0x29   : > { %2874 = vmatprep.mubr.msk.f32.mxu0 (!%p2751_p2), %vm380_vm2, %v3524_v4  ;;  %v3549_v14 = vld [vmem:[#allocation2] sm:$0xff] (!%p2751_p2)  ;;  %v3554_v17 = vld [vmem:[#allocation2 + $0x8] sm:$0xff] (!%p2751_p2)  ;;  %3144 = vset.pattern.permute.xlu0 (!%p2751_p2), %v3368_v46  ;;  %vm766_vm6 = vcmask (!%p2751_p2), 15368   ;;  %s3369_s24 = smov (!%p2751_p2), 88   ;;  %s3370_s29 = smov (!%p2751_p2), 112   ;;  %vm1028_vm7 = vcmask (!%p2751_p2), 23568  }
  0x2a   : > { %2979 = vmatprep.subr.msk.bf16.mxu0 (!%p2751_p2), %vm3528_vm3, %v2977_v7  ;;  %s3372_s9 = smov (!%p2751_p2), 80   ;;  %s3373_s10 = smov (!%p2751_p2), 104   ;;  %v3374_v5 = vmov (!%p2751_p2), 3   ;;  %vm1290_vm8 = vcmask (!%p2751_p2), 31768   ;;  %vm880_vm9 = vcmask (!%p2751_p2), 130112   ;;  %vm1142_vm10 = vcmask (!%p2751_p2), 195712  }
  0x2b   : > { %2982 = vmatpush3.bf16.xpose.msk.msra.mxu0 (!%p2751_p2), %vm3528_vm3, %v2977_v7  ;;  %s3375_s11 = smov (!%p2751_p2), 72   ;;  %s3376_s12 = smov (!%p2751_p2), 8   ;;  %vm1404_vm11 = vcmask (!%p2751_p2), 261312  }
  0x2c   : > { %s3377_s13 = smov (!%p2751_p2), 16   ;;  %s3378_s14 = smov (!%p2751_p2), 24  }
  0x32   : > { %2875 = vmatmul.mubr.msk.f32.vlgmr.msra.gmra.mrb[0].mxu0 %vm380_vm2, %v3541_v8 }
 0x105   : > { %v2876_v9 = vpop.f32.mrb[0].mxu0 }
 0x106   : > { %v459_v10 = vpop.f32.mrb[1].mxu0  ;;  %v474_v12 = vsel %vm470_vm4, %v2876_v9, -inf }
 0x107   : > { %v471_v11 = vsel %vm470_vm4, %v459_v10, -inf }
 0x108   : > { %472 = vmax.xlane.f32.xlu0 %v471_v11 }
 0x10c   : > { %475 = vmax.xlane.f32.xlu0 %v474_v12 }
 0x122   : > { %3134 = vrot.lane.b32.xlu0 %v3532_v6, %s3366_s20 }
 0x195   : > { %v473_v15 = vpop.xlane.xlu0 %472 }
 0x196   : > { %v3552_v16 = vmax.f32 %v3549_v14, %v473_v15 }
 0x198   : > { %v479_v18 = vsub.f32 %v3549_v14, %v3552_v16  ;;  %621 = vst.msk [vmem:[#allocation2] sm:$0xff] %vm513_vm5, %v3552_v16  ;;  %487 = vperm.xlu1 %3132, %v3552_v16  }
 0x199   : > { %v476_v19 = vpop.xlane.xlu0 %475 }
 0x19a   : > { %v3562_v20 = vmax.f32 %v3554_v17, %v476_v19 }
 0x19c   : > { %v480_v21 = vsub.f32 %v3554_v17, %v3562_v20  ;;  %622 = vst.msk [vmem:[#allocation2 + $0x8] sm:$0xff] %vm513_vm5, %v3562_v20  ;;  %492 = vperm.xlu1 %3132, %v3562_v20  }
 0x19d   : > { %v3135_v22 = vpop.permute.xlu0 %3134 }
 0x19e   : > { %v3137_v23 = vunpack.i.h.bf16 %v3135_v22  ;;  %v3136_v24 = vunpack.i.l.bf16 %v3135_v22 }
 0x19f   : > { %v3599_v50 = vld [vmem:[#allocation2] sm:$0xff] }
 0x1a0   : > { %3139 = vrot.lane.b32.xlu1 %v3532_v6, %s3367_s23  ;;  %v2983_v25 = vpack.c.bf16 %v3137_v23, %v3136_v24 }
 0x1a1   : > { %3143 = vset.pattern.permute.xlu1 %v3368_v46 }
 0x1a2   : > { %2984 = vmatprep.subr.bf16.mxu1 %v2983_v25 }
 0x1a3   : > { %2986 = vmatpush3.bf16.msra.mxu1 %v2983_v25  ;;  %v3594_v47 = vld [vmem:[#allocation2 + $0x8] sm:$0xff] }
 0x1a4   : > { %629 = vrot.lane.b32.xlu1 %v3524_v4, %s3367_s23 }
 0x1a8   : > { %631 = vrot.lane.b32.xlu1 %v3541_v8, %s3367_s23 }
 0x217   : > { %v488_v26 = vpop.permute.xlu1 %487 }
 0x218   : > { %v495_v27 = vsub.f32 %v459_v10, %v488_v26  ;;  %v3371_v26 = vmov 2  }
 0x21a   : > { %v497_v28 = vmul.f32 1.442695, %v495_v27 }
 0x21b   : > { %v493_v29 = vpop.permute.xlu1 %492 }
 0x21c   : > { %3181 = vpow2.f32 %v497_v28  ;;  %v496_v30 = vsub.f32 %v2876_v9, %v493_v29 }
 0x21e   : > { %v499_v31 = vmul.f32 1.442695, %v496_v30 }
 0x21f   : > { %v3140_v32 = vpop.permute.xlu1 %3139 }
 0x220   : > { %3183 = vpow2.f32 %v499_v31  ;;  %v3142_v33 = vunpack.i.h.bf16 %v3140_v32  ;;  %v3141_v34 = vunpack.i.l.bf16 %v3140_v32 }
 0x222   : > { %v2987_v35 = vpack.c.bf16 %v3142_v33, %v3141_v34 }
 0x223   : > { %v630_v37 = vpop.permute.xlu1 %629 }
 0x224   : > { %2989 = vmatprep.subr.msk.bf16.mxu1 %vm3528_vm3, %v2987_v35 }
 0x226   : > { %v3574_v36 = vpop.eup %3181 }
 0x227   : > { %2881 = vmatprep.mubr.msk.f32.mxu1 %vm470_vm4, %v3574_v36  ;;  %v632_v39 = vpop.permute.xlu1 %631 }
 0x22a   : > { %v3578_v38 = vpop.eup %3183 }
 0x22b   : > { %2882 = vmatmul.mubr.msk.f32.vlgmr.msra.gmra.mrb[0].mxu1 %vm470_vm4, %v3578_v38 }
 0x22c   : > { %2992 = vmatpush3.bf16.xpose.msk.msra.mxu1 %vm3528_vm3, %v2987_v35  ;;  %2888 = vmatprep.mubr.msk.f32.mxu1 %vm380_vm2, %v630_v37 }
 0x233   : > { %2889 = vmatmul.mubr.msk.f32.vlgmr.msra.gmra.mrb[2].mxu1 %vm380_vm2, %v632_v39 }
 0x2fe   : > { %v3586_v40 = vpop.f32.mrb[0].mxu1 }
 0x2ff   : > { %v3588_v41 = vpop.f32.mrb[1].mxu1 }
 0x306   : > { %v2890_v42 = vpop.f32.mrb[2].mxu1 }
 0x307   : > { %v713_v43 = vpop.f32.mrb[3].mxu1  ;;  %v727_v44 = vsel %vm470_vm4, %v2890_v42, -inf }
 0x308   : > { %728 = vmax.xlane.f32.xlu0 %v727_v44  ;;  %v724_v45 = vsel %vm470_vm4, %v713_v43, -inf }
 0x309   : > { %725 = vmax.xlane.f32.xlu1 %v724_v45 }
 0x395   : > { %v729_v48 = vpop.xlane.xlu0 %728 }
 0x396   : > { %v3597_v49 = vmax.f32 %v3594_v47, %v729_v48  ;;  %v726_v51 = vpop.xlane.xlu1 %725 }
 0x397   : > { %v3602_v52 = vmax.f32 %v3599_v50, %v726_v51 }
 0x398   : > { %v733_v53 = vsub.f32 %v3594_v47, %v3597_v49  ;;  %884 = vst.msk [vmem:[#allocation2 + $0x8] sm:$0xff] %vm766_vm6, %v3597_v49  ;;  %745 = vperm.xlu0 %3144, %v3597_v49  }
 0x399   : > { %v732_v54 = vsub.f32 %v3599_v50, %v3602_v52  ;;  %883 = vst.msk [vmem:[#allocation2] sm:$0xff] %vm766_vm6, %v3602_v52  ;;  %740 = vperm.xlu1 %3143, %v3602_v52  }
 0x39a   : > { %v736_v20 = vmul.f32 1.442695, %v733_v53  ;;  %v603_v53 = vld [vmem:[#allocation4] sm:$0xff] }
 0x39c   : > { %3156 = vset.pattern.permute.xlu0 %v3371_v26 }
 0x39d   : > { %3146 = vrot.lane.b32.xlu1 %v3532_v6, %s3369_s24 }
 0x39e   : > { %3155 = vset.pattern.permute.xlu1 %v3371_v26 }
 0x39f   : > { %v3640_v27 = vld [vmem:[#allocation2 + $0x8] sm:$0xff] }
 0x3a0   : > { %v3645_v31 = vld [vmem:[#allocation2] sm:$0xff] }
 0x3a1   : > { %3151 = vrot.lane.b32.xlu1 %v3532_v6, %s3370_s29 }
 0x3a5   : > { %891 = vrot.lane.b32.xlu1 %v3524_v4, %s3370_s29 }
 0x3a9   : > { %893 = vrot.lane.b32.xlu1 %v3541_v8, %s3370_s29 }
 0x417   : > { %v746_v55 = vpop.permute.xlu0 %745 }
 0x418   : > { %v749_v56 = vsub.f32 %v2890_v42, %v746_v55  ;;  %v741_v57 = vpop.permute.xlu1 %740 }
 0x419   : > { %v748_v58 = vsub.f32 %v713_v43, %v741_v57 }
 0x41a   : > { %v752_v59 = vmul.f32 1.442695, %v749_v56 }
 0x41b   : > { %v750_v60 = vmul.f32 1.442695, %v748_v58 }
 0x41c   : > { %v3147_v61 = vpop.permute.xlu1 %3146 }
 0x41d   : > { %3185 = vpow2.f32 %v750_v60  ;;  %v3149_v62 = vunpack.i.h.bf16 %v3147_v61  ;;  %v3148_v63 = vunpack.i.l.bf16 %v3147_v61 }
 0x41e   : > { %3187 = vpow2.f32 %v752_v59 }
 0x41f   : > { %v2993_v0 = vpack.c.bf16 %v3149_v62, %v3148_v63 }
 0x420   : > { %v3152_v1 = vpop.permute.xlu1 %3151 }
 0x421   : > { %2994 = vmatprep.subr.bf16.mxu0 %v2993_v0  ;;  %v3154_v2 = vunpack.i.h.bf16 %v3152_v1  ;;  %v3153_v3 = vunpack.i.l.bf16 %v3152_v1 }
 0x422   : > { %2996 = vmatpush3.bf16.msra.mxu0 %v2993_v0 }
 0x423   : > { %v2997_v7 = vpack.c.bf16 %v3154_v2, %v3153_v3 }
 0x424   : > { %v892_v10 = vpop.permute.xlu1 %891 }
 0x425   : > { %2999 = vmatprep.subr.msk.bf16.mxu0 %vm3528_vm3, %v2997_v7 }
 0x427   : > { %v3620_v9 = vpop.eup %3185 }
 0x428   : > { %v3622_v11 = vpop.eup %3187  ;;  %2895 = vmatprep.mubr.msk.f32.mxu0 %vm470_vm4, %v3620_v9  ;;  %v894_v12 = vpop.permute.xlu1 %893 }
 0x429   : > { %2896 = vmatmul.mubr.msk.f32.vlgmr.msra.gmra.mrb[2].mxu0 %vm470_vm4, %v3622_v11  ;;  %v761_v17 = vsel %vm470_vm4, %v3622_v11, 0.0 }
 0x42a   : > { %2902 = vmatprep.mubr.msk.f32.mxu0 %vm380_vm2, %v892_v10 }
 0x42b   : > { %3002 = vmatpush3.bf16.xpose.msk.msra.mxu0 %vm3528_vm3, %v2997_v7  ;;  %v481_v7 = vmul.f32 1.442695, %v479_v18  ;;  %v758_v18 = vsel %vm470_vm4, %v3620_v9, 0.0 }
 0x432   : > { %2903 = vmatmul.mubr.msk.f32.vlgmr.msra.gmra.mrb[4].mxu0 %vm380_vm2, %v894_v12 }
 0x4fc   : > { %v3632_v15 = vpop.f32.mrb[2].mxu0 }
 0x4fd   : > { %v3634_v19 = vpop.f32.mrb[3].mxu0 }
 0x505   : > { %v2904_v22 = vpop.f32.mrb[4].mxu0 }
 0x506   : > { %v975_v23 = vpop.f32.mrb[5].mxu0  ;;  %v989_v24 = vsel %vm470_vm4, %v2904_v22, -inf }
 0x507   : > { %990 = vmax.xlane.f32.xlu0 %v989_v24  ;;  %v986_v25 = vsel %vm470_vm4, %v975_v23, -inf }
 0x508   : > { %987 = vmax.xlane.f32.xlu1 %v986_v25 }
 0x594   : > { %v991_v28 = vpop.xlane.xlu0 %990 }
 0x595   : > { %v3643_v29 = vmax.f32 %v3640_v27, %v991_v28  ;;  %v988_v30 = vpop.xlane.xlu1 %987 }
 0x596   : > { %v3648_v32 = vmax.f32 %v3645_v31, %v988_v30  ;;  %v505_v30 = vsel %vm470_vm4, %v3574_v36, 0.0 }
 0x597   : > { %v995_v33 = vsub.f32 %v3640_v27, %v3643_v29  ;;  %1146 = vst.msk [vmem:[#allocation2 + $0x8] sm:$0xff] %vm1028_vm7, %v3643_v29  ;;  %1007 = vperm.xlu0 %3156, %v3643_v29   ;;  %v501_v27 = vld [vmem:[#allocation3] sm:$0xff] }
 0x598   : > { %v994_v34 = vsub.f32 %v3645_v31, %v3648_v32  ;;  %1145 = vst.msk [vmem:[#allocation2] sm:$0xff] %vm1028_vm7, %v3648_v32  ;;  %1002 = vperm.xlu1 %3155, %v3648_v32  }
 0x59b   : > { %3168 = vset.pattern.permute.xlu0 %v3374_v5 }
 0x59c   : > { %3158 = vrot.lane.b32.xlu1 %v3532_v6, %s3372_s9 }
 0x59d   : > { %3167 = vset.pattern.permute.xlu1 %v3374_v5 }
 0x59e   : > { %v3690_v10 = vld [vmem:[#allocation2 + $0x8] sm:$0xff] }
 0x59f   : > { %v3695_v24 = vld [vmem:[#allocation2] sm:$0xff] }
 0x5a0   : > { %3163 = vrot.lane.b32.xlu1 %v3532_v6, %s3373_s10 }
 0x5a4   : > { %1153 = vrot.lane.b32.xlu1 %v3524_v4, %s3373_s10 }
 0x5a8   : > { %1155 = vrot.lane.b32.xlu1 %v3541_v8, %s3373_s10 }
 0x616   : > { %v1008_v35 = vpop.permute.xlu0 %1007 }
 0x617   : > { %v1011_v37 = vsub.f32 %v2904_v22, %v1008_v35  ;;  %v1003_v39 = vpop.permute.xlu1 %1002  ;;  %v734_v35 = vmul.f32 1.442695, %v732_v54 }
 0x618   : > { %v1010_v42 = vsub.f32 %v975_v23, %v1003_v39 }
 0x619   : > { %v1014_v43 = vmul.f32 1.442695, %v1011_v37  ;;  %v508_v37 = vsel %vm470_vm4, %v3578_v38, 0.0 }
 0x61a   : > { %v1012_v44 = vmul.f32 1.442695, %v1010_v42 }
 0x61b   : > { %v3159_v45 = vpop.permute.xlu1 %3158 }
 0x61c   : > { %3189 = vpow2.f32 %v1012_v44  ;;  %v3161_v48 = vunpack.i.h.bf16 %v3159_v45  ;;  %v3160_v51 = vunpack.i.l.bf16 %v3159_v45 }
 0x61d   : > { %3191 = vpow2.f32 %v1014_v43 }
 0x61e   : > { %v3003_v55 = vpack.c.bf16 %v3161_v48, %v3160_v51  ;;  %3193 = vpow2.f32 %v481_v7 }
 0x61f   : > { %v3164_v56 = vpop.permute.xlu1 %3163  ;;  %3195 = vpow2.f32 %v734_v35 }
 0x620   : > { %3004 = vmatprep.subr.bf16.mxu1 %v3003_v55  ;;  %v3166_v57 = vunpack.i.h.bf16 %v3164_v56  ;;  %v3165_v58 = vunpack.i.l.bf16 %v3164_v56 }
 0x621   : > { %3006 = vmatpush3.bf16.msra.mxu1 %v3003_v55  ;;  %v998_v55 = vmul.f32 1.442695, %v995_v33  ;;  %v502_v33 = vld [vmem:[#allocation3 + $0x8] sm:$0xff] }
 0x622   : > { %v3007_v4 = vpack.c.bf16 %v3166_v57, %v3165_v58 }
 0x623   : > { %v1154_v59 = vpop.permute.xlu1 %1153 }
 0x624   : > { %3009 = vmatprep.subr.msk.bf16.mxu1 %vm3528_vm3, %v3007_v4 }
 0x626   : > { %v3666_v8 = vpop.eup %3189 }
 0x627   : > { %v3192_v60 = vpop.eup %3191  ;;  %2909 = vmatprep.mubr.msk.f32.mxu1 %vm470_vm4, %v3666_v8  ;;  %v1156_v61 = vpop.permute.xlu1 %1155  ;;  %v1020_v51 = vsel %vm470_vm4, %v3666_v8, 0.0 }
 0x628   : > { %2910 = vmatmul.mubr.msk.f32.vlgmr.msra.gmra.mrb[4].mxu1 %vm470_vm4, %v3192_v60  ;;  %v3710_v16 = vpop.eup %3193  ;;  %v1023_v38 = vsel %vm470_vm4, %v3192_v60, 0.0 }
 0x629   : > { %2916 = vmatprep.mubr.msk.f32.mxu1 %vm380_vm2, %v1154_v59 }
 0x62a   : > { %3012 = vmatpush3.bf16.xpose.msk.msra.mxu1 %vm3528_vm3, %v3007_v4 }
 0x631   : > { %2917 = vmatmul.mubr.msk.f32.vlgmr.msra.gmra.mrb[6].mxu1 %vm380_vm2, %v1156_v61  ;;  %v604_v61 = vld [vmem:[#allocation4 + $0x8] sm:$0xff] }
 0x6fb   : > { %v3675_v62 = vpop.f32.mrb[4].mxu1 }
 0x6fc   : > { %v1109_v63 = vpop.f32.mrb[5].mxu1 }
 0x704   : > { %v3677_v0 = vpop.f32.mrb[6].mxu1 }
 0x705   : > { %v3679_v1 = vpop.f32.mrb[7].mxu1  ;;  %v1251_v2 = vsel %vm470_vm4, %v3677_v0, -inf }
 0x706   : > { %1252 = vmax.xlane.f32.xlu0 %v1251_v2  ;;  %v1248_v3 = vsel %vm470_vm4, %v3679_v1, -inf }
 0x707   : > { %1249 = vmax.xlane.f32.xlu1 %v1248_v3 }
 0x793   : > { %v1253_v12 = vpop.xlane.xlu0 %1252 }
 0x794   : > { %v3693_v22 = vmax.f32 %v3690_v10, %v1253_v12  ;;  %v1250_v23 = vpop.xlane.xlu1 %1249 }
 0x795   : > { %v3698_v25 = vmax.f32 %v3695_v24, %v1250_v23 }
 0x796   : > { %v1257_v28 = vsub.f32 %v3690_v10, %v3693_v22  ;;  %1408 = vst.msk [vmem:[#allocation2 + $0x8] sm:$0xff] %vm1290_vm8, %v3693_v22  ;;  %1269 = vperm.xlu0 %3168, %v3693_v22  }
 0x797   : > { %v1256_v14 = vsub.f32 %v3695_v24, %v3698_v25  ;;  %1407 = vst.msk [vmem:[#allocation2] sm:$0xff] %vm1290_vm8, %v3698_v25  ;;  %1264 = vperm.xlu1 %3167, %v3698_v25  }
 0x798   : > { %v1260_v56 = vmul.f32 1.442695, %v1257_v28 }
 0x799   : > { %v1258_v31 = vmul.f32 1.442695, %v1256_v14 }
 0x79a   : > { %3174 = vset.pattern.permute.xlu0 %v3365_v13 }
 0x79b   : > { %607 = vperm.xlu0 %3174, %v3710_v16   ;;  %3170 = vrot.lane.b32.xlu1 %v3532_v6, %s3375_s11  ;;  %v483_v6 = vmul.f32 1.442695, %v480_v21 }
 0x79c   : > { %3175 = vset.pattern.permute.xlu1 %v3365_v13  ;;  %v3729_v13 = vpop.eup %3195 }
 0x79d   : > { %3197 = vpow2.f32 %v483_v6 }
 0x79e   : > { %3199 = vpow2.f32 %v736_v20 }
 0x79f   : > { %3176 = vset.pattern.permute.xlu0 %v3368_v46 }
 0x7a7   : > { %v3732_v36 = vpop.eup %3197 }
 0x7a8   : > { %v3745_v21 = vpop.eup %3199  ;;  %v504_v4 = vmul.f32 %v3732_v36, %v502_v33 }
 0x7ba   : > { %759 = vadd.xlane.f32.xlu0 %v758_v18 }
 0x7bf   : > { %506 = vadd.xlane.f32.xlu1 %v505_v30 }
 0x7c3   : > { %509 = vadd.xlane.f32.xlu1 %v508_v37 }
 0x7d0   : > { %860 = vperm.xlu0 %3176, %v3729_v13  }
 0x7d4   : > { %612 = vperm.xlu1 %3175, %v3732_v36   ;;  %3180 = vset.pattern.permute.xlu0 %v3374_v5 }
 0x7d8   : > { %3177 = vset.pattern.permute.xlu1 %v3368_v46 }
 0x7ef   : > { %1024 = vadd.xlane.f32.xlu0 %v1023_v38 }
 0x7f8   : > { %762 = vadd.xlane.f32.xlu1 %v761_v17 }
 0x805   : > { %874 = vrot.lane.b32.xlu0 %v3632_v15, %s3376_s12 }
 0x809   : > { %865 = vperm.xlu1 %3177, %v3745_v21   ;;  %1134 = vrot.lane.b32.xlu0 %v1109_v63, %s3377_s13 }
 0x80d   : > { %3178 = vset.pattern.permute.xlu1 %v3371_v26 }
 0x815   : > { %v1270_v46 = vpop.permute.xlu0 %1269 }
 0x816   : > { %v1273_v50 = vsub.f32 %v3677_v0, %v1270_v46  ;;  %v1265_v52 = vpop.permute.xlu1 %1264 }
 0x817   : > { %v1272_v47 = vsub.f32 %v3679_v1, %v1265_v52 }
 0x818   : > { %v1276_v49 = vmul.f32 1.442695, %v1273_v50 }
 0x819   : > { %v1274_v54 = vmul.f32 1.442695, %v1272_v47 }
 0x81a   : > { %3201 = vpow2.f32 %v1276_v49  ;;  %v608_v9 = vpop.permute.xlu0 %607  ;;  %v3171_v11 = vpop.permute.xlu1 %3170 }
 0x81b   : > { %3203 = vpow2.f32 %v1274_v54  ;;  %v615_v15 = vmul.f32 %v608_v9, %v603_v53  ;;  %v3173_v39 = vunpack.i.h.bf16 %v3171_v11  ;;  %v3172_v42 = vunpack.i.l.bf16 %v3171_v11 }
 0x81d   : > { %v617_v43 = vadd.f32 %v615_v15, %v3588_v41  ;;  %v3013_v44 = vpack.c.bf16 %v3173_v39, %v3172_v42  ;;  %v996_v41 = vmul.f32 1.442695, %v994_v34 }
 0x81f   : > { %619 = vst.msk [vmem:[#allocation4] sm:$0xff] %vm380_vm2, %v617_v43  ;;  %3014 = vmatprep.subr.bf16.mxu0 %v3013_v44  ;;  %3205 = vpow2.f32 %v996_v41 }
 0x820   : > { %3016 = vmatpush3.bf16.msra.mxu0 %v3013_v44  ;;  %3207 = vpow2.f32 %v998_v55 }
 0x821   : > { %3209 = vpow2.f32 %v1260_v56 }
 0x822   : > { %3211 = vpow2.f32 %v1258_v31 }
 0x824   : > { %v3202_v26 = vpop.eup %3201 }
 0x825   : > { %v3204_v45 = vpop.eup %3203  ;;  %v1285_v48 = vsel %vm470_vm4, %v3202_v26, 0.0 }
 0x826   : > { %2923 = vmatprep.mubr.msk.f32.mxu0 %vm470_vm4, %v3204_v45  ;;  %v1282_v7 = vsel %vm470_vm4, %v3204_v45, 0.0  ;;  %v856_v52 = vld [vmem:[#allocation4] sm:$0xff] }
 0x827   : > { %2924 = vmatmul.mubr.msk.f32.vlgmr.msra.gmra.mrb[6].mxu0 %vm470_vm4, %v3202_v26 }
 0x828   : > { %1286 = vadd.xlane.f32.xlu0 %v1285_v48 }
 0x829   : > { %v3206_v57 = vpop.eup %3205 }
 0x82a   : > { %v3208_v32 = vpop.eup %3207 }
 0x82b   : > { %v3210_v34 = vpop.eup %3209 }
 0x82c   : > { %v3779_v59 = vpop.eup %3211 }
 0x82d   : > { %1021 = vadd.xlane.f32.xlu1 %v1020_v51 }
 0x83e   : > { %872 = vrot.lane.b32.xlu1 %v3634_v19, %s3376_s12  ;;  %v503_v19 = vmul.f32 %v3710_v16, %v501_v27 }
 0x842   : > { %1122 = vperm.xlu1 %3178, %v3206_v57  }
 0x846   : > { %1127 = vperm.xlu1 %3178, %v3208_v32  }
 0x847   : > { %v760_v3 = vpop.xlane.xlu0 %759 }
 0x84a   : > { %1136 = vrot.lane.b32.xlu1 %v3675_v62, %s3377_s13 }
 0x84b   : > { %3179 = vset.pattern.permute.xlu1 %v3374_v5 }
 0x84c   : > { %v507_v29 = vpop.xlane.xlu1 %506 }
 0x84d   : > { %v511_v58 = vadd.f32 %v507_v29, %v503_v19 }
 0x84e   : > { %1389 = vperm.xlu1 %3179, %v3210_v34  }
 0x84f   : > { %514 = vst.msk [vmem:[#allocation3] sm:$0xff] %vm513_vm5, %v511_v58  ;;  %v861_v10 = vpop.permute.xlu0 %860 }
 0x850   : > { %v510_v8 = vpop.xlane.xlu1 %509  ;;  %v868_v47 = vmul.f32 %v861_v10, %v856_v52 }
 0x851   : > { %v512_v60 = vadd.f32 %v510_v8, %v504_v4 }
 0x852   : > { %1384 = vperm.xlu1 %3179, %v3779_v59  }
 0x853   : > { %515 = vst.msk [vmem:[#allocation3 + $0x8] sm:$0xff] %vm513_vm5, %v512_v60 }
 0x854   : > { %v613_v62 = vpop.permute.xlu1 %612 }
 0x855   : > { %v616_v63 = vmul.f32 %v613_v62, %v604_v61 }
 0x856   : > { %v754_v0 = vld [vmem:[#allocation3] sm:$0xff] }
 0x857   : > { %v756_v1 = vmul.f32 %v3729_v13, %v754_v0  ;;  %v618_v2 = vadd.f32 %v3586_v40, %v616_v63 }
 0x859   : > { %v764_v5 = vadd.f32 %v760_v3, %v756_v1  ;;  %620 = vst.msk [vmem:[#allocation4 + $0x8] sm:$0xff] %vm380_vm2, %v618_v2 }
 0x85a   : > { %v755_v12 = vld [vmem:[#allocation3 + $0x8] sm:$0xff] }
 0x85b   : > { %767 = vst.msk [vmem:[#allocation3] sm:$0xff] %vm766_vm6, %v764_v5  ;;  %v757_v22 = vmul.f32 %v3745_v21, %v755_v12 }
 0x860   : > { %v857_v28 = vld [vmem:[#allocation4 + $0x8] sm:$0xff] }
 0x862   : > { %v1016_v20 = vld [vmem:[#allocation3] sm:$0xff] }
 0x863   : > { %v1018_v21 = vmul.f32 %v3206_v57, %v1016_v20 }
 0x876   : > { %1283 = vadd.xlane.f32.xlu1 %v1282_v7 }
 0x87c   : > { %v1025_v23 = vpop.xlane.xlu0 %1024 }
 0x880   : > { %v875_v16 = vpop.permute.xlu0 %874 }
 0x884   : > { %v1135_v6 = vpop.permute.xlu0 %1134 }
 0x885   : > { %v763_v24 = vpop.xlane.xlu1 %762 }
 0x886   : > { %v765_v25 = vadd.f32 %v763_v24, %v757_v22 }
 0x888   : > { %768 = vst.msk [vmem:[#allocation3 + $0x8] sm:$0xff] %vm766_vm6, %v765_v25 }
 0x889   : > { %v866_v40 = vpop.permute.xlu1 %865 }
 0x88a   : > { %v869_v14 = vmul.f32 %v866_v40, %v857_v28 }
 0x88c   : > { %v879_v18 = vadd.f32 %v875_v16, %v869_v14 }
 0x88e   : > { %882 = vst.msk [vmem:[#allocation4 + $0x8] sm:$0xff] %vm880_vm9, %v879_v18 }
 0x88f   : > { %v1017_v30 = vld [vmem:[#allocation3 + $0x8] sm:$0xff] }
 0x890   : > { %v1019_v35 = vmul.f32 %v3208_v32, %v1017_v30 }
 0x892   : > { %v1027_v37 = vadd.f32 %v1025_v23, %v1019_v35 }
 0x894   : > { %1030 = vst.msk [vmem:[#allocation3 + $0x8] sm:$0xff] %vm1028_vm7, %v1027_v37 }
 0x895   : > { %v1119_v15 = vld [vmem:[#allocation4 + $0x8] sm:$0xff] }
 0x89b   : > { %v1279_v13 = vld [vmem:[#allocation3 + $0x8] sm:$0xff] }
 0x89c   : > { %v1281_v36 = vmul.f32 %v3210_v34, %v1279_v13 }
 0x8b5   : > { %v1287_v38 = vpop.xlane.xlu0 %1286 }
 0x8b6   : > { %v1289_v17 = vadd.f32 %v1287_v38, %v1281_v36 }
 0x8b8   : > { %1292 = vst.msk [vmem:[#allocation3 + $0x8] sm:$0xff] %vm1290_vm8, %v1289_v17 }
 0x8ba   : > { %v1022_v46 = vpop.xlane.xlu1 %1021 }
 0x8bb   : > { %v1026_v50 = vadd.f32 %v1022_v46, %v1018_v21 }
 0x8bd   : > { %1029 = vst.msk [vmem:[#allocation3] sm:$0xff] %vm1028_vm7, %v1026_v50 }
 0x8be   : > { %v873_v49 = vpop.permute.xlu1 %872 }
 0x8bf   : > { %v878_v53 = vadd.f32 %v873_v49, %v868_v47 }
 0x8c1   : > { %881 = vst.msk [vmem:[#allocation4] sm:$0xff] %vm880_vm9, %v878_v53 }
 0x8c2   : > { %v1123_v54 = vpop.permute.xlu1 %1122 }
 0x8c4   : > { %v1278_v55 = vld [vmem:[#allocation3] sm:$0xff] }
 0x8c5   : > { %v1280_v56 = vmul.f32 %v3779_v59, %v1278_v55 }
 0x8c6   : > { %v1128_v9 = vpop.permute.xlu1 %1127 }
 0x8c7   : > { %v1131_v42 = vmul.f32 %v1128_v9, %v1119_v15 }
 0x8c8   : > { %v1118_v11 = vld [vmem:[#allocation4] sm:$0xff] }
 0x8c9   : > { %v1130_v39 = vmul.f32 %v1123_v54, %v1118_v11 }
 0x8ca   : > { %v1137_v43 = vpop.permute.xlu1 %1136 }
 0x8cb   : > { %v1140_v44 = vadd.f32 %v1135_v6, %v1130_v39  ;;  %v1141_v26 = vadd.f32 %v1137_v43, %v1131_v42 }
 0x8cd   : > { %1143 = vst.msk [vmem:[#allocation4] sm:$0xff] %vm1142_vm10, %v1140_v44  ;;  %1144 = vst.msk [vmem:[#allocation4 + $0x8] sm:$0xff] %vm1142_vm10, %v1141_v26 }
 0x8ce   : > { %v1390_v45 = vpop.permute.xlu1 %1389 }
 0x8d2   : > { %v1385_v41 = vpop.permute.xlu1 %1384 }
 0x8d4   : > { %v1381_v32 = vld [vmem:[#allocation4 + $0x8] sm:$0xff]  ;;  %v1380_v27 = vld [vmem:[#allocation4] sm:$0xff] }
 0x8d5   : > { %v1393_v19 = vmul.f32 %v1390_v45, %v1381_v32  ;;  %v1392_v29 = vmul.f32 %v1385_v41, %v1380_v27 }
 0x8fa   : > { %v2925_v48 = vpop.f32.mrb[6].mxu0 }
 0x8fb   : > { %v1371_v51 = vpop.f32.mrb[7].mxu0  ;;  %1398 = vrot.lane.b32.xlu1 %v2925_v48, %s3378_s14 }
 0x8fc   : > { %1396 = vrot.lane.b32.xlu0 %v1371_v51, %s3378_s14 }
 0x903   : > { %v1284_v57 = vpop.xlane.xlu1 %1283 }
 0x904   : > { %v1288_v31 = vadd.f32 %v1284_v57, %v1280_v56 }
 0x906   : > { %1291 = vst.msk [vmem:[#allocation3] sm:$0xff] %vm1290_vm8, %v1288_v31 }
 0x96d   : > { %v1399_v33 = vpop.permute.xlu1 %1398 }
 0x96e   : > { %v1403_v34 = vadd.f32 %v1399_v33, %v1393_v19  ;;  %v1397_v58 = vpop.permute.xlu0 %1396 }
 0x96f   : > { %v1402_v4 = vadd.f32 %v1397_v58, %v1392_v29 }
 0x970   : > { %1406 = vst.msk [vmem:[#allocation4 + $0x8] sm:$0xff] %vm1404_vm11, %v1403_v34 }
 0x971   : > { %1405 = vst.msk [vmem:[#allocation4] sm:$0xff] %vm1404_vm11, %v1402_v4 }
 0x972 PF: > { %p2776_p4 = scmp.lt.s32.totalorder %s3345_s21, 1 }
 0x973   : > { %v3799_v8 = vld [vmem:[%s3514_s28] sm:$0xff] (!%p2776_p4)  ;;  %vm1416_vm12 = vcmask (!%p2776_p4), 64512   ;;  %v1414_v60 = vld [vmem:[%s3509_s17 + $0x8] sm:$0xff] (!%p2776_p4)  ;;  %v3379_v1 = vmov (!%p2776_p4), 0   ;;  %s3380_s28 = smov (!%p2776_p4), 96   ;;  %s3381_s15 = smov (!%p2776_p4), 104  }
 0x974   : > { %1412 = sbr.rel (%p2776_p4) target bundleno = 3828 (0xef4), region = 52  ;;  %v1413_v59 = vld [vmem:[%s3509_s17] sm:$0xff] (!%p2776_p4)  ;;  %2926 = vmatprep.subr.msk.mxu0 (!%p2776_p4), %vm1416_vm12, %v3799_v8  ;;  %3213 = vset.pattern.permute.xlu1 (!%p2776_p4), %v3379_v1  ;;  %vm1545_vm13 = vcmask (!%p2776_p4), 7168   ;;  %v3819_v7 = vld [vmem:[#allocation2 + $0x8] sm:$0xff] (!%p2776_p4)  ;;  %s3382_s16 = smov (!%p2776_p4), 120   ;;  %v3384_v45 = vmov (!%p2776_p4), 1  }
 0x975   : > { %2928 = vmatprep.mubr.msk.f32.mxu0 (!%p2776_p4), %vm1416_vm12, %v1413_v59  ;;  %2927 = vmatpush3.xpose.msk.msra.mxu0 (!%p2776_p4), %vm1416_vm12, %v3799_v8  ;;  %v3814_v2 = vld [vmem:[#allocation2] sm:$0xff] (!%p2776_p4)  ;;  %s3383_s17 = smov (!%p2776_p4), 112   ;;  %vm1789_vm14 = vcmask (!%p2776_p4), 15368   ;;  %v3385_v27 = vmov (!%p2776_p4), 2   ;;  %s3386_s26 = smov (!%p2776_p4), 72   ;;  %vm2042_vm15 = vcmask (!%p2776_p4), 23568  }
 0x976   : > { %3214 = vset.pattern.permute.xlu0 (!%p2776_p4), %v3384_v45  ;;  %vm2295_vm0 = vcmask (!%p2776_p4), 31768   ;;  %s3387_s27 = smov (!%p2776_p4), 88   ;;  %s3389_s7 = smov (!%p2776_p4), 80   ;;  %vm1900_vm1 = vcmask (!%p2776_p4), 130112   ;;  %vm2153_vm2 = vcmask (!%p2776_p4), 195712   ;;  %vm2406_vm3 = vcmask (!%p2776_p4), 261312  }
 0x977   : > { %s3390_s8 = smov (!%p2776_p4), 8   ;;  %s3391_s20 = smov (!%p2776_p4), 16  }
 0x978   : > { %2929 = vmatmul.mubr.msk.f32.vlgmr.msra.gmra.mrb[0].mxu0 (!%p2776_p4), %vm1416_vm12, %v1414_v60  ;;  %s3392_s23 = smov (!%p2776_p4), 24  }
 0xa4b   : > { %v2930_v61 = vpop.f32.mrb[0].mxu0 }
 0xa4c   : > { %v1492_v62 = vpop.f32.mrb[1].mxu0  ;;  %v1506_v0 = vsel %vm1416_vm12, %v2930_v61, -inf }
 0xa4d   : > { %v1503_v63 = vsel %vm1416_vm12, %v1492_v62, -inf }
 0xa4e   : > { %1504 = vmax.xlane.f32.xlu0 %v1503_v63 }
 0xa52   : > { %1507 = vmax.xlane.f32.xlu0 %v1506_v0 }
 0xa68   : > { %1548 = vrot.lane.b32.xlu0 %v3799_v8, %s3380_s28 }
 0xa6c   : > { %2168 = vrot.lane.b32.xlu0 %v3799_v8, %s3381_s15 }
 0xa70   : > { %2165 = vrot.lane.b32.xlu0 %v1414_v60, %s3381_s15 }
 0xadb   : > { %v1505_v3 = vpop.xlane.xlu0 %1504 }
 0xadc   : > { %v3817_v5 = vmax.f32 %v3814_v2, %v1505_v3 }
 0xade   : > { %v1511_v10 = vsub.f32 %v3814_v2, %v3817_v5  ;;  %1650 = vst.msk [vmem:[#allocation2] sm:$0xff] %vm1545_vm13, %v3817_v5  ;;  %1519 = vperm.xlu1 %3213, %v3817_v5  }
 0xadf   : > { %v1508_v12 = vpop.xlane.xlu0 %1507 }
 0xae0   : > { %v3827_v22 = vmax.f32 %v3819_v7, %v1508_v12 }
 0xae2   : > { %v1512_v23 = vsub.f32 %v3819_v7, %v3827_v22  ;;  %1651 = vst.msk [vmem:[#allocation2 + $0x8] sm:$0xff] %vm1545_vm13, %v3827_v22  ;;  %1524 = vperm.xlu1 %3213, %v3827_v22  }
 0xae3   : > { %v1549_v24 = vpop.permute.xlu0 %1548 }
 0xae4   : > { %2931 = vmatprep.subr.mxu1 %v1549_v24 }
 0xae5   : > { %2932 = vmatpush3.msra.mxu1 %v1549_v24  ;;  %v3891_v55 = vld [vmem:[#allocation2] sm:$0xff]  ;;  %v3388_v24 = vmov 3  }
 0xae6   : > { %1662 = vrot.lane.b32.xlu1 %v3799_v8, %s3382_s16 }
 0xae7   : > { %v2169_v38 = vpop.permute.xlu0 %2168  ;;  %3215 = vset.pattern.permute.xlu1 %v3384_v45 }
 0xae9   : > { %v3886_v48 = vld [vmem:[#allocation2 + $0x8] sm:$0xff] }
 0xaea   : > { %1657 = vrot.lane.b32.xlu1 %v1413_v59, %s3382_s16 }
 0xaeb   : > { %v2166_v21 = vpop.permute.xlu0 %2165 }
 0xaee   : > { %1659 = vrot.lane.b32.xlu1 %v1414_v60, %s3382_s16 }
 0xaf2   : > { %1915 = vrot.lane.b32.xlu1 %v3799_v8, %s3383_s17 }
 0xaf6   : > { %1910 = vrot.lane.b32.xlu1 %v1413_v59, %s3383_s17 }
 0xafa   : > { %1912 = vrot.lane.b32.xlu1 %v1414_v60, %s3383_s17 }
 0xafe   : > { %2163 = vrot.lane.b32.xlu1 %v1413_v59, %s3381_s15 }
 0xb5d   : > { %v1520_v25 = vpop.permute.xlu1 %1519 }
 0xb5e   : > { %v1527_v28 = vsub.f32 %v1492_v62, %v1520_v25 }
 0xb60   : > { %v1529_v40 = vmul.f32 1.442695, %v1527_v28 }
 0xb61   : > { %v1525_v14 = vpop.permute.xlu1 %1524 }
 0xb62   : > { %3225 = vpow2.f32 %v1529_v40  ;;  %v1528_v16 = vsub.f32 %v2930_v61, %v1525_v14  ;;  %v1513_v40 = vmul.f32 1.442695, %v1511_v10 }
 0xb64   : > { %v1531_v18 = vmul.f32 1.442695, %v1528_v16 }
 0xb65   : > { %v1663_v30 = vpop.permute.xlu1 %1662 }
 0xb66   : > { %3227 = vpow2.f32 %v1531_v18  ;;  %2936 = vmatprep.subr.msk.mxu1 %vm1416_vm12, %v1663_v30 }
 0xb67   : > { %3229 = vpow2.f32 %v1513_v40 }
 0xb69   : > { %v1658_v35 = vpop.permute.xlu1 %1657 }
 0xb6c   : > { %v3837_v37 = vpop.eup %3225 }
 0xb6d   : > { %2933 = vmatprep.mubr.msk.f32.mxu1 %vm1416_vm12, %v3837_v37  ;;  %v1660_v6 = vpop.permute.xlu1 %1659 }
 0xb70   : > { %v3841_v13 = vpop.eup %3227 }
 0xb71   : > { %2934 = vmatmul.mubr.msk.f32.vlgmr.msra.gmra.mrb[0].mxu1 %vm1416_vm12, %v3841_v13  ;;  %v1916_v36 = vpop.permute.xlu1 %1915  ;;  %v1540_v28 = vsel %vm1416_vm12, %v3841_v13, 0.0  ;;  %v3934_v18 = vpop.eup %3229 }
 0xb72   : > { %2937 = vmatpush3.xpose.msk.msra.mxu1 %vm1416_vm12, %v1663_v30  ;;  %2938 = vmatprep.mubr.msk.f32.mxu1 %vm1416_vm12, %v1658_v35 }
 0xb73   : > { %2946 = vmatprep.subr.msk.mxu1 %vm1416_vm12, %v1916_v36 }
 0xb75   : > { %2939 = vmatmul.mubr.msk.f32.vlgmr.msra.gmra.mrb[2].mxu1 %vm1416_vm12, %v1660_v6  ;;  %v1911_v17 = vpop.permute.xlu1 %1910 }
 0xb76   : > { %2947 = vmatpush3.xpose.msk.msra.mxu1 %vm1416_vm12, %v1916_v36  ;;  %2948 = vmatprep.mubr.msk.f32.mxu1 %vm1416_vm12, %v1911_v17 }
 0xb77   : > { %2956 = vmatprep.subr.msk.mxu1 %vm1416_vm12, %v2169_v38 }
 0xb79   : > { %v1913_v20 = vpop.permute.xlu1 %1912 }
 0xb7a   : > { %2949 = vmatmul.mubr.msk.f32.vlgmr.msra.gmra.mrb[4].mxu1 %vm1416_vm12, %v1913_v20 }
 0xb7b   : > { %2957 = vmatpush3.xpose.msk.msra.mxu1 %vm1416_vm12, %v2169_v38 }
 0xb7d   : > { %v2164_v46 = vpop.permute.xlu1 %2163 }
 0xb7e   : > { %2958 = vmatprep.mubr.msk.f32.mxu1 %vm1416_vm12, %v2164_v46 }
 0xb7f   : > { %2959 = vmatmul.mubr.msk.f32.vlgmr.msra.gmra.mrb[6].mxu1 %vm1416_vm12, %v2166_v21 }
 0xc44   : > { %v3856_v50 = vpop.f32.mrb[0].mxu1 }
 0xc45   : > { %v3858_v52 = vpop.f32.mrb[1].mxu1 }
 0xc48   : > { %v3860_v47 = vpop.f32.mrb[2].mxu1 }
 0xc49   : > { %v3862_v49 = vpop.f32.mrb[3].mxu1  ;;  %v1750_v53 = vsel %vm1416_vm12, %v3860_v47, -inf }
 0xc4a   : > { %1751 = vmax.xlane.f32.xlu0 %v1750_v53  ;;  %v1747_v54 = vsel %vm1416_vm12, %v3862_v49, -inf }
 0xc4b   : > { %1748 = vmax.xlane.f32.xlu1 %v1747_v54 }
 0xc4d   : > { %v3868_v9 = vpop.f32.mrb[4].mxu1 }
 0xc4e   : > { %v3870_v11 = vpop.f32.mrb[5].mxu1  ;;  %v2003_v15 = vsel %vm1416_vm12, %v3868_v9, -inf }
 0xc4f   : > { %v2000_v39 = vsel %vm1416_vm12, %v3870_v11, -inf  ;;  %2004 = vmax.xlane.f32.xlu1 %v2003_v15 }
 0xc50   : > { %2001 = vmax.xlane.f32.xlu0 %v2000_v39 }
 0xc52   : > { %v3876_v42 = vpop.f32.mrb[6].mxu1 }
 0xc53   : > { %v3878_v43 = vpop.f32.mrb[7].mxu1  ;;  %v2256_v44 = vsel %vm1416_vm12, %v3876_v42, -inf }
 0xc54   : > { %2257 = vmax.xlane.f32.xlu1 %v2256_v44  ;;  %v2253_v26 = vsel %vm1416_vm12, %v3878_v43, -inf }
 0xc55   : > { %2254 = vmax.xlane.f32.xlu0 %v2253_v26 }
 0xcd7   : > { %v1752_v51 = vpop.xlane.xlu0 %1751 }
 0xcd8   : > { %v3889_v41 = vmax.f32 %v3886_v48, %v1752_v51  ;;  %v1749_v56 = vpop.xlane.xlu1 %1748 }
 0xcd9   : > { %v1753_v57 = vmax.f32 %v3891_v55, %v1749_v56 }
 0xcda   : > { %v1756_v31 = vsub.f32 %v3886_v48, %v3889_v41  ;;  %1904 = vst.msk [vmem:[#allocation2 + $0x8] sm:$0xff] %vm1789_vm14, %v3889_v41  ;;  %1768 = vperm.xlu1 %3215, %v3889_v41  }
 0xcdb   : > { %v1755_v32 = vsub.f32 %v3891_v55, %v1753_v57  ;;  %1903 = vst.msk [vmem:[#allocation2] sm:$0xff] %vm1789_vm14, %v1753_v57  ;;  %1763 = vperm.xlu0 %3214, %v1753_v57  }
 0xcdc   : > { %v2005_v19 = vpop.xlane.xlu1 %2004  ;;  %v1759_v5 = vmul.f32 1.442695, %v1756_v31 }
 0xcdd   : > { %v2002_v29 = vpop.xlane.xlu0 %2001  ;;  %v1757_v2 = vmul.f32 1.442695, %v1755_v32 }
 0xcde   : > { %3216 = vset.pattern.permute.xlu1 %v3385_v27 }
 0xcdf   : > { %2298 = vrot.lane.b32.xlu0 %v3799_v8, %s3386_s26 }
 0xce0   : > { %3218 = vset.pattern.permute.xlu0 %v3379_v1 }
 0xce1   : > { %v1999_v33 = vld [vmem:[#allocation2 + $0x8] sm:$0xff]  ;;  %v2258_v60 = vpop.xlane.xlu1 %2257 }
 0xce2   : > { %v2007_v34 = vmax.f32 %v1999_v33, %v2005_v19  ;;  %v1998_v58 = vld [vmem:[#allocation2] sm:$0xff]  ;;  %v2255_v61 = vpop.xlane.xlu0 %2254 }
 0xce3   : > { %v2006_v4 = vmax.f32 %v1998_v58, %v2002_v29  ;;  %v1534_v29 = vld [vmem:[#allocation3 + $0x8] sm:$0xff] }
 0xce4   : > { %2157 = vst.msk [vmem:[#allocation2 + $0x8] sm:$0xff] %vm2042_vm15, %v2007_v34  ;;  %v2009_v14 = vsub.f32 %v1999_v33, %v2007_v34 }
 0xce5   : > { %v2008_v59 = vsub.f32 %v1998_v58, %v2006_v4  ;;  %2156 = vst.msk [vmem:[#allocation2] sm:$0xff] %vm2042_vm15, %v2006_v4  ;;  %2016 = vperm.xlu1 %3216, %v2006_v4   ;;  %v1632_v4 = vld [vmem:[#allocation4] sm:$0xff] }
 0xce6   : > { %v2012_v16 = vmul.f32 1.442695, %v2009_v14 }
 0xce7   : > { %v2010_v35 = vmul.f32 1.442695, %v2008_v59 }
 0xce8   : > { %3231 = vpow2.f32 %v2012_v16  ;;  %v1633_v16 = vld [vmem:[#allocation4 + $0x8] sm:$0xff] }
 0xce9   : > { %2021 = vperm.xlu1 %3216, %v2007_v34  }
 0xceb   : > { %v3906_v62 = vld [vmem:[#allocation2 + $0x8] sm:$0xff] }
 0xcec   : > { %v3909_v63 = vmax.f32 %v3906_v62, %v2258_v60  ;;  %v3911_v0 = vld [vmem:[#allocation2] sm:$0xff] }
 0xced   : > { %v3914_v3 = vmax.f32 %v3911_v0, %v2255_v61  ;;  %1792 = vrot.lane.b32.xlu1 %v3799_v8, %s3387_s27 }
 0xcee   : > { %v2262_v12 = vsub.f32 %v3906_v62, %v3909_v63  ;;  %2410 = vst.msk [vmem:[#allocation2 + $0x8] sm:$0xff] %vm2295_vm0, %v3909_v63  ;;  %3217 = vset.pattern.permute.xlu1 %v3388_v24 }
 0xcef   : > { %v2261_v25 = vsub.f32 %v3911_v0, %v3914_v3  ;;  %2409 = vst.msk [vmem:[#allocation2] sm:$0xff] %vm2295_vm0, %v3914_v3 }
 0xcf1   : > { %2269 = vperm.xlu1 %3217, %v3914_v3  }
 0xcf2   : > { %v3937_v30 = vpop.eup %3231 }
 0xcf5   : > { %2274 = vperm.xlu1 %3217, %v3909_v63  }
 0xcf9   : > { %2045 = vrot.lane.b32.xlu1 %v3799_v8, %s3389_s7  ;;  %v1537_v8 = vsel %vm1416_vm12, %v3837_v37, 0.0 }
 0xcfa   : > { %3219 = vset.pattern.permute.xlu1 %v3379_v1  ;;  %v1515_v1 = vmul.f32 1.442695, %v1512_v23 }
 0xcfc   : > { %3233 = vpow2.f32 %v1515_v1 }
 0xcfd   : > { %3235 = vpow2.f32 %v1757_v2 }
 0xcfe   : > { %1541 = vadd.xlane.f32.xlu0 %v1540_v28  ;;  %3237 = vpow2.f32 %v1759_v5 }
 0xcff   : > { %3239 = vpow2.f32 %v2010_v35 }
 0xd06   : > { %v3946_v10 = vpop.eup %3233 }
 0xd07   : > { %v3949_v6 = vpop.eup %3235  ;;  %v1536_v33 = vmul.f32 %v3946_v10, %v1534_v29 }
 0xd08   : > { %v3953_v37 = vpop.eup %3237 }
 0xd09   : > { %v3956_v7 = vpop.eup %3239 }
 0xd14   : > { %1636 = vperm.xlu0 %3218, %v3934_v18  }
 0xd18   : > { %3221 = vset.pattern.permute.xlu0 %v3385_v27 }
 0xd19   : > { %2138 = vperm.xlu0 %3221, %v3937_v30  }
 0xd1d   : > { %1538 = vadd.xlane.f32.xlu1 %v1537_v8  ;;  %3224 = vset.pattern.permute.xlu0 %v3388_v24 }
 0xd2e   : > { %1641 = vperm.xlu1 %3219, %v3946_v10  }
 0xd32   : > { %3220 = vset.pattern.permute.xlu1 %v3384_v45 }
 0xd33   : > { %1880 = vperm.xlu1 %3220, %v3949_v6  }
 0xd37   : > { %1885 = vperm.xlu1 %3220, %v3953_v37  }
 0xd3b   : > { %3222 = vset.pattern.permute.xlu1 %v3385_v27 }
 0xd3c   : > { %2133 = vperm.xlu1 %3222, %v3956_v7  }
 0xd40   : > { %3223 = vset.pattern.permute.xlu1 %v3388_v24  ;;  %v1533_v24 = vld [vmem:[#allocation3] sm:$0xff] }
 0xd41   : > { %v1535_v28 = vmul.f32 %v3934_v18, %v1533_v24 }
 0xd59   : > { %v1769_v22 = vpop.permute.xlu1 %1768 }
 0xd5a   : > { %v1772_v23 = vsub.f32 %v3860_v47, %v1769_v22  ;;  %v1764_v13 = vpop.permute.xlu0 %1763 }
 0xd5b   : > { %v1771_v36 = vsub.f32 %v3862_v49, %v1764_v13 }
 0xd5c   : > { %v1775_v38 = vmul.f32 1.442695, %v1772_v23 }
 0xd5d   : > { %v1773_v17 = vmul.f32 1.442695, %v1771_v36 }
 0xd5e   : > { %3241 = vpow2.f32 %v1775_v38  ;;  %v2299_v27 = vpop.permute.xlu0 %2298 }
 0xd5f   : > { %3243 = vpow2.f32 %v1773_v17 }
 0xd64   : > { %v2017_v20 = vpop.permute.xlu1 %2016 }
 0xd65   : > { %v2024_v21 = vsub.f32 %v3870_v11, %v2017_v20 }
 0xd67   : > { %v2026_v46 = vmul.f32 1.442695, %v2024_v21 }
 0xd68   : > { %v3242_v53 = vpop.eup %3241  ;;  %v2022_v54 = vpop.permute.xlu1 %2021 }
 0xd69   : > { %v3244_v15 = vpop.eup %3243  ;;  %3245 = vpow2.f32 %v2026_v46  ;;  %v2025_v39 = vsub.f32 %v3868_v9, %v2022_v54  ;;  %v1784_v44 = vsel %vm1416_vm12, %v3242_v53, 0.0 }
 0xd6a   : > { %1785 = vadd.xlane.f32.xlu0 %v1784_v44  ;;  %2943 = vmatprep.mubr.msk.f32.mxu0 %vm1416_vm12, %v3244_v15  ;;  %v1781_v47 = vsel %vm1416_vm12, %v3244_v15, 0.0 }
 0xd6b   : > { %v2028_v49 = vmul.f32 1.442695, %v2025_v39  ;;  %1782 = vadd.xlane.f32.xlu1 %v1781_v47 }
 0xd6c   : > { %v1793_v26 = vpop.permute.xlu1 %1792 }
 0xd6d   : > { %3247 = vpow2.f32 %v2028_v49  ;;  %2941 = vmatprep.subr.mxu0 %v1793_v26 }
 0xd6e   : > { %2942 = vmatpush3.msra.mxu0 %v1793_v26 }
 0xd6f   : > { %2944 = vmatmul.mubr.msk.f32.vlgmr.msra.gmra.mrb[2].mxu0 %vm1416_vm12, %v3242_v53 }
 0xd70   : > { %v2270_v11 = vpop.permute.xlu1 %2269 }
 0xd71   : > { %v2277_v45 = vsub.f32 %v3878_v43, %v2270_v11 }
 0xd73   : > { %v3246_v48 = vpop.eup %3245  ;;  %v2279_v9 = vmul.f32 1.442695, %v2277_v45 }
 0xd74   : > { %v2275_v51 = vpop.permute.xlu1 %2274  ;;  %2953 = vmatprep.mubr.msk.f32.mxu0 %vm1416_vm12, %v3246_v48  ;;  %v2034_v41 = vsel %vm1416_vm12, %v3246_v48, 0.0 }
 0xd75   : > { %3249 = vpow2.f32 %v2279_v9  ;;  %v2278_v55 = vsub.f32 %v3876_v42, %v2275_v51  ;;  %2035 = vadd.xlane.f32.xlu1 %v2034_v41 }
 0xd77   : > { %v3248_v56 = vpop.eup %3247  ;;  %v2281_v57 = vmul.f32 1.442695, %v2278_v55 }
 0xd78   : > { %v2046_v31 = vpop.permute.xlu1 %2045  ;;  %v2037_v32 = vsel %vm1416_vm12, %v3248_v56, 0.0 }
 0xd79   : > { %3251 = vpow2.f32 %v2281_v57  ;;  %2038 = vadd.xlane.f32.xlu0 %v2037_v32  ;;  %2951 = vmatprep.subr.mxu0 %v2046_v31 }
 0xd7a   : > { %2952 = vmatpush3.msra.mxu0 %v2046_v31 }
 0xd7b   : > { %2954 = vmatmul.mubr.msk.f32.vlgmr.msra.gmra.mrb[4].mxu0 %vm1416_vm12, %v3248_v56  ;;  %2961 = vmatprep.subr.mxu0 %v2299_v27 }
 0xd7c   : > { %2962 = vmatpush3.msra.mxu0 %v2299_v27 }
 0xd7f   : > { %v3250_v43 = vpop.eup %3249 }
 0xd80   : > { %2963 = vmatprep.mubr.msk.f32.mxu0 %vm1416_vm12, %v3250_v43  ;;  %v2287_v42 = vsel %vm1416_vm12, %v3250_v43, 0.0 }
 0xd81   : > { %2288 = vadd.xlane.f32.xlu1 %v2287_v42 }
 0xd83   : > { %v3976_v19 = vpop.eup %3251 }
 0xd84   : > { %2964 = vmatmul.mubr.msk.f32.vlgmr.msra.gmra.mrb[6].mxu0 %vm1416_vm12, %v3976_v19  ;;  %v2290_v51 = vsel %vm1416_vm12, %v3976_v19, 0.0 }
 0xd8b   : > { %v1542_v34 = vpop.xlane.xlu0 %1541 }
 0xd8c   : > { %v1544_v58 = vadd.f32 %v1542_v34, %v1536_v33 }
 0xd8e   : > { %1547 = vst.msk [vmem:[#allocation3 + $0x8] sm:$0xff] %vm1545_vm13, %v1544_v58 }
 0xd93   : > { %v1637_v59 = vpop.permute.xlu0 %1636 }
 0xd94   : > { %v1644_v60 = vmul.f32 %v1637_v59, %v1632_v4 }
 0xd96   : > { %v1646_v61 = vadd.f32 %v1644_v60, %v3858_v52  ;;  %v1778_v52 = vld [vmem:[#allocation3 + $0x8] sm:$0xff] }
 0xd97   : > { %v1780_v18 = vmul.f32 %v3953_v37, %v1778_v52 }
 0xd98   : > { %1648 = vst.msk [vmem:[#allocation4] sm:$0xff] %vm1416_vm12, %v1646_v61  ;;  %v3988_v35 = vpop.permute.xlu0 %2138 }
 0xd9f   : > { %v1876_v62 = vld [vmem:[#allocation4] sm:$0xff] }
 0xdaa   : > { %v1539_v40 = vpop.xlane.xlu1 %1538 }
 0xdab   : > { %v1543_v14 = vadd.f32 %v1539_v40, %v1535_v28 }
 0xdad   : > { %1546 = vst.msk [vmem:[#allocation3] sm:$0xff] %vm1545_vm13, %v1543_v14 }
 0xdae   : > { %v1642_v8 = vpop.permute.xlu1 %1641 }
 0xdaf   : > { %v1645_v1 = vmul.f32 %v1642_v8, %v1633_v16 }
 0xdb1   : > { %v1647_v2 = vadd.f32 %v3856_v50, %v1645_v1  ;;  %v2263_v50 = vmul.f32 1.442695, %v2261_v25 }
 0xdb2   : > { %v1881_v5 = vpop.permute.xlu1 %1880 }
 0xdb3   : > { %1649 = vst.msk [vmem:[#allocation4 + $0x8] sm:$0xff] %vm1416_vm12, %v1647_v2  ;;  %3253 = vpow2.f32 %v2263_v50 }
 0xdb4   : > { %v1777_v23 = vld [vmem:[#allocation3] sm:$0xff] }
 0xdb5   : > { %v1779_v36 = vmul.f32 %v3949_v6, %v1777_v23 }
 0xdb6   : > { %v1886_v10 = vpop.permute.xlu1 %1885 }
 0xdba   : > { %v1877_v41 = vld [vmem:[#allocation4 + $0x8] sm:$0xff] }
 0xdbb   : > { %v3990_v22 = vpop.permute.xlu1 %2133  ;;  %v1889_v63 = vmul.f32 %v1886_v10, %v1877_v41 }
 0xdbd   : > { %v3254_v44 = vpop.eup %3253 }
 0xdf7   : > { %v1786_v13 = vpop.xlane.xlu0 %1785 }
 0xdf8   : > { %v1788_v38 = vadd.f32 %v1786_v13, %v1780_v18  ;;  %v1783_v17 = vpop.xlane.xlu1 %1782 }
 0xdf9   : > { %v1787_v20 = vadd.f32 %v1783_v17, %v1779_v36 }
 0xdfa   : > { %1791 = vst.msk [vmem:[#allocation3 + $0x8] sm:$0xff] %vm1789_vm14, %v1788_v38 }
 0xdfb   : > { %1790 = vst.msk [vmem:[#allocation3] sm:$0xff] %vm1789_vm14, %v1787_v20 }
 0xe01   : > { %v2031_v46 = vld [vmem:[#allocation3 + $0x8] sm:$0xff] }
 0xe02   : > { %v2030_v21 = vld [vmem:[#allocation3] sm:$0xff]  ;;  %v2036_v37 = vpop.xlane.xlu1 %2035  ;;  %v2033_v6 = vmul.f32 %v3937_v30, %v2031_v46  ;;  %v2265_v30 = vmul.f32 1.442695, %v2262_v12  ;;  %v1888_v12 = vmul.f32 %v1881_v5, %v1876_v62 }
 0xe03   : > { %v2032_v53 = vmul.f32 %v3956_v7, %v2030_v21 }
 0xe04   : > { %3255 = vpow2.f32 %v2265_v30 }
 0xe05   : > { %v2040_v54 = vadd.f32 %v2036_v37, %v2032_v53 }
 0xe06   : > { %v2039_v15 = vpop.xlane.xlu0 %2038 }
 0xe07   : > { %2043 = vst.msk [vmem:[#allocation3] sm:$0xff] %vm2042_vm15, %v2040_v54  ;;  %v2041_v39 = vadd.f32 %v2039_v15, %v2033_v6 }
 0xe09   : > { %2044 = vst.msk [vmem:[#allocation3 + $0x8] sm:$0xff] %vm2042_vm15, %v2041_v39 }
 0xe0e   : > { %v2283_v47 = vld [vmem:[#allocation3] sm:$0xff]  ;;  %v2289_v0 = vpop.xlane.xlu1 %2288  ;;  %v3256_v45 = vpop.eup %3255 }
 0xe0f   : > { %v2285_v49 = vmul.f32 %v3254_v44, %v2283_v47 }
 0xe10   : > { %v2284_v8 = vld [vmem:[#allocation3 + $0x8] sm:$0xff] }
 0xe11   : > { %v2293_v3 = vadd.f32 %v2289_v0, %v2285_v49  ;;  %v2286_v1 = vmul.f32 %v3256_v45, %v2284_v8 }
 0xe13   : > { %2296 = vst.msk [vmem:[#allocation3] sm:$0xff] %vm2295_vm0, %v2293_v3 }
 0xe42   : > { %v2945_v25 = vpop.f32.mrb[2].mxu0 }
 0xe43   : > { %v1867_v7 = vpop.f32.mrb[3].mxu0  ;;  %1894 = vrot.lane.b32.xlu1 %v2945_v25, %s3390_s8 }
 0xe44   : > { %1892 = vrot.lane.b32.xlu0 %v1867_v7, %s3390_s8 }
 0xe47   : > { %2386 = vperm.xlu1 %3223, %v3254_v44  }
 0xe4e   : > { %v2955_v26 = vpop.f32.mrb[4].mxu0 }
 0xe4f   : > { %v2120_v11 = vpop.f32.mrb[5].mxu0  ;;  %2147 = vrot.lane.b32.xlu1 %v2955_v26, %s3391_s20 }
 0xe53   : > { %2145 = vrot.lane.b32.xlu1 %v2120_v11, %s3391_s20 }
 0xe57   : > { %2391 = vperm.xlu1 %3223, %v3256_v45   ;;  %v2965_v48 = vpop.f32.mrb[6].mxu0 }
 0xe58   : > { %v2373_v9 = vpop.f32.mrb[7].mxu0 }
 0xe5b   : > { %2398 = vrot.lane.b32.xlu1 %v2373_v9, %s3392_s23 }
 0xe5f   : > { %2400 = vrot.lane.b32.xlu1 %v2965_v48, %s3392_s23 }
 0xe63   : > { %2291 = vadd.xlane.f32.xlu0 %v2290_v51 }
 0xeb5   : > { %v1895_v55 = vpop.permute.xlu1 %1894 }
 0xeb6   : > { %v1899_v56 = vadd.f32 %v1895_v55, %v1889_v63  ;;  %v1893_v57 = vpop.permute.xlu0 %1892 }
 0xeb7   : > { %v1898_v31 = vadd.f32 %v1893_v57, %v1888_v12 }
 0xeb8   : > { %1902 = vst.msk [vmem:[#allocation4 + $0x8] sm:$0xff] %vm1900_vm1, %v1899_v56 }
 0xeb9   : > { %1901 = vst.msk [vmem:[#allocation4] sm:$0xff] %vm1900_vm1, %v1898_v31 }
 0xebf   : > { %v2130_v27 = vld [vmem:[#allocation4 + $0x8] sm:$0xff] }
 0xec0   : > { %v2142_v43 = vmul.f32 %v3988_v35, %v2130_v27  ;;  %v2129_v29 = vld [vmem:[#allocation4] sm:$0xff] }
 0xec1   : > { %v2141_v33 = vmul.f32 %v3990_v22, %v2129_v29 }
 0xec6   : > { %v2387_v32 = vpop.permute.xlu1 %2386 }
 0xeca   : > { %v2148_v42 = vpop.permute.xlu1 %2147 }
 0xecb   : > { %v2152_v19 = vadd.f32 %v2148_v42, %v2142_v43 }
 0xecd   : > { %2155 = vst.msk [vmem:[#allocation4 + $0x8] sm:$0xff] %vm2153_vm2, %v2152_v19 }
 0xece   : > { %v2146_v34 = vpop.permute.xlu1 %2145 }
 0xecf   : > { %v2151_v58 = vadd.f32 %v2146_v34, %v2141_v33 }
 0xed1   : > { %2154 = vst.msk [vmem:[#allocation4] sm:$0xff] %vm2153_vm2, %v2151_v58 }
 0xed4   : > { %v2383_v28 = vld [vmem:[#allocation4 + $0x8] sm:$0xff] }
 0xed6   : > { %v2392_v4 = vpop.permute.xlu1 %2391 }
 0xed7   : > { %v2395_v40 = vmul.f32 %v2392_v4, %v2383_v28 }
 0xed8   : > { %v2382_v59 = vld [vmem:[#allocation4] sm:$0xff] }
 0xed9   : > { %v2394_v60 = vmul.f32 %v2387_v32, %v2382_v59 }
 0xeda   : > { %v2399_v61 = vpop.permute.xlu1 %2398 }
 0xedb   : > { %v2404_v24 = vadd.f32 %v2399_v61, %v2394_v60 }
 0xedd   : > { %2407 = vst.msk [vmem:[#allocation4] sm:$0xff] %vm2406_vm3, %v2404_v24 }
 0xede   : > { %v2401_v14 = vpop.permute.xlu1 %2400 }
 0xedf   : > { %v2405_v16 = vadd.f32 %v2401_v14, %v2395_v40 }
 0xee1   : > { %2408 = vst.msk [vmem:[#allocation4 + $0x8] sm:$0xff] %vm2406_vm3, %v2405_v16 }
 0xef0   : > { %v2292_v2 = vpop.xlane.xlu0 %2291 }
 0xef1   : > { %v2294_v5 = vadd.f32 %v2292_v2, %v2286_v1 }
 0xef3   : > { %2297 = vst.msk [vmem:[#allocation3 + $0x8] sm:$0xff] %vm2295_vm0, %v2294_v5 }
 0xef4 PF: > { %p2797_p5 = scmp.ne.s32.totalorder %s3345_s21, 1 }
 0xef5   : > { %v2415_v10 = vld [vmem:[#allocation3] sm:$0xff] (!%p2797_p5)  ;;  %v3393_v52 = vmov (!%p2797_p5), 0   ;;  %v3394_v22 = vmov (!%p2797_p5), 1   ;;  %v3395_v13 = vmov (!%p2797_p5), 2   ;;  %v3396_v36 = vmov (!%p2797_p5), 3   ;;  %v2501_v38 = vld [vmem:[%s4096_s3] sm:$0xff] (!%p2797_p5) }
 0xef6   : > { %2414 = sbr.rel (%p2797_p5) target bundleno = 4230 (0x1086), region = 56  ;;  %3257 = vset.pattern.permute.xlu0 (!%p2797_p5), %v3393_v52  ;;  %3263 = vrcp.f32 (!%p2797_p5), %v2415_v10  ;;  %3258 = vset.pattern.permute.xlu1 (!%p2797_p5), %v3394_v22  ;;  %v2502_v17 = vld [vmem:[%s4096_s3 + $0x8] sm:$0xff] (!%p2797_p5)  ;;  %v2503_v50 = vld [vmem:[%s4096_s3 + $0x10] sm:$0xff] (!%p2797_p5)  ;;  %v2504_v21 = vld [vmem:[%s4096_s3 + $0x18] sm:$0xff] (!%p2797_p5)  ;;  %vm2433_vm4 = vcmask (!%p2797_p5), 64512   ;;  %vm2454_vm5 = vcmask (!%p2797_p5), 130112  }
 0xef7   : > { %v3017_v20 = vpack.c.bf16 (!%p2797_p5), %v2502_v17, %v2501_v38  ;;  %v3021_v46 = vpack.c.bf16 (!%p2797_p5), %v2504_v21, %v2503_v50  ;;  %v2419_v53 = vld [vmem:[#allocation4] sm:$0xff] (!%p2797_p5)  ;;  %v2420_v6 = vld [vmem:[#allocation4 + $0x8] sm:$0xff] (!%p2797_p5)  ;;  %vm2475_vm6 = vcmask (!%p2797_p5), 195712   ;;  %vm2496_vm7 = vcmask (!%p2797_p5), 261312  }
 0xef8   : > { %vm2512_vm8 = vcmask (!%p2797_p5), 261120   ;;  %v2798_v57 = vld [vmem:[%s4097_s4] ss:$0 sm:$0xff] (!%p2797_p5) }
 0xef9   : > { %3018 = vmatprep.subr.bf16.mxu0 (!%p2797_p5), %v3017_v20 }
 0xefa   : > { %v2416_v35 = vld [vmem:[#allocation3 + $0x8] sm:$0xff] (!%p2797_p5)  ;;  %3020 = vmatpush3.bf16.msra.mxu0 (!%p2797_p5), %v3017_v20 }
 0xefb   : > { %3265 = vrcp.f32 (!%p2797_p5), %v2416_v35  ;;  %3022 = vmatprep.subr.bf16.mxu0 (!%p2797_p5), %v3021_v46 }
 0xefe   : > { %3024 = vmatpush3.bf16.msra.mxu0 %v3021_v46 }
 0xf00   : > { %v3264_v23 = vpop.eup %3263 }
 0xf01   : > { %2423 = vperm.xlu0 %3257, %v3264_v23   ;;  %2444 = vperm.xlu1 %3258, %v3264_v23  }
 0xf05   : > { %v3266_v18 = vpop.eup %3265 }
 0xf06   : > { %2428 = vperm.xlu0 %3257, %v3266_v18   ;;  %2449 = vperm.xlu1 %3258, %v3266_v18  }
 0xf0a   : > { %3259 = vset.pattern.permute.xlu0 %v3395_v13  ;;  %3260 = vset.pattern.permute.xlu1 %v3395_v13 }
 0xf0b   : > { %2465 = vperm.xlu0 %3259, %v3264_v23   ;;  %2470 = vperm.xlu1 %3260, %v3266_v18  }
 0xf0f   : > { %3261 = vset.pattern.permute.xlu1 %v3396_v36  ;;  %3262 = vset.pattern.permute.xlu0 %v3396_v36 }
 0xf10   : > { %2486 = vperm.xlu1 %3261, %v3264_v23   ;;  %2491 = vperm.xlu0 %3262, %v3266_v18  }
 0xf80   : > { %v2424_v37 = vpop.permute.xlu0 %2423  ;;  %v2445_v44 = vpop.permute.xlu1 %2444 }
 0xf81   : > { %v2431_v54 = vmul.f32 %v2424_v37, %v2419_v53 }
 0xf83   : > { %2434 = vst.msk [vmem:[#allocation4] sm:$0xff] %vm2433_vm4, %v2431_v54 }
 0xf85   : > { %v2429_v15 = vpop.permute.xlu0 %2428  ;;  %v2450_v0 = vpop.permute.xlu1 %2449 }
 0xf86   : > { %v2432_v39 = vmul.f32 %v2429_v15, %v2420_v6 }
 0xf88   : > { %2435 = vst.msk [vmem:[#allocation4 + $0x8] sm:$0xff] %vm2433_vm4, %v2432_v39 }
 0xf8a   : > { %v2440_v47 = vld [vmem:[#allocation4] sm:$0xff]  ;;  %v2466_v7 = vpop.permute.xlu0 %2465  ;;  %v2471_v11 = vpop.permute.xlu1 %2470 }
 0xf8b   : > { %v2452_v49 = vmul.f32 %v2445_v44, %v2440_v47 }
 0xf8d   : > { %2455 = vst.msk [vmem:[#allocation4] sm:$0xff] %vm2454_vm5, %v2452_v49 }
 0xf8f   : > { %v2441_v3 = vld [vmem:[#allocation4 + $0x8] sm:$0xff]  ;;  %v2487_v9 = vpop.permute.xlu1 %2486  ;;  %v2492_v62 = vpop.permute.xlu0 %2491 }
 0xf90   : > { %v2453_v25 = vmul.f32 %v2450_v0, %v2441_v3 }
 0xf92   : > { %2456 = vst.msk [vmem:[#allocation4 + $0x8] sm:$0xff] %vm2454_vm5, %v2453_v25 }
 0xf94   : > { %v2461_v30 = vld [vmem:[#allocation4] sm:$0xff] }
 0xf95   : > { %v2473_v26 = vmul.f32 %v2466_v7, %v2461_v30 }
 0xf97   : > { %2476 = vst.msk [vmem:[#allocation4] sm:$0xff] %vm2475_vm6, %v2473_v26 }
 0xf99   : > { %v2462_v45 = vld [vmem:[#allocation4 + $0x8] sm:$0xff] }
 0xf9a   : > { %v2474_v48 = vmul.f32 %v2471_v11, %v2462_v45 }
 0xf9c   : > { %2477 = vst.msk [vmem:[#allocation4 + $0x8] sm:$0xff] %vm2475_vm6, %v2474_v48 }
 0xf9e   : > { %v2482_v51 = vld [vmem:[#allocation4] sm:$0xff] }
 0xf9f   : > { %v2494_v41 = vmul.f32 %v2487_v9, %v2482_v51 }
 0xfa1   : > { %2497 = vst.msk [vmem:[#allocation4] sm:$0xff] %vm2496_vm7, %v2494_v41 }
 0xfa3   : > { %v2483_v63 = vld [vmem:[#allocation4 + $0x8] sm:$0xff] }
 0xfa4   : > { %v2495_v12 = vmul.f32 %v2492_v62, %v2483_v63 }
 0xfa6   : > { %2498 = vst.msk [vmem:[#allocation4 + $0x8] sm:$0xff] %vm2496_vm7, %v2495_v12 }
 0xfa8   : > { %v2499_v55 = vld [vmem:[#allocation4] sm:$0xff] }
 0xfa9   : > { %2974 = vmatprep.mubr.msk.f32.mxu0 %vm2512_vm8, %v2499_v55 }
 0xfad   : > { %v2500_v56 = vld [vmem:[#allocation4 + $0x8] sm:$0xff] }
 0xfae   : > { %2975 = vmatmul.mubr.msk.f32.vlgmr.msra.gmra.mrb[0].mxu0 %vm2512_vm8, %v2500_v56 }
0x1081   : > { %v2976_v31 = vpop.f32.mrb[0].mxu0 }
0x1082   : > { %v2591_v32 = vadd.f32 %v2976_v31, %v2798_v57  ;;  %v2585_v27 = vpop.f32.mrb[1].mxu0 }
0x1083   : > { %v2586_v43 = vadd.f32 %v2798_v57, %v2585_v27 }
0x1084   : > { %2595 = vst.msk [vmem:[%s3519_s6 + $0x8] sm:$0xff] %vm2512_vm8, %v2591_v32 }
0x1085   : > { %2594 = vst.msk [vmem:[%s3519_s6] sm:$0xff] %vm2512_vm8, %v2586_v43 }
0x1086 PF: > { %s2807_s15 = sshll.u32 %s3349_s22, 8  ;;  %s2612_s27 = sshll.u32 %s3519_s6, 4  ;;  %s4037_s27 = int_to_ptr.vmem [resolvable:$true] %s2612_s27 }
0x1087   : > { %s4034_s26 = scalar_lea.hbm %s4098_s5, %s2807_s15  ;;  %s4116_s7 = sand.u32 1, %s3337_s19  }
0x1088   : > { %s4041_s8 = scalar_lea.sflag [#allocation6], %s4116_s7  ;;  %s3267_s20 = scalar_lea.vmem %s4037_s27, 256 }
0x1089   : > { %p3268_p6 = scmp.ne.s32.totalorder %s4037_s27, %s3267_s20  ;;  %s3397_s22 = smov [#allocation5]  }
0x108a   : > { %s3271_s23 = sshll.u32 %s3397_s22, 4  ;;  %s3272_s23 = int_to_ptr.vmem [resolvable:$false] %s3271_s23 }
0x108b   : > { %p3269_p7 = pnand %p3268_p6, %p3479_p3  ;;  %s3273_s21 = scalar_lea.vmem %s3272_s23, 512 }
0x108c   : > { %p3274_p10 = scmp.lt.s32.totalorder %s4037_s27, %s3272_s23  ;;  %p3275_p11 = scmp.lt.s32.totalorder %s3273_s21, %s3267_s20 }
0x108d   : > { %p3270_p8 = pneg %p3269_p7 }
0x108e   : > { %p3276_p12 = por %p3275_p11, %p3274_p10 }
0x1090   : > { %p3277_p13 = pnand %p3276_p12, %p3270_p8 }
0x1092   : > { %3280 = shalt.err (!%p3277_p13)
}
0x1093   : > { %s3281_s6 = scalar_lea.hbm %s4034_s26, 256  ;;  %s3285_s9 = scalar_lea.hbm %s4098_s5, 512 }
0x1094   : > { %p3282_p0 = scmp.ne.s32.totalorder %s4034_s26, %s3281_s6  ;;  %p3286_p4 = scmp.lt.u32.totalorder %s4034_s26, %s4098_s5 }
0x1095   : > { %p3287_p5 = scmp.lt.u32.totalorder %s3285_s9, %s3281_s6  ;;  %p3289_p7 = scmp.lt.u32.totalorder %s3281_s6, %s4034_s26 }
0x1096   : > { %p3283_p1 = pnand %p3282_p0, %p3479_p3 }
0x1097   : > { %p3288_p6 = por %p3287_p5, %p3286_p4 }
0x1098   : > { %p3284_p2 = pneg %p3283_p1 }
0x1099   : > { %p3290_p8 = por %p3289_p7, %p3288_p6 }
0x109b   : > { %p3291_p10 = pnand %p3290_p8, %p3284_p2 }
0x109d   : > { %3294 = shalt.err (!%p3291_p10)
}
0x109e   : > { %s3398_s12 = smov 128   ;;  %s3399_s13 = smov 8  }
0x109f   : > { %3025 = dma.vmem_to_hbm [thread:$0]  (%p3479_p3), %s4037_s27, 256, %s4034_s26, %s4041_s8, %s3398_s12, %s3398_s12, %s3399_s13  }
0x10a0 PF: > { %p3031_p11 = scmp.ge.s32.totalorder %s3361_s25, 2  ;;  %s2627_s28 = sand.u32 1, %s3333_s18  }
0x10a1   : > { %s2628_s15 = scalar_lea.sflag [#allocation6], %s2627_s28 }
0x10a2   : > { %p3028_p12 = pnand %p3031_p11, %p3489_p9 }
0x10a4   : > { %3328 = dma.done.wait (!%p3028_p12), %s2628_s15, 256  }
0x10a5   : > { %3330 = vsyncadd (!%p3028_p12), %s2628_s15, 4294967040  ;;  %s18_s25 = sadd.s32 1, %s3361_s25   ;;  %s4118_s16 = sld [smem:[#allocation8_spill]] }
0x10a6   : > { %p15_p13 = scmp.ge.s32.totalorder %s18_s25, 6   ;;  %s4119_s20 = sld [smem:[#allocation14_spill]] }
0x10a7   : > { %s4120_s21 = sld [smem:[#allocation9_spill]]  ;;  %s4121_s22 = sld [smem:[#allocation10_spill]] }
0x10a8   : > { %s4122_s23 = sld [smem:[#allocation11_spill]]  ;;  %s4123_s24 = sld [smem:[#allocation12_spill]] }
0x10a9   : > { %s4124_s18 = smov %s3337_s19  ;;  %17 = sbr.rel (!%p15_p13) target bundleno = 5 (0x5), region = 97 }
0x10ab   : > { %s4125_s19 = smov %s4118_s16 }
0x10b0   :  { %2633 = vsyncpa [#allocation6], 1 }
0x10b1   :  { %2635 = vsyncpa [#allocation6 + $0x1], 1 }

</bundles_post_ra>
